<compile_context>
chip_gen: v7x
topology: tpu7x:2x2x1
jax: 0.10.0
libtpu: 0.0.40
codegen_flags: <defaults>
</compile_context>

<pallas_src>
import functools
from itertools import combinations

import jax
import jax.numpy as jnp
import numpy as np
from jax import lax
from jax.experimental import pallas as pl
from jax.experimental.pallas import tpu as pltpu

NUM_PAR = 2      # leading "parallel" grid axis (2 TensorCores on v7x)
TILE_T = 512     # triplets per grid step (multiple of 8)


def _round_up(x, m):
    return (x + m - 1) // m * m


def _triplet_loss_kernel(emb_ref, embt_ref, a_ref, p_ref, n_ref, out_ref,
                         gram_ref, norms_ref, acc_ref, *, margin, inv_t, num_real):
    pi = pl.program_id(0)
    pj = pl.program_id(1)
    num_j = pl.num_programs(1)
    tile_t = a_ref.shape[0]
    n_pad = gram_ref.shape[1]

    # Once per core: Gram matrix on the MXU + exact squared norms on the VPU.
    # Both stay resident in VMEM scratch for every T-tile that follows.
    @pl.when(pj == 0)
    def _init():
        gram_ref[...] = jnp.dot(emb_ref[...], embt_ref[...],
                                preferred_element_type=jnp.float32)   # [N, N]
        embt = embt_ref[...]                                          # [E, N]
        norms_ref[...] = jnp.sum(embt * embt, axis=0, keepdims=True)  # [1, N]
        acc_ref[...] = jnp.zeros_like(acc_ref)

    a = a_ref[...]                     # [TILE_T, 1] int32 anchor indices
    p = p_ref[...]                     # positives
    n = n_ref[...]                     # negatives

    col = lax.broadcasted_iota(jnp.int32, (tile_t, n_pad), 1)
    a_oh = (col == a).astype(jnp.float32)                              # one-hot anchors
    sel = (col == p).astype(jnp.float32) - (col == n).astype(jnp.float32)

    # Row gather of the Gram matrix on the MXU: g_rows[i, :] = G[a_i, :].
    g_rows = jnp.dot(a_oh, gram_ref[...], preferred_element_type=jnp.float32)

    # diff_i = D[a,p] - D[a,n] = (||p||^2 - ||n||^2) - 2*(G[a,p] - G[a,n]).
    norm_diff = jnp.sum(sel * norms_ref[...], axis=1, keepdims=True)   # [TILE_T, 1]
    gram_diff = jnp.sum(sel * g_rows, axis=1, keepdims=True)           # [TILE_T, 1]
    hinge = jnp.maximum(norm_diff - 2.0 * gram_diff + margin, 0.0)

    # Mask padded tail rows (unmasked, each would add `margin` to the sum).
    row = (pi * num_j + pj) * tile_t + lax.broadcasted_iota(jnp.int32, (tile_t, 1), 0)
    hinge = jnp.where(row < num_real, hinge, 0.0)

    acc_ref[...] += jnp.sum(hinge, axis=0, keepdims=True)              # [1, 1]

    @pl.when(pj == num_j - 1)
    def _finalize():
        out_ref[...] = jnp.broadcast_to(acc_ref[...] * inv_t, out_ref.shape)


def online_triplet_loss(embeddings, triplets, margin):
    """OnlineTripletLoss.forward given precomputed triplet indices.

    Returns (mean hinge loss, number of triplets) like the PyTorch module."""
    embeddings = jnp.asarray(embeddings, jnp.float32)
    triplets = jnp.asarray(triplets, jnp.int32)
    n, e_dim = map(int, embeddings.shape)
    t = int(triplets.shape[0])
    if t == 0:
        # PyTorch: mean of an empty tensor is NaN.
        return jnp.float32(np.nan), 0

    n_pad = _round_up(n, 8)
    emb = jnp.zeros((n_pad, e_dim), jnp.float32).at[:n, :].set(embeddings)
    embt = emb.T                                        # [E, N_pad], tiny

    num_j = -(-t // (NUM_PAR * TILE_T))                 # tiles per parallel slice
    t_pad = NUM_PAR * num_j * TILE_T
    idx = jnp.zeros((t_pad, 3), jnp.int32).at[:t, :].set(triplets)
    a_idx = idx[:, 0:1]
    p_idx = idx[:, 1:2]
    n_idx = idx[:, 2:3]

    kernel = functools.partial(_triplet_loss_kernel,
                               margin=float(margin), inv_t=1.0 / t, num_real=t)

    resident = lambda shape: pl.BlockSpec(shape, lambda pi, pj: (0, 0))
    tiled_idx = pl.BlockSpec((TILE_T, 1), lambda pi, pj: (pi * num_j + pj, 0))

    cost = pl.CostEstimate(
        flops=2 * n_pad * n_pad * e_dim                 # Gram matrix
              + 2 * t_pad * n_pad * n_pad               # one-hot row gather
              + 10 * t_pad * n_pad,                     # compares / selects / reduces
        transcendentals=0,
        bytes_accessed=4 * (2 * n_pad * e_dim + 3 * t_pad + NUM_PAR * 8 * 128),
    )

    out = pl.pallas_call(
        kernel,
        out_shape=jax.ShapeDtypeStruct((NUM_PAR * 8, 128), jnp.float32),
        grid=(NUM_PAR, num_j),
        in_specs=[resident((n_pad, e_dim)),             # embeddings, VMEM-resident
                  resident((e_dim, n_pad)),             # transposed copy (exact norms)
                  tiled_idx, tiled_idx, tiled_idx],     # anchor / pos / neg indices
        out_specs=pl.BlockSpec((8, 128), lambda pi, pj: (pi, 0)),
        scratch_shapes=[pltpu.VMEM((n_pad, n_pad), jnp.float32),   # Gram matrix
                        pltpu.VMEM((1, n_pad), jnp.float32),       # squared norms
                        pltpu.VMEM((1, 1), jnp.float32)],          # loss accumulator
        compiler_params=pltpu.CompilerParams(
            dimension_semantics=("parallel", "arbitrary")),
        cost_estimate=cost,
    )(emb, embt, a_idx, p_idx, n_idx)

    loss = jnp.sum(out[0::8, 0])                        # sum the per-core partial means
    return loss, t


def get_all_triplets(labels):
    """AllTripletSelector: every (anchor, positive, negative) index triple."""
    labels = np.asarray(labels)
    triplets = []
    for lab in np.unique(labels):
        mask = labels == lab
        pos_idx = np.where(mask)[0]
        neg_idx = np.where(~mask)[0]
        if len(pos_idx) < 2 or len(neg_idx) == 0:
            continue
        for a_i, p_i in combinations(pos_idx, 2):
            for n_i in neg_idx:
                triplets.append((a_i, p_i, n_i))
    return np.asarray(triplets, dtype=np.int32)


if __name__ == "__main__":
    key = jax.random.PRNGKey(0)

    n, e_dim, n_classes, margin = 16, 64, 4, 1.0
    embeddings = jax.random.normal(key, (n, e_dim), jnp.float32)
    target = np.repeat(np.arange(n_classes), n // n_classes).astype(np.int32)

    triplets = get_all_triplets(target)                  # [288, 3]
    loss, num_triplets = online_triplet_loss(
        embeddings, jnp.asarray(triplets), margin)
    loss = jax.block_until_ready(loss)

    # Pure numpy reference (exact PyTorch semantics), in float64.
    emb = np.asarray(embeddings, dtype=np.float64)
    a = emb[triplets[:, 0]]
    p = emb[triplets[:, 1]]
    ng = emb[triplets[:, 2]]
    ap = ((a - p) ** 2).sum(1)
    an = ((a - ng) ** 2).sum(1)
    ref = np.maximum(ap - an + margin, 0.0).mean()

    assert num_triplets == triplets.shape[0]
    # Tolerance leaves headroom for MXU f32 pass rounding in the Gram matrix;
    # structural errors (bad indices, unmasked padding, wrong sign) are O(1)+.
    assert np.allclose(np.asarray(loss), ref, rtol=2e-2, atol=2e-2), (float(loss), ref)
    print("KERNEL_OK")
</pallas_src>

<mosaic_0001>
module attributes {stable_mosaic.version = 11 : i64} {
  func.func @_triplet_loss_kernel(%arg0: i32, %arg1: i32, %arg2: memref<16x64xf32, #tpu.memory_space<vmem>>, %arg3: memref<64x16xf32, #tpu.memory_space<vmem>>, %arg4: memref<512x1xi32, #tpu.memory_space<vmem>>, %arg5: memref<512x1xi32, #tpu.memory_space<vmem>>, %arg6: memref<512x1xi32, #tpu.memory_space<vmem>>, %arg7: memref<8x128xf32, #tpu.memory_space<vmem>>, %arg8: memref<16x16xf32, #tpu.memory_space<vmem>>, %arg9: memref<1x16xf32, #tpu.memory_space<vmem>>, %arg10: memref<1x1xf32, #tpu.memory_space<vmem>>) attributes {dimension_semantics = [#tpu.dimension_semantics<parallel>, #tpu.dimension_semantics<arbitrary>], iteration_bounds = array<i64: 2, 1>, scalar_prefetch = 0 : i64, scratch_operands = 3 : i64, tpu.core_type = #tpu.core_type<tc>, window_params = [{pipeline_mode = #tpu.pipeline_mode<synchronous>, transform_indices = @transform_0, window_bounds = array<i64: 16, 64>}, {pipeline_mode = #tpu.pipeline_mode<synchronous>, transform_indices = @transform_1, window_bounds = array<i64: 64, 16>}, {transform_indices = @transform_2, window_bounds = array<i64: 512, 1>}, {transform_indices = @transform_3, window_bounds = array<i64: 512, 1>}, {transform_indices = @transform_4, window_bounds = array<i64: 512, 1>}, {transform_indices = @transform_5, window_bounds = array<i64: 8, 128>}]} {
    %c0_i32 = arith.constant 0 : i32
    %0 = arith.cmpi eq, %arg1, %c0_i32 : i32
    %1 = arith.extui %0 : i1 to i32
    %c0_i32_0 = arith.constant 0 : i32
    %2 = arith.cmpi ne, %1, %c0_i32_0 : i32
    scf.if %2 {
      %c0_23 = arith.constant 0 : index
      %c0_24 = arith.constant 0 : index
      %55 = vector.load %arg2[%c0_23, %c0_24] : memref<16x64xf32, #tpu.memory_space<vmem>>, vector<16x64xf32>
      %c0_25 = arith.constant 0 : index
      %c0_26 = arith.constant 0 : index
      %56 = vector.load %arg3[%c0_25, %c0_26] : memref<64x16xf32, #tpu.memory_space<vmem>>, vector<64x16xf32>
      %cst_27 = arith.constant dense<0.000000e+00> : vector<16x16xf32>
      %57 = tpu.matmul %55, %56, %cst_27 {dimension_numbers = #tpu.dot_dimension_numbers<[1], [0], [0], [1], [0, 0, 1, 1], [], []>} : vector<16x64xf32>, vector<64x16xf32>, vector<16x16xf32> -> vector<16x16xf32>
      %c0_28 = arith.constant 0 : index
      %c0_29 = arith.constant 0 : index
      %58 = vector.load %arg8[%c0_28, %c0_29] : memref<16x16xf32, #tpu.memory_space<vmem>>, vector<16x16xf32>
      tpu.vector_store %arg8[%c0_28, %c0_29], %57 {strides = array<i32>} : memref<16x16xf32, #tpu.memory_space<vmem>>, vector<16x16xf32>,
      %c0_30 = arith.constant 0 : index
      %c0_31 = arith.constant 0 : index
      %59 = vector.load %arg3[%c0_30, %c0_31] : memref<64x16xf32, #tpu.memory_space<vmem>>, vector<64x16xf32>
      %60 = arith.mulf %59, %59 : vector<64x16xf32>
      %cst_32 = arith.constant dense<0.000000e+00> : vector<16xf32>
      %61 = vector.multi_reduction <add>, %60, %cst_32 [0] : vector<64x16xf32> to vector<16xf32>
      %62 = vector.shape_cast %61 : vector<16xf32> to vector<1x16xf32>
      %c0_33 = arith.constant 0 : index
      %c0_34 = arith.constant 0 : index
      %63 = vector.load %arg9[%c0_33, %c0_34] : memref<1x16xf32, #tpu.memory_space<vmem>>, vector<1x16xf32>
      tpu.vector_store %arg9[%c0_33, %c0_34], %62 {strides = array<i32>} : memref<1x16xf32, #tpu.memory_space<vmem>>, vector<1x16xf32>,
      %cst_35 = arith.constant 0.000000e+00 : f32
      %64 = vector.broadcast %cst_35 : f32 to vector<1x1xf32>
      %c0_36 = arith.constant 0 : index
      %c0_37 = arith.constant 0 : index
      %65 = vector.load %arg10[%c0_36, %c0_37] : memref<1x1xf32, #tpu.memory_space<vmem>>, vector<1x1xf32>
      tpu.vector_store %arg10[%c0_36, %c0_37], %64 {strides = array<i32>} : memref<1x1xf32, #tpu.memory_space<vmem>>, vector<1x1xf32>,
    } else {
    }
    %c0 = arith.constant 0 : index
    %c0_1 = arith.constant 0 : index
    %3 = vector.load %arg4[%c0, %c0_1] : memref<512x1xi32, #tpu.memory_space<vmem>>, vector<512x1xi32>
    %c0_2 = arith.constant 0 : index
    %c0_3 = arith.constant 0 : index
    %4 = vector.load %arg5[%c0_2, %c0_3] : memref<512x1xi32, #tpu.memory_space<vmem>>, vector<512x1xi32>
    %c0_4 = arith.constant 0 : index
    %c0_5 = arith.constant 0 : index
    %5 = vector.load %arg6[%c0_4, %c0_5] : memref<512x1xi32, #tpu.memory_space<vmem>>, vector<512x1xi32>
    %6 = tpu.iota {dimensions = array<i32: 1>} : vector<512x16xi32>
    %7 = vector.broadcast %3 : vector<512x1xi32> to vector<512x16xi32>
    %8 = arith.cmpi eq, %6, %7 : vector<512x16xi32>
    %9 = arith.extui %8 : vector<512x16xi1> to vector<512x16xi32>
    %10 = arith.sitofp %9 : vector<512x16xi32> to vector<512x16xf32>
    %11 = vector.broadcast %4 : vector<512x1xi32> to vector<512x16xi32>
    %12 = arith.cmpi eq, %6, %11 : vector<512x16xi32>
    %13 = arith.extui %12 : vector<512x16xi1> to vector<512x16xi32>
    %14 = arith.sitofp %13 : vector<512x16xi32> to vector<512x16xf32>
    %15 = vector.broadcast %5 : vector<512x1xi32> to vector<512x16xi32>
    %16 = arith.cmpi eq, %6, %15 : vector<512x16xi32>
    %17 = arith.extui %16 : vector<512x16xi1> to vector<512x16xi32>
    %18 = arith.sitofp %17 : vector<512x16xi32> to vector<512x16xf32>
    %19 = arith.subf %14, %18 : vector<512x16xf32>
    %c0_6 = arith.constant 0 : index
    %c0_7 = arith.constant 0 : index
    %20 = vector.load %arg8[%c0_6, %c0_7] : memref<16x16xf32, #tpu.memory_space<vmem>>, vector<16x16xf32>
    %cst = arith.constant dense<0.000000e+00> : vector<512x16xf32>
    %21 = tpu.matmul %10, %20, %cst {dimension_numbers = #tpu.dot_dimension_numbers<[1], [0], [0], [1], [0, 0, 1, 1], [], []>} : vector<512x16xf32>, vector<16x16xf32>, vector<512x16xf32> -> vector<512x16xf32>
    %c0_8 = arith.constant 0 : index
    %c0_9 = arith.constant 0 : index
    %22 = vector.load %arg9[%c0_8, %c0_9] : memref<1x16xf32, #tpu.memory_space<vmem>>, vector<1x16xf32>
    %23 = vector.broadcast %22 : vector<1x16xf32> to vector<512x16xf32>
    %24 = arith.mulf %19, %23 : vector<512x16xf32>
    %cst_10 = arith.constant dense<0.000000e+00> : vector<512xf32>
    %25 = vector.multi_reduction <add>, %24, %cst_10 [1] : vector<512x16xf32> to vector<512xf32>
    %26 = vector.shape_cast %25 : vector<512xf32> to vector<512x1xf32>
    %27 = arith.mulf %19, %21 : vector<512x16xf32>
    %cst_11 = arith.constant dense<0.000000e+00> : vector<512xf32>
    %28 = vector.multi_reduction <add>, %27, %cst_11 [1] : vector<512x16xf32> to vector<512xf32>
    %29 = vector.shape_cast %28 : vector<512xf32> to vector<512x1xf32>
    %cst_12 = arith.constant 2.000000e+00 : f32
    %30 = vector.broadcast %cst_12 : f32 to vector<512x1xf32>
    %31 = arith.mulf %30, %29 : vector<512x1xf32>
    %32 = arith.subf %26, %31 : vector<512x1xf32>
    %cst_13 = arith.constant 1.000000e+00 : f32
    %33 = vector.broadcast %cst_13 : f32 to vector<512x1xf32>
    %34 = arith.addf %32, %33 : vector<512x1xf32>
    %cst_14 = arith.constant 0.000000e+00 : f32
    %35 = vector.broadcast %cst_14 : f32 to vector<512x1xf32>
    %36 = arith.maximumf %34, %35 : vector<512x1xf32>
    %c1_i32 = arith.constant 1 : i32
    %37 = arith.muli %arg0, %c1_i32 : i32
    %38 = arith.addi %37, %arg1 : i32
    %c512_i32 = arith.constant 512 : i32
    %39 = arith.muli %38, %c512_i32 : i32
    %40 = tpu.iota {dimensions = array<i32: 0>} : vector<512x1xi32>
    %41 = vector.broadcast %39 : i32 to vector<512x1xi32>
    %42 = arith.addi %41, %40 : vector<512x1xi32>
    %c288_i32 = arith.constant 288 : i32
    %43 = vector.broadcast %c288_i32 : i32 to vector<512x1xi32>
    %44 = arith.cmpi slt, %42, %43 : vector<512x1xi32>
    %cst_15 = arith.constant 0.000000e+00 : f32
    %45 = vector.broadcast %cst_15 : f32 to vector<512x1xf32>
    %46 = arith.select %44, %36, %45 : vector<512x1xi1>, vector<512x1xf32>
    %c0_16 = arith.constant 0 : index
    %c0_17 = arith.constant 0 : index
    %47 = vector.load %arg10[%c0_16, %c0_17] : memref<1x1xf32, #tpu.memory_space<vmem>>, vector<1x1xf32>
    %cst_18 = arith.constant dense<0.000000e+00> : vector<1xf32>
    %48 = vector.multi_reduction <add>, %46, %cst_18 [0] : vector<512x1xf32> to vector<1xf32>
    %49 = vector.shape_cast %48 : vector<1xf32> to vector<1x1xf32>
    %50 = arith.addf %47, %49 : vector<1x1xf32>
    %c0_19 = arith.constant 0 : index
    %c0_20 = arith.constant 0 : index
    %51 = vector.load %arg10[%c0_19, %c0_20] : memref<1x1xf32, #tpu.memory_space<vmem>>, vector<1x1xf32>
    tpu.vector_store %arg10[%c0_19, %c0_20], %50 {strides = array<i32>} : memref<1x1xf32, #tpu.memory_space<vmem>>, vector<1x1xf32>,
    %c0_i32_21 = arith.constant 0 : i32
    %52 = arith.cmpi eq, %arg1, %c0_i32_21 : i32
    %53 = arith.extui %52 : i1 to i32
    %c0_i32_22 = arith.constant 0 : i32
    %54 = arith.cmpi ne, %53, %c0_i32_22 : i32
    scf.if %54 {
      %c0_23 = arith.constant 0 : index
      %c0_24 = arith.constant 0 : index
      %55 = vector.load %arg10[%c0_23, %c0_24] : memref<1x1xf32, #tpu.memory_space<vmem>>, vector<1x1xf32>
      %cst_25 = arith.constant 0.00347222225 : f32
      %56 = vector.broadcast %cst_25 : f32 to vector<1x1xf32>
      %57 = arith.mulf %55, %56 : vector<1x1xf32>
      %58 = vector.shape_cast %57 : vector<1x1xf32> to vector<1x1xf32>
      %59 = vector.broadcast %58 : vector<1x1xf32> to vector<8x128xf32>
      %c0_26 = arith.constant 0 : index
      %c0_27 = arith.constant 0 : index
      %60 = vector.load %arg7[%c0_26, %c0_27] : memref<8x128xf32, #tpu.memory_space<vmem>>, vector<8x128xf32>
      tpu.vector_store %arg7[%c0_26, %c0_27], %59 {strides = array<i32>} : memref<8x128xf32, #tpu.memory_space<vmem>>, vector<8x128xf32>,
    } else {
    }
    return
  }
  func.func @transform_0(%arg0: i32, %arg1: i32) -> (i32, i32) {
    %c0_i32 = arith.constant 0 : i32
    %c0_i32_0 = arith.constant 0 : i32
    %c0_i32_1 = arith.constant 0 : i32
    return %c0_i32, %c0_i32_0 : i32, i32
  }
  func.func @transform_1(%arg0: i32, %arg1: i32) -> (i32, i32) {
    %c0_i32 = arith.constant 0 : i32
    %c0_i32_0 = arith.constant 0 : i32
    %c0_i32_1 = arith.constant 0 : i32
    return %c0_i32, %c0_i32_0 : i32, i32
  }
  func.func @transform_2(%arg0: i32, %arg1: i32) -> (i32, i32) {
    %c1_i32 = arith.constant 1 : i32
    %0 = arith.muli %arg0, %c1_i32 : i32
    %1 = arith.addi %0, %arg1 : i32
    %c0_i32 = arith.constant 0 : i32
    %c0_i32_0 = arith.constant 0 : i32
    return %1, %c0_i32 : i32, i32
  }
  func.func @transform_3(%arg0: i32, %arg1: i32) -> (i32, i32) {
    %c1_i32 = arith.constant 1 : i32
    %0 = arith.muli %arg0, %c1_i32 : i32
    %1 = arith.addi %0, %arg1 : i32
    %c0_i32 = arith.constant 0 : i32
    %c0_i32_0 = arith.constant 0 : i32
    return %1, %c0_i32 : i32, i32
  }
  func.func @transform_4(%arg0: i32, %arg1: i32) -> (i32, i32) {
    %c1_i32 = arith.constant 1 : i32
    %0 = arith.muli %arg0, %c1_i32 : i32
    %1 = arith.addi %0, %arg1 : i32
    %c0_i32 = arith.constant 0 : i32
    %c0_i32_0 = arith.constant 0 : i32
    return %1, %c0_i32 : i32, i32
  }
  func.func @transform_5(%arg0: i32, %arg1: i32) -> (i32, i32) {
    %c0_i32 = arith.constant 0 : i32
    %c0_i32_0 = arith.constant 0 : i32
    return %arg0, %c0_i32 : i32, i32
  }
}

</mosaic_0001>

<bundles_post_ra>
// kernel: tpu_custom_call.1
= control target key start
LH: loop header
LB: loop body
LE: loop exit
PB: predicated region body
PF: predicated region fallthrough
CT: control target
= control target key end

     0   :  { %10 = vsyncpa [#allocation6], 0  ;;  %s6781_s0 = inlined_call_operand.vmem [shape: f32[16,64], index: 0, kind: input, shape index: {}]   ;;  %s6782_s1 = inlined_call_operand.vmem [shape: f32[64,16], index: 1, kind: input, shape index: {}]   ;;  %s6783_s2 = inlined_call_operand.vmem [shape: s32[1024,1], index: 2, kind: input, shape index: {}]   ;;  %s6784_s3 = inlined_call_operand.vmem [shape: s32[1024,1], index: 3, kind: input, shape index: {}]   ;;  %s6785_s4 = inlined_call_operand.vmem [shape: s32[1024,1], index: 4, kind: input, shape index: {}]   ;;  %s6786_s5 = inlined_call_operand.hbm [shape: f32[16,128], index: 5, kind: output, shape index: {}]  }
   0x1   :  { %12 = vsyncpa [#allocation6 + $0x1], 0  ;;  %s4327_s18 = smov 0   ;;  %s4329_s19 = smov 0  }
   0x2   :  { %s4331_s20 = smov 0   ;;  %s4333_s21 = smov 0  }
   0x3   :  { %s4335_s22 = smov 0   ;;  %s4337_s23 = smov 0  }
   0x4 LB: > { %s3660_s24 = sadd.s32 4294967295, %s4292_s23   ;;  %s3661_s25 = sadd.s32 4294967294, %s4292_s23   ;;  %s4292_s23 = sphi %s4337_s23, %s18_s23   ;;  %s4288_s22 = sphi %s4335_s22, %s6996_s22   ;;  %s4284_s21 = sphi %s4333_s21, %s6995_s21   ;;  %s4280_s20 = sphi %s4331_s20, %s6994_s20   ;;  %s4276_s19 = sphi %s4329_s19, %s6993_s19   ;;  %s4272_s18 = sphi %s4327_s18, %s6992_s18  }
   0x5   : > { %s30_s26 = sadd.s32 1, %s4288_s22  ;;  %s163_s27 = sadd.s32 1, %s4280_s20 }
   0x6   : > { %p32_p0 = scmp.ge.s32.totalorder %s30_s26, 2  ;;  %p173_p1 = scmp.ne.s32.totalorder %s4280_s20, %s4276_s19 }
   0x7   : > { %p174_p2 = scmp.eq.s32.totalorder %s3660_s24, 1  ;;  %p179_p3 = scmp.ne.s32.totalorder %s4276_s19, %s4272_s18 }
   0x8   : > { %s6998_s26 = smov (%p32_p0, %s30_s26), 0  ;;  %p180_p5 = scmp.eq.s32.totalorder %s3661_s25, 1 }
   0x9   : > { %p4367_p4 = por %p174_p2, %p173_p1  ;;  %s160_s29 = ssub.s32 %s4288_s22, %s6998_s26 }
   0xa   : > { %p3664_p6 = scmp.ge.s32.totalorder %s4292_s23, 1  ;;  %p161_p7 = scmp.eq.s32.totalorder %s160_s29, 0 }
   0xb   : > { %p4374_p8 = por %p180_p5, %p179_p3  ;;  %p237_p9 = scmp.lt.s32.totalorder %s4292_s23, 3 }
   0xc   : > { %s4380_s6 = scalar_select %p161_p7, %s4280_s20, %s163_s27  }
   0xd   : > { %p238_p10 = pnand %p3664_p6, %p237_p9 }
   0xf   : > { %241 = sbr.rel (%p238_p10) target bundleno = 1159 (0x487), region = 40 }
  0x16   : > { %v308_v0 = vld [vmem:[%s6782_s1] sm:$0xff]  ;;  %v309_v1 = vld [vmem:[%s6782_s1 + $0x8] sm:$0xff]  ;;  %v310_v2 = vld [vmem:[%s6782_s1 + $0x10] sm:$0xff]  ;;  %s3666_s13 = sshll.u32 %s4284_s21, 6  ;;  %vm316_vm0 = vcmask 523264   ;;  %v4294_v4 = vmov 0  }
  0x17   : > { %v4131_v3 = vpack.c.bf16 %v309_v1, %v308_v0  ;;  %4211 = vset.pattern.permute.xlu1 %v4294_v4  ;;  %4210 = vset.pattern.permute.xlu0 %v4294_v4  ;;  %v311_v5 = vld [vmem:[%s6782_s1 + $0x18] sm:$0xff]  ;;  %p280_p11 = scmp.lt.s32.totalorder %s3666_s13, 127  ;;  %v312_v7 = vld [vmem:[%s6782_s1 + $0x20] sm:$0xff]  ;;  %v313_v8 = vld [vmem:[%s6782_s1 + $0x28] sm:$0xff]  ;;  %vm398_vm1 = vcmask 130048   ;;  %s4296_s8 = smov [#allocation5]  }
  0x18   : > { %v4135_v6 = vpack.c.bf16 %v311_v5, %v310_v2  ;;  %v306_v9 = vld [vmem:[%s6781_s0] sm:$0xff]  ;;  %v4139_v10 = vpack.c.bf16 %v313_v8, %v312_v7  ;;  %v314_v11 = vld [vmem:[%s6782_s1 + $0x30] sm:$0xff]  ;;  %v315_v12 = vld [vmem:[%s6782_s1 + $0x38] sm:$0xff] }
  0x19   : > { %4132 = vmatprep.subr.bf16.mxu0 %v4131_v3  ;;  %s7000_s13 = smov (!%p280_p11, %s3666_s13), 127  ;;  %4028 = vmatprep.mubr.msk.f32.mxu0 %vm316_vm0, %v306_v9  ;;  %v4143_v16 = vpack.c.bf16 %v315_v12, %v314_v11  ;;  %v307_v20 = vld [vmem:[%s6781_s0 + $0x8] sm:$0xff] }
  0x1a   : > { %4134 = vmatpush3.bf16.msra.mxu0 %v4131_v3  ;;  %s4405_s7 = sshll.u32 %s7000_s13, 3  ;;  %s3933_s13 = sshll.u32 %s4284_s21, 7 }
  0x1b   : > { %4136 = vmatprep.subr.bf16.mxu0 %v4135_v6  ;;  %s4411_s10 = scalar_lea.vmem %s6783_s2, %s4405_s7  ;;  %s4491_s25 = scalar_lea.vmem %s6784_s3, %s4405_s7 }
  0x1c   : > { %v444_v13 = vld [vmem:[%s4411_s10 + $0x10] sm:$0xff]  ;;  %v442_v14 = vld [vmem:[%s4411_s10] sm:$0xff]  ;;  %v445_v15 = vld [vmem:[%s4411_s10 + $0x18] sm:$0xff]  ;;  %s4802_s11 = scalar_lea.vmem %s6785_s4, %s4405_s7  ;;  %s3931_s7 = sshll.u32 %s4284_s21, 9 }
  0x1d   : > { %643 = vperm.xlu1 %4211, %v444_v13   ;;  %637 = vperm.xlu0 %4210, %v442_v14   ;;  %v443_v17 = vld [vmem:[%s4411_s10 + $0x8] sm:$0xff]  ;;  %v446_v19 = vld [vmem:[%s4411_s10 + $0x20] sm:$0xff]  ;;  %v449_v21 = vld [vmem:[%s4411_s10 + $0x38] sm:$0xff]  ;;  %v6787_v14 = vlaneseq  ;;  %s6736_s24 = scalar_lea.hbm %s6786_s5, %s3933_s13  ;;  %s4218_s21 = sshll.u32 %s4296_s8, 4  ;;  %s4219_s21 = int_to_ptr.vmem [resolvable:$false] %s4218_s21 }
  0x1e   : > { %4138 = vmatpush3.bf16.msra.mxu0 %v4135_v6  ;;  %v447_v18 = vld [vmem:[%s4411_s10 + $0x28] sm:$0xff]  ;;  %v448_v22 = vld [vmem:[%s4411_s10 + $0x30] sm:$0xff]  ;;  %v450_v24 = vld [vmem:[%s4411_s10 + $0x40] sm:$0xff]  ;;  %s4220_s9 = scalar_lea.vmem %s4219_s21, 256 }
  0x1f   : > { %4140 = vmatprep.subr.bf16.mxu0 %v4139_v10  ;;  %v451_v23 = vld [vmem:[%s4411_s10 + $0x48] sm:$0xff]  ;;  %v453_v25 = vld [vmem:[%s4411_s10 + $0x58] sm:$0xff]  ;;  %v452_v26 = vld [vmem:[%s4411_s10 + $0x50] sm:$0xff] }
  0x20   : > { %v455_v27 = vld [vmem:[%s4411_s10 + $0x68] sm:$0xff]  ;;  %v454_v28 = vld [vmem:[%s4411_s10 + $0x60] sm:$0xff]  ;;  %v457_v29 = vld [vmem:[%s4411_s10 + $0x78] sm:$0xff] }
  0x21   : > { %646 = vperm.xlu1 %4211, %v445_v15   ;;  %640 = vperm.xlu0 %4210, %v443_v17   ;;  %v456_v30 = vld [vmem:[%s4411_s10 + $0x70] sm:$0xff]  ;;  %v459_v31 = vld [vmem:[%s4411_s10 + $0x88] sm:$0xff]  ;;  %v458_v32 = vld [vmem:[%s4411_s10 + $0x80] sm:$0xff] }
  0x22   : > { %4142 = vmatpush3.bf16.msra.mxu0 %v4139_v10  ;;  %v461_v33 = vld [vmem:[%s4411_s10 + $0x98] sm:$0xff]  ;;  %v460_v34 = vld [vmem:[%s4411_s10 + $0x90] sm:$0xff]  ;;  %v463_v35 = vld [vmem:[%s4411_s10 + $0xa8] sm:$0xff] }
  0x23   : > { %4144 = vmatprep.subr.bf16.mxu0 %v4143_v16  ;;  %v462_v36 = vld [vmem:[%s4411_s10 + $0xa0] sm:$0xff]  ;;  %v465_v37 = vld [vmem:[%s4411_s10 + $0xb8] sm:$0xff]  ;;  %v464_v38 = vld [vmem:[%s4411_s10 + $0xb0] sm:$0xff] }
  0x24   : > { %v467_v39 = vld [vmem:[%s4411_s10 + $0xc8] sm:$0xff]  ;;  %v466_v40 = vld [vmem:[%s4411_s10 + $0xc0] sm:$0xff]  ;;  %v469_v41 = vld [vmem:[%s4411_s10 + $0xd8] sm:$0xff] }
  0x25   : > { %652 = vperm.xlu1 %4211, %v447_v18   ;;  %649 = vperm.xlu0 %4210, %v446_v19   ;;  %v468_v42 = vld [vmem:[%s4411_s10 + $0xd0] sm:$0xff]  ;;  %v471_v43 = vld [vmem:[%s4411_s10 + $0xe8] sm:$0xff]  ;;  %v470_v44 = vld [vmem:[%s4411_s10 + $0xe0] sm:$0xff] }
  0x26   : > { %4146 = vmatpush3.bf16.msra.mxu0 %v4143_v16  ;;  %v473_v45 = vld [vmem:[%s4411_s10 + $0xf8] sm:$0xff]  ;;  %v472_v46 = vld [vmem:[%s4411_s10 + $0xf0] sm:$0xff]  ;;  %v475_v47 = vld [vmem:[%s4411_s10 + $0x108] sm:$0xff]  ;;  %v4494_v16 = vand.u32 127, %v6787_v14 }
  0x27   : > { %v474_v48 = vld [vmem:[%s4411_s10 + $0x100] sm:$0xff]  ;;  %v477_v49 = vld [vmem:[%s4411_s10 + $0x118] sm:$0xff]  ;;  %v476_v50 = vld [vmem:[%s4411_s10 + $0x110] sm:$0xff] }
  0x28   : > { %v479_v51 = vld [vmem:[%s4411_s10 + $0x128] sm:$0xff]  ;;  %v478_v52 = vld [vmem:[%s4411_s10 + $0x120] sm:$0xff]  ;;  %v481_v53 = vld [vmem:[%s4411_s10 + $0x138] sm:$0xff] }
  0x29   : > { %4029 = vmatmul.mubr.msk.f32.vlgmr.msra.gmra.mrb[0].mxu0 %vm316_vm0, %v307_v20  ;;  %658 = vperm.xlu1 %4211, %v449_v21   ;;  %v480_v54 = vld [vmem:[%s4411_s10 + $0x130] sm:$0xff]  ;;  %v483_v55 = vld [vmem:[%s4411_s10 + $0x148] sm:$0xff]  ;;  %v482_v56 = vld [vmem:[%s4411_s10 + $0x140] sm:$0xff] }
  0x2a   : > { %655 = vperm.xlu0 %4210, %v448_v22   ;;  %v485_v57 = vld [vmem:[%s4411_s10 + $0x158] sm:$0xff]  ;;  %v484_v58 = vld [vmem:[%s4411_s10 + $0x150] sm:$0xff]  ;;  %v487_v59 = vld [vmem:[%s4411_s10 + $0x168] sm:$0xff]  ;;  %v6788_v22 = vmov 0.0  }
  0x2b   : > { %v486_v60 = vld [vmem:[%s4411_s10 + $0x160] sm:$0xff]  ;;  %v489_v61 = vld [vmem:[%s4411_s10 + $0x178] sm:$0xff]  ;;  %v488_v62 = vld [vmem:[%s4411_s10 + $0x170] sm:$0xff] }
  0x2c   : > { %v491_v63 = vld [vmem:[%s4411_s10 + $0x188] sm:$0xff]  ;;  %v490_v0 = vld [vmem:[%s4411_s10 + $0x180] sm:$0xff]  ;;  %v493_v1 = vld [vmem:[%s4411_s10 + $0x198] sm:$0xff] }
  0x2d   : > { %664 = vperm.xlu1 %4211, %v451_v23   ;;  %v492_v2 = vld [vmem:[%s4411_s10 + $0x190] sm:$0xff]  ;;  %v495_v3 = vld [vmem:[%s4411_s10 + $0x1a8] sm:$0xff]  ;;  %v494_v4 = vld [vmem:[%s4411_s10 + $0x1a0] sm:$0xff] }
  0x2e   : > { %661 = vperm.xlu0 %4210, %v450_v24   ;;  %v497_v5 = vld [vmem:[%s4411_s10 + $0x1b8] sm:$0xff]  ;;  %v496_v6 = vld [vmem:[%s4411_s10 + $0x1b0] sm:$0xff]  ;;  %v499_v7 = vld [vmem:[%s4411_s10 + $0x1c8] sm:$0xff] }
  0x2f   : > { %v498_v8 = vld [vmem:[%s4411_s10 + $0x1c0] sm:$0xff]  ;;  %v501_v9 = vld [vmem:[%s4411_s10 + $0x1d8] sm:$0xff]  ;;  %v500_v10 = vld [vmem:[%s4411_s10 + $0x1d0] sm:$0xff] }
  0x30   : > { %v503_v11 = vld [vmem:[%s4411_s10 + $0x1e8] sm:$0xff]  ;;  %v502_v12 = vld [vmem:[%s4411_s10 + $0x1e0] sm:$0xff]  ;;  %v505_v13 = vld [vmem:[%s4411_s10 + $0x1f8] sm:$0xff] }
  0x31   : > { %670 = vperm.xlu1 %4211, %v453_v25   ;;  %v504_v15 = vld [vmem:[%s4411_s10 + $0x1f0] sm:$0xff]  ;;  %v507_v17 = vld [vmem:[%s4491_s25 + $0x8] sm:$0xff]  ;;  %v506_v18 = vld [vmem:[%s4491_s25] sm:$0xff] }
  0x32   : > { %667 = vperm.xlu0 %4210, %v452_v26   ;;  %v509_v21 = vld [vmem:[%s4491_s25 + $0x18] sm:$0xff]  ;;  %v508_v24 = vld [vmem:[%s4491_s25 + $0x10] sm:$0xff] }
  0x35   : > { %676 = vperm.xlu1 %4211, %v455_v27   ;;  %v511_v27 = vld [vmem:[%s4491_s25 + $0x28] sm:$0xff] }
  0x36   : > { %673 = vperm.xlu0 %4210, %v454_v28   ;;  %v510_v28 = vld [vmem:[%s4491_s25 + $0x20] sm:$0xff] }
  0x39   : > { %682 = vperm.xlu1 %4211, %v457_v29  }
  0x3a   : > { %679 = vperm.xlu0 %4210, %v456_v30  }
  0x3d   : > { %688 = vperm.xlu1 %4211, %v459_v31   ;;  %v513_v31 = vld [vmem:[%s4491_s25 + $0x38] sm:$0xff] }
  0x3e   : > { %685 = vperm.xlu0 %4210, %v458_v32   ;;  %v512_v32 = vld [vmem:[%s4491_s25 + $0x30] sm:$0xff] }
  0x41   : > { %694 = vperm.xlu1 %4211, %v461_v33  }
  0x42   : > { %691 = vperm.xlu0 %4210, %v460_v34  }
  0x45   : > { %700 = vperm.xlu1 %4211, %v463_v35   ;;  %v515_v35 = vld [vmem:[%s4491_s25 + $0x48] sm:$0xff] }
  0x46   : > { %697 = vperm.xlu0 %4210, %v462_v36   ;;  %v514_v36 = vld [vmem:[%s4491_s25 + $0x40] sm:$0xff] }
  0x49   : > { %706 = vperm.xlu1 %4211, %v465_v37  }
  0x4a   : > { %703 = vperm.xlu0 %4210, %v464_v38  }
  0x4d   : > { %712 = vperm.xlu1 %4211, %v467_v39   ;;  %v517_v39 = vld [vmem:[%s4491_s25 + $0x58] sm:$0xff] }
  0x4e   : > { %709 = vperm.xlu0 %4210, %v466_v40   ;;  %v516_v40 = vld [vmem:[%s4491_s25 + $0x50] sm:$0xff] }
  0x51   : > { %718 = vperm.xlu1 %4211, %v469_v41  }
  0x52   : > { %715 = vperm.xlu0 %4210, %v468_v42  }
  0x55   : > { %724 = vperm.xlu1 %4211, %v471_v43   ;;  %v519_v43 = vld [vmem:[%s4491_s25 + $0x68] sm:$0xff] }
  0x56   : > { %721 = vperm.xlu0 %4210, %v470_v44   ;;  %v518_v44 = vld [vmem:[%s4491_s25 + $0x60] sm:$0xff] }
  0x59   : > { %730 = vperm.xlu1 %4211, %v473_v45  }
  0x5a   : > { %727 = vperm.xlu0 %4210, %v472_v46  }
  0x5d   : > { %736 = vperm.xlu1 %4211, %v475_v47   ;;  %v521_v47 = vld [vmem:[%s4491_s25 + $0x78] sm:$0xff] }
  0x5e   : > { %733 = vperm.xlu0 %4210, %v474_v48   ;;  %v520_v48 = vld [vmem:[%s4491_s25 + $0x70] sm:$0xff] }
  0x61   : > { %742 = vperm.xlu1 %4211, %v477_v49  }
  0x62   : > { %739 = vperm.xlu0 %4210, %v476_v50  }
  0x65   : > { %748 = vperm.xlu1 %4211, %v479_v51   ;;  %v523_v51 = vld [vmem:[%s4491_s25 + $0x88] sm:$0xff] }
  0x66   : > { %745 = vperm.xlu0 %4210, %v478_v52   ;;  %v522_v52 = vld [vmem:[%s4491_s25 + $0x80] sm:$0xff] }
  0x69   : > { %754 = vperm.xlu1 %4211, %v481_v53  }
  0x6a   : > { %751 = vperm.xlu0 %4210, %v480_v54  }
  0x6d   : > { %760 = vperm.xlu1 %4211, %v483_v55   ;;  %v525_v55 = vld [vmem:[%s4491_s25 + $0x98] sm:$0xff] }
  0x6e   : > { %757 = vperm.xlu0 %4210, %v482_v56   ;;  %v524_v56 = vld [vmem:[%s4491_s25 + $0x90] sm:$0xff] }
  0x71   : > { %766 = vperm.xlu1 %4211, %v485_v57  }
  0x72   : > { %763 = vperm.xlu0 %4210, %v484_v58  }
  0x75   : > { %772 = vperm.xlu1 %4211, %v487_v59   ;;  %v527_v59 = vld [vmem:[%s4491_s25 + $0xa8] sm:$0xff] }
  0x76   : > { %769 = vperm.xlu0 %4210, %v486_v60   ;;  %v526_v60 = vld [vmem:[%s4491_s25 + $0xa0] sm:$0xff] }
  0x79   : > { %778 = vperm.xlu1 %4211, %v489_v61  }
  0x7a   : > { %775 = vperm.xlu0 %4210, %v488_v62  }
  0x7d   : > { %784 = vperm.xlu1 %4211, %v491_v63   ;;  %v529_v63 = vld [vmem:[%s4491_s25 + $0xb8] sm:$0xff] }
  0x7e   : > { %781 = vperm.xlu0 %4210, %v490_v0   ;;  %v528_v0 = vld [vmem:[%s4491_s25 + $0xb0] sm:$0xff] }
  0x81   : > { %790 = vperm.xlu1 %4211, %v493_v1  }
  0x82   : > { %787 = vperm.xlu0 %4210, %v492_v2  }
  0x85   : > { %796 = vperm.xlu1 %4211, %v495_v3   ;;  %v531_v3 = vld [vmem:[%s4491_s25 + $0xc8] sm:$0xff] }
  0x86   : > { %793 = vperm.xlu0 %4210, %v494_v4   ;;  %v530_v4 = vld [vmem:[%s4491_s25 + $0xc0] sm:$0xff] }
  0x89   : > { %802 = vperm.xlu1 %4211, %v497_v5  }
  0x8a   : > { %799 = vperm.xlu0 %4210, %v496_v6  }
  0x8d   : > { %808 = vperm.xlu1 %4211, %v499_v7   ;;  %v533_v7 = vld [vmem:[%s4491_s25 + $0xd8] sm:$0xff] }
  0x8e   : > { %805 = vperm.xlu0 %4210, %v498_v8   ;;  %v532_v8 = vld [vmem:[%s4491_s25 + $0xd0] sm:$0xff] }
  0x91   : > { %814 = vperm.xlu1 %4211, %v501_v9  }
  0x92   : > { %811 = vperm.xlu0 %4210, %v500_v10  }
  0x95   : > { %820 = vperm.xlu1 %4211, %v503_v11   ;;  %v535_v11 = vld [vmem:[%s4491_s25 + $0xe8] sm:$0xff] }
  0x96   : > { %817 = vperm.xlu0 %4210, %v502_v12   ;;  %v534_v12 = vld [vmem:[%s4491_s25 + $0xe0] sm:$0xff] }
  0x99   : > { %826 = vperm.xlu1 %4211, %v505_v13  }
  0x9a   : > { %823 = vperm.xlu0 %4210, %v504_v15  }
  0x9c   : > { %v4498_v19 = vpop.permute.xlu1 %643  ;;  %v638_v20 = vpop.permute.xlu0 %637 }
  0x9d   : > { %1024 = vperm.xlu1 %4211, %v507_v17   ;;  %vm828_vm2 = vcmp.eq.s32.totalorder %v4494_v16, %v638_v20  ;;  %v537_v17 = vld [vmem:[%s4491_s25 + $0xf8] sm:$0xff]  ;;  %v536_v20 = vld [vmem:[%s4491_s25 + $0xf0] sm:$0xff]  ;;  %vm830_vm4 = vcmp.eq.s32.totalorder %v4494_v16, %v4498_v19 }
  0x9e   : > { %1021 = vperm.xlu0 %4210, %v506_v18   ;;  %v3674_v23 = vsel %vm828_vm2, 1.0, %v6788_v22 }
  0x9f   : > { %4035 = vmatprep.mubr.msk.f32.mxu0 %vm398_vm1, %v3674_v23 }
  0xa0   : > { %v4505_v25 = vpop.permute.xlu1 %646  ;;  %v4507_v26 = vpop.permute.xlu0 %640 }
  0xa1   : > { %1030 = vperm.xlu1 %4211, %v509_v21   ;;  %vm829_vm5 = vcmp.eq.s32.totalorder %v4494_v16, %v4507_v26  ;;  %vm831_vm8 = vcmp.eq.s32.totalorder %v4494_v16, %v4505_v25  ;;  %v562_v26 = vld [vmem:[%s4491_s25 + $0x1c0] sm:$0xff] }
  0xa2   : > { %1027 = vperm.xlu0 %4210, %v508_v24   ;;  %v539_v24 = vld [vmem:[%s4491_s25 + $0x108] sm:$0xff] }
  0xa4   : > { %v4511_v29 = vpop.permute.xlu1 %652  ;;  %v4513_v30 = vpop.permute.xlu0 %649 }
  0xa5   : > { %1036 = vperm.xlu1 %4211, %v511_v27   ;;  %v538_v27 = vld [vmem:[%s4491_s25 + $0x100] sm:$0xff]  ;;  %vm832_vm10 = vcmp.eq.s32.totalorder %v4494_v16, %v4513_v30  ;;  %v565_v30 = vld [vmem:[%s4491_s25 + $0x1d8] sm:$0xff]  ;;  %vm833_vm12 = vcmp.eq.s32.totalorder %v4494_v16, %v4511_v29 }
  0xa6   : > { %1033 = vperm.xlu0 %4210, %v510_v28  }
  0xa8   : > { %v4517_v33 = vpop.permute.xlu1 %658 }
  0xa9   : > { %v4519_v34 = vpop.permute.xlu0 %655  ;;  %1042 = vperm.xlu1 %4211, %v513_v31   ;;  %vm835_vm0 = vcmp.eq.s32.totalorder %v4494_v16, %v4517_v33 }
  0xaa   : > { %1039 = vperm.xlu0 %4210, %v512_v32   ;;  %v541_v32 = vld [vmem:[%s4491_s25 + $0x118] sm:$0xff]  ;;  %vm834_vm14 = vcmp.eq.s32.totalorder %v4494_v16, %v4519_v34  ;;  %v567_v34 = vld [vmem:[%s4491_s25 + $0x1e8] sm:$0xff] }
  0xac   : > { %v4523_v37 = vpop.permute.xlu1 %664 }
  0xad   : > { %v4525_v38 = vpop.permute.xlu0 %661  ;;  %1048 = vperm.xlu1 %4211, %v515_v35   ;;  %v540_v35 = vld [vmem:[%s4491_s25 + $0x110] sm:$0xff] }
  0xae   : > { %1045 = vperm.xlu0 %4210, %v514_v36  }
  0xb0   : > { %v4529_v41 = vpop.permute.xlu1 %670 }
  0xb1   : > { %v4531_v42 = vpop.permute.xlu0 %667  ;;  %1054 = vperm.xlu1 %4211, %v517_v39  }
  0xb2   : > { %1051 = vperm.xlu0 %4210, %v516_v40   ;;  %v543_v40 = vld [vmem:[%s4491_s25 + $0x128] sm:$0xff] }
  0xb4   : > { %v4535_v45 = vpop.permute.xlu1 %676 }
  0xb5   : > { %v4537_v46 = vpop.permute.xlu0 %673  ;;  %1060 = vperm.xlu1 %4211, %v519_v43   ;;  %v542_v43 = vld [vmem:[%s4491_s25 + $0x120] sm:$0xff] }
  0xb6   : > { %1057 = vperm.xlu0 %4210, %v518_v44  }
  0xb8   : > { %v4541_v49 = vpop.permute.xlu1 %682 }
  0xb9   : > { %v4543_v50 = vpop.permute.xlu0 %679  ;;  %1066 = vperm.xlu1 %4211, %v521_v47  }
  0xba   : > { %1063 = vperm.xlu0 %4210, %v520_v48   ;;  %v545_v48 = vld [vmem:[%s4491_s25 + $0x138] sm:$0xff] }
  0xbc   : > { %v4547_v53 = vpop.permute.xlu1 %688 }
  0xbd   : > { %v4549_v54 = vpop.permute.xlu0 %685  ;;  %1072 = vperm.xlu1 %4211, %v523_v51   ;;  %v544_v51 = vld [vmem:[%s4491_s25 + $0x130] sm:$0xff] }
  0xbe   : > { %1069 = vperm.xlu0 %4210, %v522_v52  }
  0xc0   : > { %v4553_v57 = vpop.permute.xlu1 %694 }
  0xc1   : > { %v4555_v58 = vpop.permute.xlu0 %691  ;;  %1078 = vperm.xlu1 %4211, %v525_v55  }
  0xc2   : > { %1075 = vperm.xlu0 %4210, %v524_v56   ;;  %v547_v56 = vld [vmem:[%s4491_s25 + $0x148] sm:$0xff] }
  0xc4   : > { %v4559_v61 = vpop.permute.xlu1 %700 }
  0xc5   : > { %v4561_v62 = vpop.permute.xlu0 %697  ;;  %1084 = vperm.xlu1 %4211, %v527_v59   ;;  %v546_v59 = vld [vmem:[%s4491_s25 + $0x140] sm:$0xff] }
  0xc6   : > { %1081 = vperm.xlu0 %4210, %v526_v60  }
  0xc8   : > { %v4565_v1 = vpop.permute.xlu1 %706 }
  0xc9   : > { %v4567_v2 = vpop.permute.xlu0 %703  ;;  %1090 = vperm.xlu1 %4211, %v529_v63  }
  0xca   : > { %1087 = vperm.xlu0 %4210, %v528_v0   ;;  %v549_v0 = vld [vmem:[%s4491_s25 + $0x158] sm:$0xff] }
  0xcc   : > { %v4571_v5 = vpop.permute.xlu1 %712 }
  0xcd   : > { %6800 = vst [vmem:[#allocation8_spill] sm:$0xff] %v4571_v5  ;;  %v4573_v6 = vpop.permute.xlu0 %709  ;;  %1096 = vperm.xlu1 %4211, %v531_v3   ;;  %v548_v3 = vld [vmem:[%s4491_s25 + $0x150] sm:$0xff] }
  0xce   : > { %1093 = vperm.xlu0 %4210, %v530_v4  }
  0xd0   : > { %v4577_v9 = vpop.permute.xlu1 %718 }
  0xd1   : > { %6801 = vst [vmem:[#allocation9_spill] sm:$0xff] %v4577_v9  ;;  %v4579_v10 = vpop.permute.xlu0 %715  ;;  %1102 = vperm.xlu1 %4211, %v533_v7  }
  0xd2   : > { %6802 = vst [vmem:[#allocation10_spill] sm:$0xff] %v4579_v10  ;;  %1099 = vperm.xlu0 %4210, %v532_v8   ;;  %v551_v8 = vld [vmem:[%s4491_s25 + $0x168] sm:$0xff] }
  0xd4   : > { %v4583_v13 = vpop.permute.xlu1 %724 }
  0xd5   : > { %v722_v15 = vpop.permute.xlu0 %721  ;;  %1108 = vperm.xlu1 %4211, %v535_v11   ;;  %v550_v11 = vld [vmem:[%s4491_s25 + $0x160] sm:$0xff]  ;;  %vm857_vm6 = vcmp.eq.s32.totalorder %v4494_v16, %v4583_v13 }
  0xd6   : > { %1105 = vperm.xlu0 %4210, %v534_v12   ;;  %vm856_vm3 = vcmp.eq.s32.totalorder %v4494_v16, %v722_v15 }
  0xd7   : > { %v3702_v18 = vsel %vm856_vm3, 1.0, %v6788_v22  ;;  %v559_v22 = vld [vmem:[%s4491_s25 + $0x1a8] sm:$0xff]  ;;  %vm836_vm3 = vcmp.eq.s32.totalorder %v4494_v16, %v4525_v38  ;;  %v569_v38 = vld [vmem:[%s4491_s25 + $0x1f8] sm:$0xff] }
  0xd8   : > { %4077 = vmatprep.mubr.msk.f32.mxu1 %vm398_vm1, %v3702_v18  ;;  %v4590_v21 = vpop.permute.xlu1 %730  ;;  %v552_v18 = vld [vmem:[%s4491_s25 + $0x170] sm:$0xff] }
  0xd9   : > { %v4592_v23 = vpop.permute.xlu0 %727  ;;  %1114 = vperm.xlu1 %4211, %v537_v17   ;;  %v553_v17 = vld [vmem:[%s4491_s25 + $0x178] sm:$0xff]  ;;  %vm859_vm9 = vcmp.eq.s32.totalorder %v4494_v16, %v4590_v21 }
  0xda   : > { %1111 = vperm.xlu0 %4210, %v536_v20   ;;  %vm858_vm7 = vcmp.eq.s32.totalorder %v4494_v16, %v4592_v23 }
  0xdc   : > { %v4596_v28 = vpop.permute.xlu1 %736 }
  0xdd   : > { %v4598_v31 = vpop.permute.xlu0 %733  ;;  %1120 = vperm.xlu1 %4211, %v539_v24   ;;  %vm861_vm13 = vcmp.eq.s32.totalorder %v4494_v16, %v4596_v28 }
  0xde   : > { %1117 = vperm.xlu0 %4210, %v538_v27   ;;  %v555_v27 = vld [vmem:[%s4491_s25 + $0x188] sm:$0xff]  ;;  %vm860_vm11 = vcmp.eq.s32.totalorder %v4494_v16, %v4598_v31 }
  0xe0   : > { %v4602_v36 = vpop.permute.xlu1 %742 }
  0xe1   : > { %v4604_v39 = vpop.permute.xlu0 %739  ;;  %1126 = vperm.xlu1 %4211, %v541_v32   ;;  %vm863_vm2 = vcmp.eq.s32.totalorder %v4494_v16, %v4602_v36 }
  0xe2   : > { %1123 = vperm.xlu0 %4210, %v540_v35   ;;  %v554_v35 = vld [vmem:[%s4491_s25 + $0x180] sm:$0xff]  ;;  %vm862_vm15 = vcmp.eq.s32.totalorder %v4494_v16, %v4604_v39 }
  0xe4   : > { %v4608_v44 = vpop.permute.xlu1 %748 }
  0xe5   : > { %v4610_v47 = vpop.permute.xlu0 %745  ;;  %1132 = vperm.xlu1 %4211, %v543_v40  }
  0xe6   : > { %1129 = vperm.xlu0 %4210, %v542_v43  }
  0xe8   : > { %v4614_v52 = vpop.permute.xlu1 %754 }
  0xe9   : > { %v4616_v55 = vpop.permute.xlu0 %751  ;;  %1138 = vperm.xlu1 %4211, %v545_v48   ;;  %v401_v48 = vld [vmem:[%s6782_s1] sm:$0xff] }
  0xea   : > { %1135 = vperm.xlu0 %4210, %v544_v51   ;;  %v402_v51 = vld [vmem:[%s6782_s1 + $0x8] sm:$0xff] }
  0xec   : > { %v4620_v60 = vpop.permute.xlu1 %760 }
  0xed   : > { %v4622_v63 = vpop.permute.xlu0 %757  ;;  %1144 = vperm.xlu1 %4211, %v547_v56  }
  0xee   : > { %1141 = vperm.xlu0 %4210, %v546_v59   ;;  %v409_v59 = vmul.f32 %v401_v48, %v401_v48 }
  0xf0   : > { %v4626_v4 = vpop.permute.xlu1 %766 }
  0xf1   : > { %v4628_v7 = vpop.permute.xlu0 %763  ;;  %1150 = vperm.xlu1 %4211, %v549_v0   ;;  %v410_v0 = vmul.f32 %v402_v51, %v402_v51 }
  0xf2   : > { %1147 = vperm.xlu0 %4210, %v548_v3   ;;  %v557_v3 = vld [vmem:[%s4491_s25 + $0x198] sm:$0xff] }
  0xf4   : > { %v4632_v12 = vpop.permute.xlu1 %772 }
  0xf5   : > { %v4634_v15 = vpop.permute.xlu0 %769  ;;  %1156 = vperm.xlu1 %4211, %v551_v8   ;;  %v403_v8 = vld [vmem:[%s6782_s1 + $0x10] sm:$0xff] }
  0xf6   : > { %1153 = vperm.xlu0 %4210, %v550_v11   ;;  %v556_v11 = vld [vmem:[%s4491_s25 + $0x190] sm:$0xff] }
  0xf8   : > { %v4638_v20 = vpop.permute.xlu1 %778 }
  0xf9   : > { %v4640_v24 = vpop.permute.xlu0 %775  ;;  %1162 = vperm.xlu1 %4211, %v553_v17   ;;  %v411_v17 = vmul.f32 %v403_v8, %v403_v8  ;;  %v558_v8 = vld [vmem:[%s4491_s25 + $0x1a0] sm:$0xff] }
  0xfa   : > { %1159 = vperm.xlu0 %4210, %v552_v18   ;;  %v417_v18 = vsel %vm398_vm1, %v409_v59, 0.0  ;;  %v405_v59 = vld [vmem:[%s6782_s1 + $0x20] sm:$0xff] }
  0xfb   : > { %v420_v14 = vsel %vm398_vm1, %v411_v17, 0.0  ;;  %v413_v10 = vmul.f32 %v405_v59, %v405_v59  ;;  %v407_v59 = vld [vmem:[%s6782_s1 + $0x30] sm:$0xff] }
  0xfc   : > { %v4030_v32 = vpop.f32.mrb[0].mxu0  ;;  %v4645_v43 = vpop.permute.xlu1 %784 }
  0xfd   : > { %400 = vst.msk [vmem:[#allocation2 + $0x8] sm:$0xff] %vm398_vm1, %v4030_v32  ;;  %v389_v40 = vpop.f32.mrb[1].mxu0  ;;  %v4654_v56 = vpop.permute.xlu0 %781  ;;  %1168 = vperm.xlu1 %4211, %v555_v27   ;;  %v418_v32 = vsel %vm398_vm1, %v410_v0, 0.0  ;;  %v404_v27 = vld [vmem:[%s6782_s1 + $0x18] sm:$0xff] }
  0xfe   : > { %399 = vst.msk [vmem:[#allocation2] sm:$0xff] %vm398_vm1, %v389_v40  ;;  %1165 = vperm.xlu0 %4210, %v554_v35   ;;  %v419_v48 = vadd.f32 %v418_v32, %v417_v18  ;;  %v412_v51 = vmul.f32 %v404_v27, %v404_v27 }
 0x100   : > { %v4663_v40 = vpop.permute.xlu1 %790  ;;  %v421_v0 = vadd.f32 %v420_v14, %v419_v48  ;;  %v422_v5 = vsel %vm398_vm1, %v412_v51, 0.0  ;;  %v424_v48 = vsel %vm398_vm1, %v413_v10, 0.0  ;;  %v561_v51 = vld [vmem:[%s4491_s25 + $0x1b8] sm:$0xff] }
 0x101   : > { %v4668_v35 = vpop.permute.xlu0 %787  ;;  %1174 = vperm.xlu1 %4211, %v557_v3   ;;  %v406_v3 = vld [vmem:[%s6782_s1 + $0x28] sm:$0xff] }
 0x102   : > { %1171 = vperm.xlu0 %4210, %v556_v11   ;;  %v423_v11 = vadd.f32 %v422_v5, %v421_v0  ;;  %v414_v14 = vmul.f32 %v406_v3, %v406_v3  ;;  %v415_v5 = vmul.f32 %v407_v59, %v407_v59  ;;  %v408_v0 = vld [vmem:[%s6782_s1 + $0x38] sm:$0xff] }
 0x103   : > { %v416_v3 = vmul.f32 %v408_v0, %v408_v0 }
 0x104   : > { %v1853_v9 = vld [vmem:[#allocation2 + $0x8] sm:$0xff]  ;;  %v4677_v18 = vpop.permute.xlu1 %796 }
 0x105   : > { %6803 = vst [vmem:[#allocation11_spill] sm:$0xff] %v4677_v18  ;;  %v1852_v32 = vld [vmem:[#allocation2] sm:$0xff]  ;;  %v4682_v17 = vpop.permute.xlu0 %793  ;;  %1180 = vperm.xlu1 %4211, %v559_v22   ;;  %v425_v18 = vadd.f32 %v424_v48, %v423_v11  ;;  %v560_v22 = vld [vmem:[%s4491_s25 + $0x1b0] sm:$0xff]  ;;  %v428_v11 = vsel %vm398_vm1, %v415_v5, 0.0  ;;  %v430_v13 = vsel %vm398_vm1, %v416_v3, 0.0 }
 0x106   : > { %v4147_v27 = vpack.c.bf16 %v1853_v9, %v1852_v32  ;;  %1177 = vperm.xlu0 %4210, %v558_v8   ;;  %v426_v9 = vsel %vm398_vm1, %v414_v14, 0.0  ;;  %v6804_v14 = vmov 0.0  }
 0x107   : > { %v427_v8 = vadd.f32 %v426_v9, %v425_v18  ;;  %v3676_v48 = vsel %vm830_vm4, 1.0, %v6804_v14  ;;  %v3703_v18 = vsel %vm857_vm6, 1.0, %v6804_v14  ;;  %v3704_v19 = vsel %vm858_vm7, 1.0, %v6804_v14 }
 0x108   : > { %4148 = vmatprep.subr.bf16.mxu0 %v4147_v27  ;;  %4151 = vmatprep.subr.bf16.mxu1 %v4147_v27  ;;  %v4699_v10 = vpop.permute.xlu1 %802  ;;  %v3705_v5 = vsel %vm859_vm9, 1.0, %v6804_v14  ;;  %v3678_v31 = vsel %vm832_vm10, 1.0, %v6804_v14  ;;  %v3706_v0 = vsel %vm860_vm11, 1.0, %v6804_v14  ;;  %v3680_v39 = vsel %vm834_vm14, 1.0, %v6804_v14 }
 0x109   : > { %4150 = vmatpush3.bf16.msra.mxu0 %v4147_v27  ;;  %4152 = vmatpush3.bf16.msra.mxu1 %v4147_v27  ;;  %v4704_v32 = vpop.permute.xlu0 %799  ;;  %v3675_v27 = vsel %vm829_vm5, 1.0, %v6804_v14  ;;  %v429_v59 = vadd.f32 %v428_v11, %v427_v8  ;;  %v564_v8 = vld [vmem:[%s4491_s25 + $0x1d0] sm:$0xff]  ;;  %v3679_v11 = vsel %vm833_vm12, 1.0, %v6804_v14  ;;  %vm864_vm4 = vcmp.eq.s32.totalorder %v4494_v16, %v4610_v47 }
 0x10a   : > { %1186 = vperm.xlu1 %4211, %v561_v51   ;;  %1183 = vperm.xlu0 %4210, %v560_v22   ;;  %v563_v51 = vld [vmem:[%s4491_s25 + $0x1c8] sm:$0xff]  ;;  %v3677_v22 = vsel %vm831_vm8, 1.0, %v6804_v14  ;;  %vm837_vm5 = vcmp.eq.s32.totalorder %v4494_v16, %v4523_v37  ;;  %v3682_v47 = vsel %vm836_vm3, 1.0, %v6804_v14  ;;  %vm865_vm6 = vcmp.eq.s32.totalorder %v4494_v16, %v4608_v44  ;;  %v570_v44 = vld [vmem:[%s4802_s11] sm:$0xff] }
 0x10b   : > { %v431_v21 = vadd.f32 %v430_v13, %v429_v59  ;;  %vm838_vm7 = vcmp.eq.s32.totalorder %v4494_v16, %v4531_v42  ;;  %vm866_vm8 = vcmp.eq.s32.totalorder %v4494_v16, %v4616_v55  ;;  %vm438_vm9 = vcmask 122880  }
 0x10c   : > { %4036 = vmatmul.mubr.msk.f32.vlgmr.msra.gmra.mrb[2].mxu0 %vm398_vm1, %v3675_v27  ;;  %4078 = vmatmul.mubr.msk.f32.vlgmr.msra.gmra.mrb[0].mxu1 %vm398_vm1, %v3703_v18  ;;  %v4736_v25 = vpop.permute.xlu1 %808  ;;  %v3708_v18 = vsel %vm862_vm15, 1.0, %v6804_v14  ;;  %v3683_v42 = vsel %vm837_vm5, 1.0, %v6804_v14  ;;  %vm839_vm10 = vcmp.eq.s32.totalorder %v4494_v16, %v4529_v41  ;;  %vm867_vm11 = vcmp.eq.s32.totalorder %v4494_v16, %v4614_v52 }
 0x10d   : > { %4038 = vmatprep.mubr.msk.f32.mxu0 %vm398_vm1, %v3676_v48  ;;  %4080 = vmatprep.mubr.msk.f32.mxu1 %vm398_vm1, %v3704_v19  ;;  %v4740_v23 = vpop.permute.xlu0 %805  ;;  %v432_v9 = vrot.slane %v431_v21, 4  ;;  %v3707_v48 = vsel %vm861_vm13, 1.0, %v6804_v14  ;;  %v3681_v19 = vsel %vm835_vm0, 1.0, %v6804_v14  ;;  %v3712_v37 = vsel %vm866_vm8, 1.0, %v6804_v14 }
 0x10e   : > { %1192 = vperm.xlu1 %4211, %v563_v51   ;;  %1189 = vperm.xlu0 %4210, %v562_v26   ;;  %v566_v51 = vld [vmem:[%s4491_s25 + $0x1e0] sm:$0xff]  ;;  %v3709_v26 = vsel %vm863_vm2, 1.0, %v6804_v14  ;;  %vm840_vm12 = vcmp.eq.s32.totalorder %v4494_v16, %v4537_v46  ;;  %vm868_vm13 = vcmp.eq.s32.totalorder %v4494_v16, %v4622_v63  ;;  %v3685_v55 = vsel %vm839_vm10, 1.0, %v6804_v14 }
 0x10f   : > { %v433_v28 = vadd.f32 %v432_v9, %v431_v21  ;;  %v3710_v21 = vsel %vm864_vm4, 1.0, %v6804_v14  ;;  %vm841_vm14 = vcmp.eq.s32.totalorder %v4494_v16, %v4535_v45  ;;  %v3686_v46 = vsel %vm840_vm12, 1.0, %v6804_v14 }
 0x110   : > { %4039 = vmatmul.mubr.msk.f32.gmra.mrb[4].mxu0 %vm398_vm1, %v3677_v22  ;;  %4081 = vmatmul.mubr.msk.f32.gmra.mrb[2].mxu1 %vm398_vm1, %v3705_v5  ;;  %v4758_v29 = vpop.permute.xlu1 %814  ;;  %v568_v22 = vld [vmem:[%s4491_s25 + $0x1f0] sm:$0xff]  ;;  %vm869_vm15 = vcmp.eq.s32.totalorder %v4494_v16, %v4620_v60  ;;  %v3714_v63 = vsel %vm868_vm13, 1.0, %v6804_v14  ;;  %vm842_vm0 = vcmp.eq.s32.totalorder %v4494_v16, %v4543_v50  ;;  %vm870_vm2 = vcmp.eq.s32.totalorder %v4494_v16, %v4628_v7  ;;  %s275_s25 = sand.u32 1, %s4276_s19  }
 0x111   : > { %4041 = vmatprep.mubr.msk.f32.mxu0 %vm398_vm1, %v3678_v31  ;;  %4083 = vmatprep.mubr.msk.f32.mxu1 %vm398_vm1, %v3706_v0  ;;  %v4762_v3 = vpop.permute.xlu0 %811  ;;  %v434_v27 = vrot.slane %v433_v28, 2  ;;  %v3711_v31 = vsel %vm865_vm6, 1.0, %v6804_v14  ;;  %v571_v0 = vld [vmem:[%s4802_s11 + $0x8] sm:$0xff]  ;;  %vm843_vm3 = vcmp.eq.s32.totalorder %v4494_v16, %v4541_v49  ;;  %v3688_v50 = vsel %vm842_vm0, 1.0, %v6804_v14  ;;  %s3665_s12 = sshll.u32 %s275_s25, 3  ;;  %s3556_s27 = scalar_lea.sflag [#allocation6], %s275_s25 }
 0x112   : > { %1198 = vperm.xlu1 %4211, %v565_v30   ;;  %1195 = vperm.xlu0 %4210, %v564_v8   ;;  %v3684_v8 = vsel %vm838_vm7, 1.0, %v6804_v14  ;;  %vm871_vm4 = vcmp.eq.s32.totalorder %v4494_v16, %v4626_v4  ;;  %v3716_v7 = vsel %vm870_vm2, 1.0, %v6804_v14  ;;  %vm844_vm5 = vcmp.eq.s32.totalorder %v4494_v16, %v4549_v54  ;;  %s277_s14 = scalar_lea.vmem [#allocation5], %s3665_s12 }
 0x113   : > { %v435_v36 = vadd.f32 %v434_v27, %v433_v28  ;;  %v3713_v28 = vsel %vm867_vm11, 1.0, %v6804_v14  ;;  %v3715_v27 = vsel %vm869_vm15, 1.0, %v6804_v14  ;;  %vm872_vm6 = vcmp.eq.s32.totalorder %v4494_v16, %v4634_v15  ;;  %s3569_s15 = sshll.u32 %s277_s14, 4  ;;  %s6731_s15 = int_to_ptr.vmem [resolvable:$true] %s3569_s15 }
 0x114   : > { %4042 = vmatmul.mubr.msk.f32.gmra.mrb[6].mxu0 %vm398_vm1, %v3679_v11  ;;  %4084 = vmatmul.mubr.msk.f32.gmra.mrb[4].mxu1 %vm398_vm1, %v3707_v48  ;;  %v4780_v33 = vpop.permute.xlu1 %820  ;;  %v573_v11 = vld [vmem:[%s4802_s11 + $0x18] sm:$0xff]  ;;  %v572_v48 = vld [vmem:[%s4802_s11 + $0x10] sm:$0xff]  ;;  %vm845_vm7 = vcmp.eq.s32.totalorder %v4494_v16, %v4547_v53  ;;  %v3690_v54 = vsel %vm844_vm5, 1.0, %v6804_v14  ;;  %vm873_vm8 = vcmp.eq.s32.totalorder %v4494_v16, %v4632_v12  ;;  %v3718_v15 = vsel %vm872_vm6, 1.0, %v6804_v14  ;;  %s4214_s29 = scalar_lea.vmem %s6731_s15, 128  ;;  %p4221_p1 = scmp.lt.s32.totalorder %s6731_s15, %s4219_s21 }
 0x115   : > { %4044 = vmatprep.mubr.msk.f32.mxu0 %vm398_vm1, %v3680_v39  ;;  %4086 = vmatprep.mubr.msk.f32.mxu1 %vm398_vm1, %v3708_v18  ;;  %v4784_v59 = vpop.permute.xlu0 %817  ;;  %v436_v13 = vrot.slane %v435_v36, 1  ;;  %v575_v39 = vld [vmem:[%s4802_s11 + $0x28] sm:$0xff]  ;;  %v574_v18 = vld [vmem:[%s4802_s11 + $0x20] sm:$0xff]  ;;  %vm874_vm10 = vcmp.eq.s32.totalorder %v4494_v16, %v4640_v24  ;;  %vm847_vm11 = vcmp.eq.s32.totalorder %v4494_v16, %v4553_v57  ;;  %vm875_vm12 = vcmp.eq.s32.totalorder %v4494_v16, %v4638_v20  ;;  %p4215_p12 = scmp.ne.s32.totalorder %s6731_s15, %s4214_s29  ;;  %p4222_p2 = scmp.lt.s32.totalorder %s4220_s9, %s4214_s29 }
 0x116   : > { %1204 = vperm.xlu1 %4211, %v567_v34   ;;  %1201 = vperm.xlu0 %4210, %v566_v51   ;;  %v3687_v34 = vsel %vm841_vm14, 1.0, %v6804_v14  ;;  %v3689_v51 = vsel %vm843_vm3, 1.0, %v6804_v14  ;;  %v3720_v24 = vsel %vm874_vm10, 1.0, %v6804_v14  ;;  %vm848_vm13 = vcmp.eq.s32.totalorder %v4494_v16, %v4561_v62 }
 0x117   : > { %v437_v30 = vadd.f32 %v436_v13, %v435_v36  ;;  %v3717_v36 = vsel %vm871_vm4, 1.0, %v6804_v14  ;;  %v3719_v13 = vsel %vm873_vm8, 1.0, %v6804_v14  ;;  %vm876_vm14 = vcmp.eq.s32.totalorder %v4494_v16, %v4654_v56  ;;  %p4216_p13 = pnand %p4215_p12, %p4367_p4  ;;  %p4223_p3 = por %p4222_p2, %p4221_p1 }
 0x118   : > { %4045 = vmatmul.mubr.msk.f32.gmra.mrb[8].mxu0 %vm398_vm1, %v3681_v19  ;;  %4087 = vmatmul.mubr.msk.f32.gmra.mrb[6].mxu1 %vm398_vm1, %v3709_v26  ;;  %v4808_v5 = vpop.permute.xlu1 %826  ;;  %v577_v19 = vld [vmem:[%s4802_s11 + $0x38] sm:$0xff]  ;;  %v576_v26 = vld [vmem:[%s4802_s11 + $0x30] sm:$0xff]  ;;  %vm849_vm15 = vcmp.eq.s32.totalorder %v4494_v16, %v4559_v61  ;;  %v3694_v62 = vsel %vm848_vm13, 1.0, %v6804_v14  ;;  %vm877_vm0 = vcmp.eq.s32.totalorder %v4494_v16, %v4645_v43  ;;  %v3722_v56 = vsel %vm876_vm14, 1.0, %v6804_v14 }
 0x119   : > { %4047 = vmatprep.mubr.msk.f32.mxu0 %vm398_vm1, %v3682_v47  ;;  %4089 = vmatprep.mubr.msk.f32.mxu1 %vm398_vm1, %v3710_v21  ;;  %v4812_v9 = vpop.permute.xlu0 %823  ;;  %439 = vst.msk [vmem:[#allocation3] sm:$0x1] %vm438_vm9, %v437_v30  ;;  %vm846_vm9 = vcmp.eq.s32.totalorder %v4494_v16, %v4555_v58  ;;  %v579_v47 = vld [vmem:[%s4802_s11 + $0x48] sm:$0xff]  ;;  %v578_v21 = vld [vmem:[%s4802_s11 + $0x40] sm:$0xff]  ;;  %v3721_v30 = vsel %vm875_vm12, 1.0, %v6804_v14  ;;  %vm850_vm2 = vcmp.eq.s32.totalorder %v4494_v16, %v4567_v2  ;;  %p4217_p0 = pneg %p4216_p13 }
 0x11a   : > { %1210 = vperm.xlu1 %4211, %v569_v38   ;;  %1207 = vperm.xlu0 %4210, %v568_v22   ;;  %v3691_v38 = vsel %vm845_vm7, 1.0, %v6804_v14  ;;  %v3692_v58 = vsel %vm846_vm9, 1.0, %v6804_v14  ;;  %v3693_v22 = vsel %vm847_vm11, 1.0, %v6804_v14  ;;  %vm878_vm3 = vcmp.eq.s32.totalorder %v4494_v16, %v4668_v35 }
 0x11b   : > { %vm851_vm4 = vcmp.eq.s32.totalorder %v4494_v16, %v4565_v1  ;;  %v3696_v2 = vsel %vm850_vm2, 1.0, %v6804_v14  ;;  %vm879_vm5 = vcmp.eq.s32.totalorder %v4494_v16, %v4663_v40  ;;  %v3724_v35 = vsel %vm878_vm3, 1.0, %v6804_v14  ;;  %p4224_p5 = pnand %p4223_p3, %p4217_p0 }
 0x11c   : > { %4048 = vmatmul.mubr.msk.f32.gmra.mrb[10].mxu0 %vm398_vm1, %v3683_v42  ;;  %4090 = vmatmul.mubr.msk.f32.gmra.mrb[8].mxu1 %vm398_vm1, %v3711_v31  ;;  %v4839_v41 = vpop.permute.xlu1 %1024  ;;  %v581_v42 = vld [vmem:[%s4802_s11 + $0x58] sm:$0xff]  ;;  %v580_v31 = vld [vmem:[%s4802_s11 + $0x50] sm:$0xff]  ;;  %vm852_vm6 = vcmp.eq.s32.totalorder %v4494_v16, %v4573_v6  ;;  %vm880_vm7 = vcmp.eq.s32.totalorder %v4494_v16, %v4682_v17  ;;  %v6805_v6 = vld [vmem:[#allocation8_spill] sm:$0xff]  ;;  %vm882_vm11 = vcmp.eq.s32.totalorder %v4494_v16, %v4704_v32 }
 0x11d   : > { %4050 = vmatprep.mubr.msk.f32.mxu0 %vm398_vm1, %v3684_v8  ;;  %4092 = vmatprep.mubr.msk.f32.mxu1 %vm398_vm1, %v3712_v37  ;;  %v4843_v52 = vpop.permute.xlu0 %1021  ;;  %v3723_v8 = vsel %vm877_vm0, 1.0, %v6804_v14  ;;  %v583_v37 = vld [vmem:[%s4802_s11 + $0x68] sm:$0xff]  ;;  %vm853_vm8 = vcmp.eq.s32.totalorder %v4494_v16, %v6805_v6  ;;  %v3698_v17 = vsel %vm852_vm6, 1.0, %v6804_v14  ;;  %vm883_vm13 = vcmp.eq.s32.totalorder %v4494_v16, %v4699_v10 }
 0x11e   : > { %1408 = vperm.xlu1 %4211, %v571_v0   ;;  %1405 = vperm.xlu0 %4210, %v570_v44   ;;  %v3695_v0 = vsel %vm849_vm15, 1.0, %v6804_v14  ;;  %v582_v44 = vld [vmem:[%s4802_s11 + $0x60] sm:$0xff]  ;;  %vm884_vm14 = vcmp.eq.s32.totalorder %v4494_v16, %v4740_v23  ;;  %vm885_vm15 = vcmp.eq.s32.totalorder %v4494_v16, %v4736_v25  ;;  %vm886_vm0 = vcmp.eq.s32.totalorder %v4494_v16, %v4762_v3 }
 0x11f   : > { %v3730_v23 = vsel %vm884_vm14, 1.0, %v6804_v14  ;;  %v3731_v25 = vsel %vm885_vm15, 1.0, %v6804_v14  ;;  %vm887_vm2 = vcmp.eq.s32.totalorder %v4494_v16, %v4758_v29  ;;  %v590_v3 = vld [vmem:[%s4802_s11 + $0xa0] sm:$0xff]  ;;  %vm888_vm3 = vcmp.eq.s32.totalorder %v4494_v16, %v4784_v59  ;;  %v593_v29 = vld [vmem:[%s4802_s11 + $0xb8] sm:$0xff]  ;;  %v592_v59 = vld [vmem:[%s4802_s11 + $0xb0] sm:$0xff] }
 0x120   : > { %4051 = vmatmul.mubr.msk.f32.gmra.mrb[12].mxu0 %vm398_vm1, %v3685_v55  ;;  %4093 = vmatmul.mubr.msk.f32.gmra.mrb[10].mxu1 %vm398_vm1, %v3713_v28  ;;  %v4861_v45 = vpop.permute.xlu1 %1030  ;;  %v3697_v55 = vsel %vm851_vm4, 1.0, %v6804_v14  ;;  %v3725_v28 = vsel %vm879_vm5, 1.0, %v6804_v14  ;;  %vm889_vm4 = vcmp.eq.s32.totalorder %v4494_v16, %v4780_v33  ;;  %vm890_vm5 = vcmp.eq.s32.totalorder %v4494_v16, %v4812_v9  ;;  %v595_v33 = vld [vmem:[%s4802_s11 + $0xc8] sm:$0xff]  ;;  %v594_v9 = vld [vmem:[%s4802_s11 + $0xc0] sm:$0xff] }
 0x121   : > { %4053 = vmatprep.mubr.msk.f32.mxu0 %vm398_vm1, %v3686_v46  ;;  %4095 = vmatprep.mubr.msk.f32.mxu1 %vm398_vm1, %v3714_v63  ;;  %v4865_v60 = vpop.permute.xlu0 %1027  ;;  %v6806_v46 = vld [vmem:[#allocation11_spill] sm:$0xff]  ;;  %v3726_v63 = vsel %vm880_vm7, 1.0, %v6804_v14  ;;  %vm891_vm6 = vcmp.eq.s32.totalorder %v4494_v16, %v4808_v5  ;;  %v596_v5 = vld [vmem:[%s4802_s11 + $0xd0] sm:$0xff]  ;;  %vm1213_vm7 = vcmp.eq.s32.totalorder %v4494_v16, %v4839_v41 }
 0x122   : > { %1414 = vperm.xlu1 %4211, %v573_v11   ;;  %1411 = vperm.xlu0 %4210, %v572_v48   ;;  %v585_v11 = vld [vmem:[%s4802_s11 + $0x78] sm:$0xff]  ;;  %vm881_vm9 = vcmp.eq.s32.totalorder %v4494_v16, %v6806_v46  ;;  %v584_v48 = vld [vmem:[%s4802_s11 + $0x70] sm:$0xff] }
 0x124   : > { %4054 = vmatmul.mubr.msk.f32.gmra.mrb[14].mxu0 %vm398_vm1, %v3687_v34  ;;  %4096 = vmatmul.mubr.msk.f32.gmra.mrb[12].mxu1 %vm398_vm1, %v3715_v27  ;;  %v4883_v49 = vpop.permute.xlu1 %1036  ;;  %v6807_v34 = vld [vmem:[#allocation10_spill] sm:$0xff] }
 0x125   : > { %4056 = vmatprep.mubr.msk.f32.mxu0 %vm398_vm1, %v3688_v50  ;;  %4098 = vmatprep.mubr.msk.f32.mxu1 %vm398_vm1, %v3716_v7  ;;  %v4887_v4 = vpop.permute.xlu0 %1033  ;;  %vm854_vm10 = vcmp.eq.s32.totalorder %v4494_v16, %v6807_v34  ;;  %v3699_v50 = vsel %vm853_vm8, 1.0, %v6804_v14  ;;  %v3727_v7 = vsel %vm881_vm9, 1.0, %v6804_v14  ;;  %vm1215_vm9 = vcmp.eq.s32.totalorder %v4494_v16, %v4861_v45 }
 0x126   : > { %1420 = vperm.xlu1 %4211, %v575_v39   ;;  %1417 = vperm.xlu0 %4210, %v574_v18   ;;  %v587_v18 = vld [vmem:[%s4802_s11 + $0x88] sm:$0xff]  ;;  %v3700_v32 = vsel %vm854_vm10, 1.0, %v6804_v14  ;;  %vm1214_vm10 = vcmp.eq.s32.totalorder %v4494_v16, %v4865_v60 }
 0x128   : > { %4057 = vmatmul.mubr.msk.f32.gmra.mrb[16].mxu0 %vm398_vm1, %v3689_v51  ;;  %4099 = vmatmul.mubr.msk.f32.gmra.mrb[14].mxu1 %vm398_vm1, %v3717_v36  ;;  %v4905_v53 = vpop.permute.xlu1 %1042  ;;  %v6808_v51 = vld [vmem:[#allocation9_spill] sm:$0xff]  ;;  %v3728_v36 = vsel %vm882_vm11, 1.0, %v6804_v14 }
 0x129   : > { %4059 = vmatprep.mubr.msk.f32.mxu0 %vm398_vm1, %v3690_v54  ;;  %4101 = vmatprep.mubr.msk.f32.mxu1 %vm398_vm1, %v3718_v15  ;;  %v4909_v12 = vpop.permute.xlu0 %1039  ;;  %vm855_vm12 = vcmp.eq.s32.totalorder %v4494_v16, %v6808_v51 }
 0x12a   : > { %1426 = vperm.xlu1 %4211, %v577_v19   ;;  %1423 = vperm.xlu0 %4210, %v576_v26   ;;  %v586_v19 = vld [vmem:[%s4802_s11 + $0x80] sm:$0xff]  ;;  %v3701_v10 = vsel %vm855_vm12, 1.0, %v6804_v14  ;;  %v3729_v26 = vsel %vm883_vm13, 1.0, %v6804_v14  ;;  %vm1216_vm13 = vcmp.eq.s32.totalorder %v4494_v16, %v4887_v4 }
 0x12c   : > { %4060 = vmatmul.mubr.msk.f32.gmra.mrb[18].mxu0 %vm398_vm1, %v3691_v38  ;;  %4102 = vmatmul.mubr.msk.f32.gmra.mrb[16].mxu1 %vm398_vm1, %v3719_v13  ;;  %v4927_v57 = vpop.permute.xlu1 %1048  ;;  %v589_v38 = vld [vmem:[%s4802_s11 + $0x98] sm:$0xff]  ;;  %v588_v13 = vld [vmem:[%s4802_s11 + $0x90] sm:$0xff] }
 0x12d   : > { %4062 = vmatprep.mubr.msk.f32.mxu0 %vm398_vm1, %v3692_v58  ;;  %4104 = vmatprep.mubr.msk.f32.mxu1 %vm398_vm1, %v3720_v24  ;;  %v4931_v20 = vpop.permute.xlu0 %1045  ;;  %v591_v24 = vld [vmem:[%s4802_s11 + $0xa8] sm:$0xff] }
 0x12e   : > { %1432 = vperm.xlu1 %4211, %v579_v47   ;;  %1429 = vperm.xlu0 %4210, %v578_v21   ;;  %v3732_v21 = vsel %vm886_vm0, 1.0, %v6804_v14  ;;  %vm1217_vm0 = vcmp.eq.s32.totalorder %v4494_v16, %v4883_v49 }
 0x12f   : > { %v3743_v49 = vsel %vm1217_vm0, 1.0, %v6804_v14 }
 0x130   : > { %4063 = vmatmul.mubr.msk.f32.gmra.mrb[20].mxu0 %vm398_vm1, %v3693_v22  ;;  %4105 = vmatmul.mubr.msk.f32.gmra.mrb[18].mxu1 %vm398_vm1, %v3721_v30  ;;  %v4949_v61 = vpop.permute.xlu1 %1054 }
 0x131   : > { %4065 = vmatprep.mubr.msk.f32.mxu0 %vm398_vm1, %v3694_v62  ;;  %4107 = vmatprep.mubr.msk.f32.mxu1 %vm398_vm1, %v3722_v56  ;;  %v4953_v43 = vpop.permute.xlu0 %1051  ;;  %v3734_v62 = vsel %vm888_vm3, 1.0, %v6804_v14 }
 0x132   : > { %1438 = vperm.xlu1 %4211, %v581_v42   ;;  %1435 = vperm.xlu0 %4210, %v580_v31   ;;  %v3733_v42 = vsel %vm887_vm2, 1.0, %v6804_v14 }
 0x134   : > { %4066 = vmatmul.mubr.msk.f32.gmra.mrb[22].mxu0 %vm398_vm1, %v3695_v0  ;;  %4108 = vmatmul.mubr.msk.f32.gmra.mrb[20].mxu1 %vm398_vm1, %v3723_v8  ;;  %v4971_v1 = vpop.permute.xlu1 %1060  ;;  %v3735_v0 = vsel %vm889_vm4, 1.0, %v6804_v14  ;;  %v3736_v8 = vsel %vm890_vm5, 1.0, %v6804_v14  ;;  %vm1212_vm4 = vcmp.eq.s32.totalorder %v4494_v16, %v4843_v52  ;;  %vm1218_vm5 = vcmp.eq.s32.totalorder %v4494_v16, %v4909_v12 }
 0x135   : > { %4068 = vmatprep.mubr.msk.f32.mxu0 %vm398_vm1, %v3696_v2  ;;  %4110 = vmatprep.mubr.msk.f32.mxu1 %vm398_vm1, %v3724_v35  ;;  %v4975_v40 = vpop.permute.xlu0 %1057  ;;  %v3737_v35 = vsel %vm891_vm6, 1.0, %v6804_v14  ;;  %v3738_v52 = vsel %vm1212_vm4, 1.0, %v6804_v14  ;;  %v3744_v12 = vsel %vm1218_vm5, 1.0, %v6804_v14  ;;  %vm1225_vm4 = vcmp.eq.s32.totalorder %v4494_v16, %v4971_v1 }
 0x136   : > { %1444 = vperm.xlu1 %4211, %v583_v37   ;;  %1441 = vperm.xlu0 %4210, %v582_v44  }
 0x138   : > { %4069 = vmatmul.mubr.msk.f32.gmra.mrb[24].mxu0 %vm398_vm1, %v3697_v55  ;;  %4111 = vmatmul.mubr.msk.f32.gmra.mrb[22].mxu1 %vm398_vm1, %v3725_v28  ;;  %v4993_v27 = vpop.permute.xlu1 %1066  ;;  %v598_v28 = vld [vmem:[%s4802_s11 + $0xe0] sm:$0xff] }
 0x139   : > { %4071 = vmatprep.mubr.msk.f32.mxu0 %vm398_vm1, %v3698_v17  ;;  %4113 = vmatprep.mubr.msk.f32.mxu1 %vm398_vm1, %v3726_v63  ;;  %v4997_v39 = vpop.permute.xlu0 %1063  ;;  %v600_v17 = vld [vmem:[%s4802_s11 + $0xf0] sm:$0xff] }
 0x13a   : > { %1450 = vperm.xlu1 %4211, %v585_v11   ;;  %1447 = vperm.xlu0 %4210, %v584_v48   ;;  %v602_v48 = vld [vmem:[%s4802_s11 + $0x100] sm:$0xff] }
 0x13c   : > { %4072 = vmatmul.mubr.msk.f32.gmra.mrb[26].mxu0 %vm398_vm1, %v3699_v50  ;;  %4114 = vmatmul.mubr.msk.f32.gmra.mrb[24].mxu1 %vm398_vm1, %v3727_v7  ;;  %v5013_v54 = vpop.permute.xlu1 %1072  ;;  %v604_v7 = vld [vmem:[%s4802_s11 + $0x110] sm:$0xff] }
 0x13d   : > { %4074 = vmatprep.mubr.msk.f32.mxu0 %vm398_vm1, %v3700_v32  ;;  %4116 = vmatprep.mubr.msk.f32.mxu1 %vm398_vm1, %v3728_v36  ;;  %v5017_v15 = vpop.permute.xlu0 %1069  ;;  %v606_v32 = vld [vmem:[%s4802_s11 + $0x120] sm:$0xff] }
 0x13e   : > { %1456 = vperm.xlu1 %4211, %v587_v18   ;;  %1453 = vperm.xlu0 %4210, %v586_v19  }
 0x140   : > { %4075 = vmatmul.mubr.msk.f32.gmra.mrb[28].mxu0 %vm398_vm1, %v3701_v10  ;;  %4117 = vmatmul.mubr.msk.f32.gmra.mrb[26].mxu1 %vm398_vm1, %v3729_v26  ;;  %v5030_v47 = vpop.permute.xlu1 %1078  ;;  %v608_v10 = vld [vmem:[%s4802_s11 + $0x130] sm:$0xff] }
 0x141   : > { %4119 = vmatprep.mubr.msk.f32.mxu1 %vm398_vm1, %v3730_v23  ;;  %v5033_v58 = vpop.permute.xlu0 %1075  ;;  %v610_v23 = vld [vmem:[%s4802_s11 + $0x140] sm:$0xff] }
 0x142   : > { %1462 = vperm.xlu1 %4211, %v589_v38   ;;  %1459 = vperm.xlu0 %4210, %v588_v13  }
 0x144   : > { %4120 = vmatmul.mubr.msk.f32.gmra.mrb[28].mxu1 %vm398_vm1, %v3731_v25  ;;  %v5044_v22 = vpop.permute.xlu1 %1084 }
 0x145   : > { %4122 = vmatprep.mubr.msk.f32.mxu1 %vm398_vm1, %v3732_v21  ;;  %v5047_v30 = vpop.permute.xlu0 %1081 }
 0x146   : > { %1468 = vperm.xlu1 %4211, %v591_v24   ;;  %1465 = vperm.xlu0 %4210, %v590_v3   ;;  %v612_v24 = vld [vmem:[%s4802_s11 + $0x150] sm:$0xff] }
 0x148   : > { %4123 = vmatmul.mubr.msk.f32.gmra.mrb[30].mxu1 %vm398_vm1, %v3733_v42  ;;  %v5058_v56 = vpop.permute.xlu1 %1090  ;;  %v614_v42 = vld [vmem:[%s4802_s11 + $0x160] sm:$0xff] }
 0x149   : > { %4125 = vmatprep.mubr.msk.f32.mxu1 %vm398_vm1, %v3734_v62  ;;  %v5061_v31 = vpop.permute.xlu0 %1087 }
 0x14a   : > { %1474 = vperm.xlu1 %4211, %v593_v29   ;;  %1471 = vperm.xlu0 %4210, %v592_v59   ;;  %v616_v59 = vld [vmem:[%s4802_s11 + $0x170] sm:$0xff] }
 0x14c   : > { %4126 = vmatmul.mubr.msk.f32.gmra.mrb[32].mxu1 %vm398_vm1, %v3735_v0  ;;  %v5070_v37 = vpop.permute.xlu1 %1096 }
 0x14d   : > { %4128 = vmatprep.mubr.msk.f32.mxu1 %vm398_vm1, %v3736_v8  ;;  %v5073_v2 = vpop.permute.xlu0 %1093  ;;  %v618_v8 = vld [vmem:[%s4802_s11 + $0x180] sm:$0xff] }
 0x14e   : > { %1480 = vperm.xlu1 %4211, %v595_v33   ;;  %1477 = vperm.xlu0 %4210, %v594_v9  }
 0x150   : > { %4129 = vmatmul.mubr.msk.f32.gmra.mrb[34].mxu1 %vm398_vm1, %v3737_v35  ;;  %v5078_v44 = vpop.permute.xlu1 %1102 }
 0x151   : > { %v5080_v55 = vpop.permute.xlu0 %1099 }
 0x152   : > { %1483 = vperm.xlu0 %4210, %v596_v5   ;;  %v620_v5 = vld [vmem:[%s4802_s11 + $0x190] sm:$0xff] }
 0x154   : > { %v5083_v11 = vpop.permute.xlu1 %1108 }
 0x155   : > { %v5085_v6 = vpop.permute.xlu0 %1105 }
 0x156   : > { %1489 = vperm.xlu0 %4210, %v598_v28  }
 0x158   : > { %v5088_v46 = vpop.permute.xlu1 %1114 }
 0x159   : > { %v5090_v63 = vpop.permute.xlu0 %1111 }
 0x15a   : > { %1495 = vperm.xlu0 %4210, %v600_v17  }
 0x15c   : > { %v5093_v34 = vpop.permute.xlu1 %1120 }
 0x15d   : > { %v5095_v50 = vpop.permute.xlu0 %1117 }
 0x15e   : > { %1501 = vperm.xlu0 %4210, %v602_v48   ;;  %v622_v48 = vld [vmem:[%s4802_s11 + $0x1a0] sm:$0xff] }
 0x160   : > { %v5098_v18 = vpop.permute.xlu1 %1126 }
 0x161   : > { %v5100_v51 = vpop.permute.xlu0 %1123 }
 0x162   : > { %1507 = vperm.xlu0 %4210, %v604_v7  }
 0x164   : > { %v5103_v36 = vpop.permute.xlu1 %1132 }
 0x165   : > { %v5105_v19 = vpop.permute.xlu0 %1129 }
 0x166   : > { %1513 = vperm.xlu0 %4210, %v606_v32  }
 0x168   : > { %v5108_v26 = vpop.permute.xlu1 %1138 }
 0x169   : > { %v5110_v38 = vpop.permute.xlu0 %1135 }
 0x16a   : > { %1519 = vperm.xlu0 %4210, %v608_v10   ;;  %v624_v10 = vld [vmem:[%s4802_s11 + $0x1b0] sm:$0xff] }
 0x16c   : > { %v5113_v13 = vpop.permute.xlu1 %1144 }
 0x16d   : > { %6809 = vst [vmem:[#allocation8_spill] sm:$0xff] %v5113_v13  ;;  %v5115_v25 = vpop.permute.xlu0 %1141 }
 0x16e   : > { %6810 = vst [vmem:[#allocation11_spill] sm:$0xff] %v5115_v25  ;;  %1525 = vperm.xlu0 %4210, %v610_v23  }
 0x170   : > { %v5118_v21 = vpop.permute.xlu1 %1150 }
 0x171   : > { %6811 = vst [vmem:[#allocation10_spill] sm:$0xff] %v5118_v21  ;;  %v5120_v3 = vpop.permute.xlu0 %1147 }
 0x172   : > { %6812 = vst [vmem:[#allocation9_spill] sm:$0xff] %v5120_v3  ;;  %1531 = vperm.xlu0 %4210, %v612_v24  }
 0x174   : > { %v5123_v29 = vpop.permute.xlu1 %1156 }
 0x175   : > { %6813 = vst [vmem:[#allocation12_spill] sm:$0xff] %v5123_v29  ;;  %v5125_v62 = vpop.permute.xlu0 %1153 }
 0x176   : > { %6814 = vst [vmem:[#allocation13_spill] sm:$0xff] %v5125_v62  ;;  %1537 = vperm.xlu0 %4210, %v614_v42   ;;  %v626_v42 = vld [vmem:[%s4802_s11 + $0x1c0] sm:$0xff] }
 0x178   : > { %v5128_v0 = vpop.permute.xlu1 %1162 }
 0x179   : > { %6815 = vst [vmem:[#allocation14_spill] sm:$0xff] %v5128_v0  ;;  %v5130_v33 = vpop.permute.xlu0 %1159 }
 0x17a   : > { %6816 = vst [vmem:[#allocation15_spill] sm:$0xff] %v5130_v33  ;;  %1543 = vperm.xlu0 %4210, %v616_v59  }
 0x17c   : > { %v5133_v9 = vpop.permute.xlu1 %1168 }
 0x17d   : > { %6817 = vst [vmem:[#allocation16_spill] sm:$0xff] %v5133_v9  ;;  %v5135_v35 = vpop.permute.xlu0 %1165 }
 0x17e   : > { %1549 = vperm.xlu0 %4210, %v618_v8  }
 0x180   : > { %v5138_v28 = vpop.permute.xlu1 %1174 }
 0x181   : > { %6818 = vst [vmem:[#allocation17_spill] sm:$0xff] %v5138_v28  ;;  %v5140_v17 = vpop.permute.xlu0 %1171 }
 0x182   : > { %6819 = vst [vmem:[#allocation18_spill] sm:$0xff] %v5140_v17  ;;  %1555 = vperm.xlu0 %4210, %v620_v5   ;;  %v628_v5 = vld [vmem:[%s4802_s11 + $0x1d0] sm:$0xff] }
 0x184   : > { %v5143_v7 = vpop.permute.xlu1 %1180 }
 0x185   : > { %6820 = vst [vmem:[#allocation19_spill] sm:$0xff] %v5143_v7  ;;  %v5145_v32 = vpop.permute.xlu0 %1177 }
 0x186   : > { %6821 = vst [vmem:[#allocation20_spill] sm:$0xff] %v5145_v32  ;;  %1561 = vperm.xlu0 %4210, %v622_v48   ;;  %v630_v48 = vld [vmem:[%s4802_s11 + $0x1e0] sm:$0xff] }
 0x189   : > { %v5148_v23 = vpop.permute.xlu1 %1186  ;;  %v5150_v24 = vpop.permute.xlu0 %1183 }
 0x18a   : > { %6822 = vst [vmem:[#allocation21_spill] sm:$0xff] %v5148_v23  ;;  %6823 = vst [vmem:[#allocation22_spill] sm:$0xff] %v5150_v24  ;;  %1567 = vperm.xlu0 %4210, %v624_v10   ;;  %v632_v23 = vld [vmem:[%s4802_s11 + $0x1f0] sm:$0xff] }
 0x18d   : > { %v5153_v59 = vpop.permute.xlu1 %1192  ;;  %v5155_v8 = vpop.permute.xlu0 %1189 }
 0x18e   : > { %6824 = vst [vmem:[#allocation23_spill] sm:$0xff] %v5153_v59  ;;  %6825 = vst [vmem:[#allocation24_spill] sm:$0xff] %v5155_v8  ;;  %1573 = vperm.xlu0 %4210, %v626_v42   ;;  %v3742_v8 = vsel %vm1216_vm13, 1.0, %v6804_v14  ;;  %vm1222_vm13 = vcmp.eq.s32.totalorder %v4494_v16, %v4953_v43 }
 0x191   : > { %v5158_v28 = vpop.permute.xlu1 %1198  ;;  %v5160_v7 = vpop.permute.xlu0 %1195 }
 0x192   : > { %6826 = vst [vmem:[#allocation25_spill] sm:$0xff] %v5158_v28  ;;  %6827 = vst [vmem:[#allocation26_spill] sm:$0xff] %v5160_v7  ;;  %1579 = vperm.xlu0 %4210, %v628_v5   ;;  %v3739_v5 = vsel %vm1213_vm7, 1.0, %v6804_v14  ;;  %v5177_v7 = vld [vmem:[#allocation3] ss:$0 sm:$0xff]  ;;  %vm1219_vm7 = vcmp.eq.s32.totalorder %v4494_v16, %v4905_v53 }
 0x195   : > { %v5163_v32 = vpop.permute.xlu1 %1204  ;;  %v5165_v17 = vpop.permute.xlu0 %1201 }
 0x196   : > { %6828 = vst [vmem:[#allocation27_spill] sm:$0xff] %v5163_v32  ;;  %6829 = vst [vmem:[#allocation28_spill] sm:$0xff] %v5165_v17  ;;  %1585 = vperm.xlu0 %4210, %v630_v48  }
 0x199   : > { %v5168_v10 = vpop.permute.xlu1 %1210  ;;  %v5170_v24 = vpop.permute.xlu0 %1207 }
 0x19a   : > { %6830 = vst [vmem:[#allocation29_spill] sm:$0xff] %v5168_v10  ;;  %6831 = vst [vmem:[#allocation30_spill] sm:$0xff] %v5170_v24  ;;  %1591 = vperm.xlu0 %4210, %v632_v23  }
 0x19d   : > { %v1409_v42 = vpop.permute.xlu1 %1408  ;;  %v1406_v28 = vpop.permute.xlu0 %1405 }
 0x19e   : > { %vm1597_vm8 = vcmp.eq.s32.totalorder %v4494_v16, %v1409_v42  ;;  %vm1596_vm2 = vcmp.eq.s32.totalorder %v4494_v16, %v1406_v28 }
 0x19f   : > { %v3803_v32 = vsel %vm1597_vm8, 1.0, %v6804_v14  ;;  %v3802_v28 = vsel %vm1596_vm2, 1.0, %v6804_v14  ;;  %vm1224_vm2 = vcmp.eq.s32.totalorder %v4494_v16, %v4975_v40 }
 0x1a0   : > { %v5179_v48 = vsub.f32 %v3739_v5, %v3803_v32  ;;  %v3741_v32 = vsel %vm1215_vm9, 1.0, %v6804_v14  ;;  %v3740_v5 = vsel %vm1214_vm10, 1.0, %v6804_v14  ;;  %vm1220_vm9 = vcmp.eq.s32.totalorder %v4494_v16, %v4931_v20 }
 0x1a1   : > { %v1415_v23 = vpop.permute.xlu1 %1414  ;;  %v1412_v41 = vpop.permute.xlu0 %1411  ;;  %v3746_v20 = vsel %vm1220_vm9, 1.0, %v6804_v14 }
 0x1a2   : > { %vm1599_vm11 = vcmp.eq.s32.totalorder %v4494_v16, %v1415_v23  ;;  %v2440_v42 = vmul.f32 %v5177_v7, %v5179_v48  ;;  %vm1598_vm12 = vcmp.eq.s32.totalorder %v4494_v16, %v1412_v41 }
 0x1a3   : > { %v3805_v10 = vsel %vm1599_vm11, 1.0, %v6804_v14  ;;  %v3804_v45 = vsel %vm1598_vm12, 1.0, %v6804_v14  ;;  %vm1221_vm11 = vcmp.eq.s32.totalorder %v4494_v16, %v4927_v57 }
 0x1a4   : > { %v2506_v24 = vsel %vm398_vm1, %v2440_v42, 0.0  ;;  %v5196_v60 = vsub.f32 %v3741_v32, %v3805_v10  ;;  %v5198_v23 = vsub.f32 %v3740_v5, %v3804_v45  ;;  %v3747_v57 = vsel %vm1221_vm11, 1.0, %v6804_v14 }
 0x1a5   : > { %2507 = vadd.xlane.f32.xlu1 %v2506_v24  ;;  %v1421_v17 = vpop.permute.xlu1 %1420  ;;  %v1418_v59 = vpop.permute.xlu0 %1417 }
 0x1a6   : > { %vm1601_vm14 = vcmp.eq.s32.totalorder %v4494_v16, %v1421_v17  ;;  %vm1600_vm15 = vcmp.eq.s32.totalorder %v4494_v16, %v1418_v59  ;;  %v2441_v41 = vmul.f32 %v5177_v7, %v5198_v23  ;;  %v2442_v10 = vmul.f32 %v5177_v7, %v5196_v60 }
 0x1a7   : > { %v3806_v42 = vsel %vm1600_vm15, 1.0, %v6804_v14  ;;  %v3807_v17 = vsel %vm1601_vm14, 1.0, %v6804_v14  ;;  %vm1223_vm15 = vcmp.eq.s32.totalorder %v4494_v16, %v4949_v61 }
 0x1a8   : > { %v5208_v4 = vsub.f32 %v3742_v8, %v3806_v42  ;;  %v2509_v24 = vsel %vm398_vm1, %v2441_v41, 0.0  ;;  %v5221_v32 = vsub.f32 %v3743_v49, %v3807_v17  ;;  %v2512_v5 = vsel %vm398_vm1, %v2442_v10, 0.0 }
 0x1a9   : > { %2510 = vadd.xlane.f32.xlu1 %v2509_v24  ;;  %v1424_v59 = vpop.permute.xlu0 %1423  ;;  %v1427_v8 = vpop.permute.xlu1 %1426  ;;  %v5233_v24 = vsub.f32 %v3738_v52, %v3802_v28 }
 0x1aa   : > { %vm1602_vm3 = vcmp.eq.s32.totalorder %v4494_v16, %v1424_v59  ;;  %v2443_v45 = vmul.f32 %v5177_v7, %v5208_v4  ;;  %vm1603_vm6 = vcmp.eq.s32.totalorder %v4494_v16, %v1427_v8  ;;  %v2444_v59 = vmul.f32 %v5177_v7, %v5221_v32 }
 0x1ab   : > { %v3808_v41 = vsel %vm1602_vm3, 1.0, %v6804_v14  ;;  %v3809_v49 = vsel %vm1603_vm6, 1.0, %v6804_v14  ;;  %vm1226_vm6 = vcmp.eq.s32.totalorder %v4494_v16, %v4997_v39 }
 0x1ac   : > { %v5235_v10 = vsub.f32 %v3744_v12, %v3808_v41  ;;  %v2515_v17 = vsel %vm398_vm1, %v2443_v45, 0.0  ;;  %v2518_v41 = vsel %vm398_vm1, %v2444_v59, 0.0  ;;  %v2439_v45 = vmul.f32 %v5177_v7, %v5233_v24 }
 0x1ad   : > { %2513 = vadd.xlane.f32.xlu1 %v2512_v5  ;;  %v1430_v42 = vpop.permute.xlu0 %1429  ;;  %v3745_v5 = vsel %vm1219_vm7, 1.0, %v6804_v14  ;;  %v1433_v53 = vpop.permute.xlu1 %1432 }
 0x1ae   : > { %vm1604_vm8 = vcmp.eq.s32.totalorder %v4494_v16, %v1430_v42  ;;  %v5245_v28 = vsub.f32 %v3745_v5, %v3809_v49  ;;  %v2445_v52 = vmul.f32 %v5177_v7, %v5235_v10  ;;  %vm1605_vm10 = vcmp.eq.s32.totalorder %v4494_v16, %v1433_v53 }
 0x1af   : > { %v3810_v12 = vsel %vm1604_vm8, 1.0, %v6804_v14  ;;  %v2503_v59 = vsel %vm398_vm1, %v2439_v45, 0.0  ;;  %v3811_v9 = vsel %vm1605_vm10, 1.0, %v6804_v14  ;;  %vm1227_vm8 = vcmp.eq.s32.totalorder %v4494_v16, %v4993_v27 }
 0x1b0   : > { %v2521_v49 = vsel %vm398_vm1, %v2445_v52, 0.0  ;;  %v2446_v5 = vmul.f32 %v5177_v7, %v5245_v28  ;;  %vm1228_vm10 = vcmp.eq.s32.totalorder %v4494_v16, %v5017_v15 }
 0x1b1   : > { %2516 = vadd.xlane.f32.xlu1 %v2515_v17  ;;  %v1436_v8 = vpop.permute.xlu0 %1435  ;;  %v5257_v17 = vsub.f32 %v3746_v20, %v3810_v12  ;;  %v1439_v53 = vpop.permute.xlu1 %1438  ;;  %v5268_v12 = vsub.f32 %v3747_v57, %v3811_v9 }
 0x1b2   : > { %vm1606_vm12 = vcmp.eq.s32.totalorder %v4494_v16, %v1436_v8  ;;  %v2524_v45 = vsel %vm398_vm1, %v2446_v5, 0.0  ;;  %vm1607_vm14 = vcmp.eq.s32.totalorder %v4494_v16, %v1439_v53  ;;  %v3748_v8 = vsel %vm1222_vm13, 1.0, %v6804_v14 }
 0x1b3   : > { %v2447_v52 = vmul.f32 %v5177_v7, %v5257_v17  ;;  %v3812_v20 = vsel %vm1606_vm12, 1.0, %v6804_v14  ;;  %v2448_v9 = vmul.f32 %v5177_v7, %v5268_v12  ;;  %v3813_v5 = vsel %vm1607_vm14, 1.0, %v6804_v14 }
 0x1b4   : > { %v3749_v53 = vsel %vm1223_vm15, 1.0, %v6804_v14  ;;  %vm1229_vm12 = vcmp.eq.s32.totalorder %v4494_v16, %v5013_v54  ;;  %vm1230_vm14 = vcmp.eq.s32.totalorder %v4494_v16, %v5033_v58 }
 0x1b5   : > { %2519 = vadd.xlane.f32.xlu1 %v2518_v41  ;;  %v1442_v42 = vpop.permute.xlu0 %1441  ;;  %v2527_v43 = vsel %vm398_vm1, %v2447_v52, 0.0  ;;  %v5290_v61 = vsub.f32 %v3749_v53, %v3813_v5  ;;  %v2530_v52 = vsel %vm398_vm1, %v2448_v9, 0.0  ;;  %v3756_v58 = vsel %vm1230_vm14, 1.0, %v6804_v14 }
 0x1b6   : > { %vm1608_vm0 = vcmp.eq.s32.totalorder %v4494_v16, %v1442_v42  ;;  %v3750_v42 = vsel %vm1224_vm2, 1.0, %v6804_v14 }
 0x1b7   : > { %v2450_v9 = vmul.f32 %v5177_v7, %v5290_v61 }
 0x1b9   : > { %2504 = vadd.xlane.f32.xlu0 %v2503_v59  ;;  %2522 = vadd.xlane.f32.xlu1 %v2521_v49  ;;  %v1448_v41 = vpop.permute.xlu0 %1447  ;;  %v5278_v49 = vsub.f32 %v3748_v8, %v3812_v20  ;;  %v3814_v8 = vsel %vm1608_vm0, 1.0, %v6804_v14  ;;  %vm1231_vm0 = vcmp.eq.s32.totalorder %v4494_v16, %v5030_v47 }
 0x1ba   : > { %v5302_v40 = vsub.f32 %v3750_v42, %v3814_v8  ;;  %vm1610_vm5 = vcmp.eq.s32.totalorder %v4494_v16, %v1448_v41  ;;  %v3752_v41 = vsel %vm1226_vm6, 1.0, %v6804_v14 }
 0x1bb   : > { %v2449_v20 = vmul.f32 %v5177_v7, %v5278_v49  ;;  %v3816_v42 = vsel %vm1610_vm5, 1.0, %v6804_v14  ;;  %vm1233_vm5 = vcmp.eq.s32.totalorder %v4494_v16, %v5044_v22 }
 0x1bc   : > { %v2451_v8 = vmul.f32 %v5177_v7, %v5302_v40  ;;  %v5326_v39 = vsub.f32 %v3752_v41, %v3816_v42 }
 0x1bd   : > { %2525 = vadd.xlane.f32.xlu1 %v2524_v45  ;;  %v1454_v59 = vpop.permute.xlu0 %1453  ;;  %v1445_v45 = vpop.permute.xlu1 %1444  ;;  %v2533_v5 = vsel %vm398_vm1, %v2449_v20, 0.0  ;;  %v2536_v20 = vsel %vm398_vm1, %v2450_v9, 0.0 }
 0x1be   : > { %vm1609_vm3 = vcmp.eq.s32.totalorder %v4494_v16, %v1445_v45  ;;  %v3751_v45 = vsel %vm1225_vm4, 1.0, %v6804_v14  ;;  %vm1612_vm9 = vcmp.eq.s32.totalorder %v4494_v16, %v1454_v59  ;;  %v2453_v42 = vmul.f32 %v5177_v7, %v5326_v39 }
 0x1bf   : > { %v3815_v53 = vsel %vm1609_vm3, 1.0, %v6804_v14  ;;  %v3818_v41 = vsel %vm1612_vm9, 1.0, %v6804_v14  ;;  %v3754_v59 = vsel %vm1228_vm10, 1.0, %v6804_v14  ;;  %vm1232_vm3 = vcmp.eq.s32.totalorder %v4494_v16, %v5047_v30 }
 0x1c0   : > { %v5314_v1 = vsub.f32 %v3751_v45, %v3815_v53  ;;  %v2539_v53 = vsel %vm398_vm1, %v2451_v8, 0.0  ;;  %v5350_v15 = vsub.f32 %v3754_v59, %v3818_v41  ;;  %vm1235_vm9 = vcmp.eq.s32.totalorder %v4494_v16, %v5058_v56 }
 0x1c1   : > { %2528 = vadd.xlane.f32.xlu1 %v2527_v43  ;;  %v5284_v57 = vpop.permute.xlu0 %1459  ;;  %v1451_v0 = vpop.permute.xlu1 %1450 }
 0x1c2   : > { %vm1611_vm7 = vcmp.eq.s32.totalorder %v4494_v16, %v1451_v0  ;;  %v2452_v9 = vmul.f32 %v5177_v7, %v5314_v1  ;;  %v3753_v0 = vsel %vm1227_vm8, 1.0, %v6804_v14  ;;  %vm1614_vm13 = vcmp.eq.s32.totalorder %v4494_v16, %v5284_v57 }
 0x1c3   : > { %v3817_v45 = vsel %vm1611_vm7, 1.0, %v6804_v14  ;;  %v2455_v41 = vmul.f32 %v5177_v7, %v5350_v15  ;;  %v3820_v59 = vsel %vm1614_vm13, 1.0, %v6804_v14  ;;  %vm1234_vm7 = vcmp.eq.s32.totalorder %v4494_v16, %v5061_v31 }
 0x1c4   : > { %v5338_v27 = vsub.f32 %v3753_v0, %v3817_v45  ;;  %v2542_v8 = vsel %vm398_vm1, %v2452_v9, 0.0  ;;  %v2545_v45 = vsel %vm398_vm1, %v2453_v42, 0.0  ;;  %v5380_v3 = vsub.f32 %v3756_v58, %v3820_v59 }
 0x1c5   : > { %2531 = vadd.xlane.f32.xlu1 %v2530_v52  ;;  %v5296_v43 = vpop.permute.xlu0 %1465  ;;  %v1457_v33 = vpop.permute.xlu1 %1456  ;;  %vm1237_vm13 = vcmp.eq.s32.totalorder %v4494_v16, %v5070_v37 }
 0x1c6   : > { %vm1613_vm11 = vcmp.eq.s32.totalorder %v4494_v16, %v1457_v33  ;;  %v2454_v9 = vmul.f32 %v5177_v7, %v5338_v27  ;;  %v3755_v33 = vsel %vm1229_vm12, 1.0, %v6804_v14  ;;  %vm1616_vm2 = vcmp.eq.s32.totalorder %v4494_v16, %v5296_v43 }
 0x1c7   : > { %v3819_v0 = vsel %vm1613_vm11, 1.0, %v6804_v14  ;;  %v3822_v47 = vsel %vm1616_vm2, 1.0, %v6804_v14  ;;  %vm1236_vm11 = vcmp.eq.s32.totalorder %v4494_v16, %v5073_v2  ;;  %v3763_v37 = vsel %vm1237_vm13, 1.0, %v6804_v14 }
 0x1c8   : > { %v5363_v54 = vsub.f32 %v3755_v33, %v3819_v0  ;;  %v2548_v42 = vsel %vm398_vm1, %v2454_v9, 0.0  ;;  %vm1238_vm2 = vcmp.eq.s32.totalorder %v4494_v16, %v5080_v55  ;;  %vm1246_vm13 = vcmp.eq.s32.totalorder %v4494_v16, %v5100_v51 }
 0x1c9   : > { %2534 = vadd.xlane.f32.xlu1 %v2533_v5  ;;  %v5308_v52 = vpop.permute.xlu0 %1471  ;;  %v1463_v62 = vpop.permute.xlu1 %1462 }
 0x1ca   : > { %vm1615_vm15 = vcmp.eq.s32.totalorder %v4494_v16, %v1463_v62  ;;  %v2551_v62 = vsel %vm398_vm1, %v2455_v41, 0.0  ;;  %vm1618_vm6 = vcmp.eq.s32.totalorder %v4494_v16, %v5308_v52 }
 0x1cb   : > { %v3821_v21 = vsel %vm1615_vm15, 1.0, %v6804_v14  ;;  %vm1260_vm15 = vcmp.eq.s32.totalorder %v4494_v16, %v5135_v35 }
 0x1cc   : > { %v3786_v35 = vsel %vm1260_vm15, 1.0, %v6804_v14 }
 0x1cd   : > { %2537 = vadd.xlane.f32.xlu1 %v2536_v20  ;;  %v5320_v5 = vpop.permute.xlu0 %1477  ;;  %v1469_v25 = vpop.permute.xlu1 %1468 }
 0x1ce   : > { %vm1617_vm4 = vcmp.eq.s32.totalorder %v4494_v16, %v1469_v25  ;;  %vm1620_vm10 = vcmp.eq.s32.totalorder %v4494_v16, %v5320_v5 }
 0x1cf   : > { %v3826_v56 = vsel %vm1620_vm10, 1.0, %v6804_v14  ;;  %vm1244_vm10 = vcmp.eq.s32.totalorder %v4494_v16, %v5095_v50 }
 0x1d1   : > { %2540 = vadd.xlane.f32.xlu1 %v2539_v53  ;;  %v5332_v20 = vpop.permute.xlu0 %1483 }
 0x1d5   : > { %2543 = vadd.xlane.f32.xlu1 %v2542_v8  ;;  %v5344_v53 = vpop.permute.xlu0 %1489 }
 0x1d9   : > { %2546 = vadd.xlane.f32.xlu1 %v2545_v45  ;;  %v5356_v8 = vpop.permute.xlu0 %1495 }
 0x1dd   : > { %2549 = vadd.xlane.f32.xlu1 %v2548_v42  ;;  %v5369_v45 = vpop.permute.xlu0 %1501 }
 0x1de   : > { %vm1628_vm15 = vcmp.eq.s32.totalorder %v4494_v16, %v5369_v45  ;;  %v3772_v45 = vsel %vm1246_vm13, 1.0, %v6804_v14 }
 0x1df   : > { %v4037_v57 = vpop.f32.mrb[2].mxu0  ;;  %v5372_v29 = vpop.f32.mrb[0].mxu1 }
 0x1e0   : > { %6832 = vst [vmem:[#allocation31_spill] sm:$0xff] %v5372_v29  ;;  %v2696_v9 = vmul.f32 %v4037_v57, %v5179_v48  ;;  %v2113_v0 = vpop.f32.mrb[3].mxu0  ;;  %v5378_v33 = vpop.f32.mrb[1].mxu1  ;;  %v2456_v29 = vmul.f32 %v5177_v7, %v5363_v54 }
 0x1e1   : > { %6833 = vst [vmem:[#allocation32_spill] sm:$0xff] %v5378_v33  ;;  %v5383_v42 = vmul.f32 %v2113_v0, %v5233_v24  ;;  %2552 = vadd.xlane.f32.xlu1 %v2551_v62  ;;  %v5389_v13 = vpop.permute.xlu0 %1507  ;;  %v3757_v24 = vsel %vm1231_vm0, 1.0, %v6804_v14  ;;  %vm1622_vm0 = vcmp.eq.s32.totalorder %v4494_v16, %v5332_v20 }
 0x1e2   : > { %v2762_v48 = vsel %vm398_vm1, %v2696_v9, 0.0  ;;  %v5405_v9 = vsub.f32 %v3757_v24, %v3821_v21  ;;  %v2554_v62 = vsel %vm398_vm1, %v2456_v29, 0.0  ;;  %v3758_v21 = vsel %vm1232_vm3, 1.0, %v6804_v14 }
 0x1e3   : > { %v4040_v59 = vpop.f32.mrb[4].mxu0  ;;  %v5394_v57 = vpop.f32.mrb[2].mxu1  ;;  %2763 = vadd.xlane.f32.xlu0 %v2762_v48  ;;  %v2457_v48 = vmul.f32 %v5177_v7, %v5380_v3  ;;  %v5426_v24 = vsub.f32 %v3758_v21, %v3822_v47  ;;  %vm1239_vm3 = vcmp.eq.s32.totalorder %v4494_v16, %v5078_v44 }
 0x1e4   : > { %6834 = vst [vmem:[#allocation33_spill] sm:$0xff] %v5394_v57  ;;  %v2698_v41 = vmul.f32 %v4040_v59, %v5196_v60  ;;  %v2123_v58 = vpop.f32.mrb[5].mxu0  ;;  %v5403_v0 = vpop.f32.mrb[3].mxu1 }
 0x1e5   : > { %6835 = vst [vmem:[#allocation34_spill] sm:$0xff] %v5403_v0  ;;  %v2697_v43 = vmul.f32 %v2123_v58, %v5198_v23  ;;  %2555 = vadd.xlane.f32.xlu1 %v2554_v62  ;;  %v5412_v57 = vpop.permute.xlu0 %1513  ;;  %v2557_v25 = vsel %vm398_vm1, %v2457_v48, 0.0  ;;  %v3823_v58 = vsel %vm1617_vm4, 1.0, %v6804_v14  ;;  %v1475_v62 = vpop.permute.xlu1 %1474  ;;  %v3759_v48 = vsel %vm1233_vm5, 1.0, %v6804_v14 }
 0x1e6   : > { %v2768_v33 = vsel %vm398_vm1, %v2698_v41, 0.0  ;;  %v5449_v21 = vsub.f32 %v3759_v48, %v3823_v58  ;;  %vm1619_vm8 = vcmp.eq.s32.totalorder %v4494_v16, %v1475_v62  ;;  %vm1241_vm4 = vcmp.eq.s32.totalorder %v4494_v16, %v5083_v11 }
 0x1e7   : > { %v4043_v60 = vpop.f32.mrb[6].mxu0  ;;  %v5416_v59 = vpop.f32.mrb[4].mxu1  ;;  %2769 = vadd.xlane.f32.xlu0 %v2768_v33  ;;  %v2458_v33 = vmul.f32 %v5177_v7, %v5405_v9  ;;  %v2765_v0 = vsel %vm398_vm1, %v2697_v43, 0.0  ;;  %vm1624_vm5 = vcmp.eq.s32.totalorder %v4494_v16, %v5344_v53  ;;  %v5758_v44 = vsel %vm1241_vm4, 1.0, %v6804_v14 }
 0x1e8   : > { %6836 = vst [vmem:[#allocation35_spill] sm:$0xff] %v5416_v59  ;;  %v2133_v29 = vpop.f32.mrb[7].mxu0  ;;  %v5424_v23 = vpop.f32.mrb[5].mxu1  ;;  %v2700_v59 = vmul.f32 %v4043_v60, %v5221_v32  ;;  %v3830_v11 = vsel %vm1624_vm5, 1.0, %v6804_v14  ;;  %vm1251_vm4 = vcmp.eq.s32.totalorder %v4494_v16, %v5108_v26  ;;  %vm1250_vm5 = vcmp.eq.s32.totalorder %v4494_v16, %v5110_v38 }
 0x1e9   : > { %v2699_v41 = vmul.f32 %v2133_v29, %v5208_v4  ;;  %2558 = vadd.xlane.f32.xlu1 %v2557_v25  ;;  %v5434_v30 = vpop.permute.xlu0 %1519  ;;  %v2560_v52 = vsel %vm398_vm1, %v2458_v33, 0.0  ;;  %v3824_v29 = vsel %vm1618_vm6, 1.0, %v6804_v14  ;;  %vm1240_vm6 = vcmp.eq.s32.totalorder %v4494_v16, %v5085_v6 }
 0x1ea   : > { %v2774_v25 = vsel %vm398_vm1, %v2700_v59, 0.0 }
 0x1eb   : > { %v4046_v47 = vpop.f32.mrb[8].mxu0  ;;  %v5439_v4 = vpop.f32.mrb[6].mxu1  ;;  %2766 = vadd.xlane.f32.xlu0 %v2765_v0  ;;  %v2459_v0 = vmul.f32 %v5177_v7, %v5426_v24 }
 0x1ec   : > { %6837 = vst [vmem:[#allocation36_spill] sm:$0xff] %v5439_v4  ;;  %v2143_v32 = vpop.f32.mrb[9].mxu0  ;;  %v5447_v60 = vpop.f32.mrb[7].mxu1 }
 0x1ed   : > { %6838 = vst [vmem:[#allocation37_spill] sm:$0xff] %v5447_v60  ;;  %v2701_v43 = vmul.f32 %v2143_v32, %v5235_v10  ;;  %2561 = vadd.xlane.f32.xlu1 %v2560_v52  ;;  %v5456_v22 = vpop.permute.xlu0 %1525  ;;  %v3760_v10 = vsel %vm1234_vm7, 1.0, %v6804_v14  ;;  %v2563_v62 = vsel %vm398_vm1, %v2459_v0, 0.0  ;;  %v2460_v32 = vmul.f32 %v5177_v7, %v5449_v21 }
 0x1ee   : > { %v5470_v48 = vsub.f32 %v3760_v10, %v3824_v29  ;;  %v3825_v52 = vsel %vm1619_vm8, 1.0, %v6804_v14  ;;  %v3761_v0 = vsel %vm1235_vm9, 1.0, %v6804_v14  ;;  %vm1243_vm7 = vcmp.eq.s32.totalorder %v4494_v16, %v5088_v46 }
 0x1ef   : > { %v4049_v4 = vpop.f32.mrb[10].mxu0  ;;  %v5460_v60 = vpop.f32.mrb[8].mxu1  ;;  %2775 = vadd.xlane.f32.xlu0 %v2774_v25  ;;  %v2702_v25 = vmul.f32 %v4046_v47, %v5245_v28  ;;  %v5495_v10 = vsub.f32 %v3761_v0, %v3825_v52  ;;  %v2566_v5 = vsel %vm398_vm1, %v2460_v32, 0.0  ;;  %vm1242_vm8 = vcmp.eq.s32.totalorder %v4494_v16, %v5090_v63 }
 0x1f0   : > { %6839 = vst [vmem:[#allocation38_spill] sm:$0xff] %v5460_v60  ;;  %v2153_v33 = vpop.f32.mrb[11].mxu0  ;;  %v5468_v58 = vpop.f32.mrb[9].mxu1  ;;  %v2771_v60 = vsel %vm398_vm1, %v2699_v41, 0.0  ;;  %vm1245_vm9 = vcmp.eq.s32.totalorder %v4494_v16, %v5093_v34  ;;  %v5773_v46 = vsel %vm1243_vm7, 1.0, %v6804_v14  ;;  %v3768_v63 = vsel %vm1242_vm8, 1.0, %v6804_v14 }
 0x1f1   : > { %6840 = vst [vmem:[#allocation39_spill] sm:$0xff] %v5468_v58  ;;  %v5473_v59 = vmul.f32 %v2153_v33, %v5257_v17  ;;  %2564 = vadd.xlane.f32.xlu1 %v2563_v62  ;;  %v5480_v31 = vpop.permute.xlu0 %1531  ;;  %v1481_v33 = vpop.permute.xlu1 %1480  ;;  %v2780_v2 = vsel %vm398_vm1, %v2702_v25, 0.0  ;;  %v2462_v25 = vmul.f32 %v5177_v7, %v5495_v10  ;;  %v2704_v58 = vmul.f32 %v4049_v4, %v5268_v12 }
 0x1f2   : > { %vm1621_vm12 = vcmp.eq.s32.totalorder %v4494_v16, %v1481_v33  ;;  %v5787_v50 = vsel %vm1245_vm9, 1.0, %v6804_v14  ;;  %vm1636_vm13 = vcmp.eq.s32.totalorder %v4494_v16, %v5456_v22 }
 0x1f3   : > { %v4052_v29 = vpop.f32.mrb[12].mxu0  ;;  %v5485_v17 = vpop.f32.mrb[10].mxu1  ;;  %2772 = vadd.xlane.f32.xlu0 %v2771_v60  ;;  %v2461_v60 = vmul.f32 %v5177_v7, %v5470_v48  ;;  %v2572_v4 = vsel %vm398_vm1, %v2462_v25, 0.0 }
 0x1f4   : > { %6841 = vst [vmem:[#allocation40_spill] sm:$0xff] %v5485_v17  ;;  %v2163_v28 = vpop.f32.mrb[13].mxu0  ;;  %v5493_v47 = vpop.f32.mrb[11].mxu1 }
 0x1f5   : > { %6842 = vst [vmem:[#allocation41_spill] sm:$0xff] %v5493_v47  ;;  %v5498_v41 = vmul.f32 %v2163_v28, %v5278_v49  ;;  %2567 = vadd.xlane.f32.xlu1 %v2566_v5  ;;  %v5504_v62 = vpop.permute.xlu0 %1537  ;;  %v3762_v49 = vsel %vm1236_vm11, 1.0, %v6804_v14  ;;  %v2569_v5 = vsel %vm398_vm1, %v2461_v60, 0.0  ;;  %v3827_v60 = vsel %vm1621_vm12, 1.0, %v6804_v14 }
 0x1f6   : > { %6843 = vst [vmem:[#allocation42_spill] sm:$0xff] %v5504_v62  ;;  %v5514_v28 = vsub.f32 %v3762_v49, %v3826_v56  ;;  %vm1626_vm11 = vcmp.eq.s32.totalorder %v4494_v16, %v5356_v8  ;;  %vm1247_vm12 = vcmp.eq.s32.totalorder %v4494_v16, %v5098_v18  ;;  %v3770_v8 = vsel %vm1244_vm10, 1.0, %v6804_v14 }
 0x1f7   : > { %v5507_v17 = vpop.f32.mrb[14].mxu0  ;;  %v5509_v52 = vpop.f32.mrb[12].mxu1  ;;  %2781 = vadd.xlane.f32.xlu0 %v2780_v2  ;;  %v2777_v2 = vsel %vm398_vm1, %v2701_v43, 0.0  ;;  %v3832_v18 = vsel %vm1626_vm11, 1.0, %v6804_v14  ;;  %vm1634_vm11 = vcmp.eq.s32.totalorder %v4494_v16, %v5434_v30 }
 0x1f8   : > { %6844 = vst [vmem:[#allocation43_spill] sm:$0xff] %v5509_v52  ;;  %v2173_v0 = vpop.f32.mrb[15].mxu0  ;;  %v5512_v32 = vpop.f32.mrb[13].mxu1  ;;  %v2463_v43 = vmul.f32 %v5177_v7, %v5514_v28 }
 0x1f9   : > { %6845 = vst [vmem:[#allocation44_spill] sm:$0xff] %v5512_v32  ;;  %v5517_v47 = vmul.f32 %v2173_v0, %v5302_v40  ;;  %2570 = vadd.xlane.f32.xlu1 %v2569_v5  ;;  %v5523_v52 = vpop.permute.xlu0 %1543  ;;  %v2786_v0 = vsel %vm398_vm1, %v2704_v58, 0.0  ;;  %v2706_v58 = vmul.f32 %v4052_v29, %v5290_v61  ;;  %v2759_v61 = vsel %vm398_vm1, %v5383_v42, 0.0 }
 0x1fa   : > { %6846 = vst [vmem:[#allocation45_spill] sm:$0xff] %v5523_v52 }
 0x1fb   : > { %v5527_v32 = vpop.f32.mrb[16].mxu0  ;;  %v5529_v56 = vpop.f32.mrb[14].mxu1  ;;  %2778 = vadd.xlane.f32.xlu0 %v2777_v2  ;;  %v2792_v29 = vsel %vm398_vm1, %v2706_v58, 0.0  ;;  %v2789_v58 = vsel %vm398_vm1, %v5498_v41, 0.0 }
 0x1fc   : > { %6847 = vst [vmem:[#allocation46_spill] sm:$0xff] %v5529_v56  ;;  %v2183_v40 = vpop.f32.mrb[17].mxu0  ;;  %v5531_v49 = vpop.f32.mrb[15].mxu1 }
 0x1fd   : > { %6848 = vst [vmem:[#allocation47_spill] sm:$0xff] %v5531_v49  ;;  %v5536_v12 = vmul.f32 %v2183_v40, %v5326_v39  ;;  %2573 = vadd.xlane.f32.xlu1 %v2572_v4  ;;  %v1550_v33 = vpop.permute.xlu0 %1549  ;;  %v5548_v40 = vsub.f32 %v3763_v37, %v3827_v60  ;;  %v2575_v4 = vsel %vm398_vm1, %v2463_v43, 0.0  ;;  %v6887_v49 = vld [vmem:[#allocation12_spill] sm:$0xff] }
 0x1fe   : > { %vm1644_vm14 = vcmp.eq.s32.totalorder %v4494_v16, %v1550_v33  ;;  %vm1257_vm10 = vcmp.eq.s32.totalorder %v4494_v16, %v6887_v49 }
 0x1ff   : > { %v4061_v5 = vpop.f32.mrb[18].mxu0  ;;  %v5543_v2 = vpop.f32.mrb[16].mxu1  ;;  %2787 = vadd.xlane.f32.xlu0 %v2786_v0  ;;  %v2783_v0 = vsel %vm398_vm1, %v5473_v59, 0.0  ;;  %v3850_v60 = vsel %vm1644_vm14, 1.0, %v6804_v14  ;;  %v2464_v59 = vmul.f32 %v5177_v7, %v5548_v40  ;;  %vm1249_vm14 = vcmp.eq.s32.totalorder %v4494_v16, %v5103_v36 }
 0x200   : > { %6849 = vst [vmem:[#allocation48_spill] sm:$0xff] %v5543_v2  ;;  %v2193_v56 = vpop.f32.mrb[19].mxu0  ;;  %v5546_v39 = vpop.f32.mrb[17].mxu1  ;;  %v5796_v36 = vsel %vm1247_vm12, 1.0, %v6804_v14 }
 0x201   : > { %6850 = vst [vmem:[#allocation49_spill] sm:$0xff] %v5546_v39  ;;  %v5552_v25 = vmul.f32 %v2193_v56, %v5350_v15  ;;  %2576 = vadd.xlane.f32.xlu1 %v2575_v4  ;;  %v5576_v4 = vsub.f32 %v3786_v35, %v3850_v60 }
 0x203   : > { %v4064_v2 = vpop.f32.mrb[20].mxu0  ;;  %v5560_v39 = vpop.f32.mrb[18].mxu1  ;;  %2784 = vadd.xlane.f32.xlu0 %v2783_v0  ;;  %6854 = vst [vmem:[#allocation53_spill] sm:$0xff] %v5576_v4 }
 0x204   : > { %6851 = vst [vmem:[#allocation50_spill] sm:$0xff] %v5560_v39  ;;  %v2203_v33 = vpop.f32.mrb[21].mxu0  ;;  %v5563_v15 = vpop.f32.mrb[19].mxu1  ;;  %v2578_v39 = vsel %vm398_vm1, %v2464_v59, 0.0 }
 0x205   : > { %6852 = vst [vmem:[#allocation51_spill] sm:$0xff] %v5563_v15  ;;  %v5566_v56 = vmul.f32 %v2203_v33, %v5380_v3  ;;  %2760 = vadd.xlane.f32.xlu1 %v2759_v61  ;;  %v2708_v61 = vmul.f32 %v5507_v17, %v5314_v1 }
 0x207   : > { %v4067_v43 = vpop.f32.mrb[22].mxu0  ;;  %v5574_v37 = vpop.f32.mrb[20].mxu1  ;;  %2793 = vadd.xlane.f32.xlu0 %v2792_v29 }
 0x208   : > { %6853 = vst [vmem:[#allocation52_spill] sm:$0xff] %v5574_v37  ;;  %v2213_v0 = vpop.f32.mrb[23].mxu0  ;;  %v2353_v3 = vpop.f32.mrb[21].mxu1 }
 0x209   : > { %v5579_v33 = vmul.f32 %v2213_v0, %v5426_v24  ;;  %v5582_v42 = vmul.f32 %v2353_v3, %v5576_v4  ;;  %2579 = vadd.xlane.f32.xlu1 %v2578_v39  ;;  %v2798_v0 = vsel %vm398_vm1, %v2708_v61, 0.0  ;;  %v2710_v39 = vmul.f32 %v5527_v32, %v5338_v27  ;;  %v597_v32 = vld [vmem:[%s4802_s11 + $0xd8] sm:$0xff] }
 0x20a   : > { %v2795_v3 = vsel %vm398_vm1, %v5517_v47, 0.0  ;;  %v2712_v47 = vmul.f32 %v4061_v5, %v5363_v54  ;;  %v601_v54 = vld [vmem:[%s4802_s11 + $0xf8] sm:$0xff]  ;;  %v2807_v5 = vsel %vm398_vm1, %v5552_v25, 0.0  ;;  %v6889_v4 = vlaneseq }
 0x20b   : > { %6855 = vst [vmem:[#allocation54_spill] sm:$0xff] %v5582_v42  ;;  %v4070_v29 = vpop.f32.mrb[24].mxu0  ;;  %v5589_v60 = vpop.f32.mrb[22].mxu1  ;;  %2790 = vadd.xlane.f32.xlu0 %v2789_v58  ;;  %v3776_v42 = vsel %vm1250_vm5, 1.0, %v6804_v14 }
 0x20c   : > { %6856 = vst [vmem:[#allocation55_spill] sm:$0xff] %v5589_v60  ;;  %v2223_v35 = vpop.f32.mrb[25].mxu0  ;;  %v5591_v37 = vpop.f32.mrb[23].mxu1  ;;  %v6880_v60 = vld [vmem:[#allocation8_spill] sm:$0xff] }
 0x20d   : > { %6857 = vst [vmem:[#allocation56_spill] sm:$0xff] %v5591_v37  ;;  %v5594_v24 = vmul.f32 %v2223_v35, %v5470_v48 }
 0x20f   : > { %v5597_v59 = vpop.f32.mrb[26].mxu0  ;;  %v5599_v1 = vpop.f32.mrb[24].mxu1  ;;  %2799 = vadd.xlane.f32.xlu0 %v2798_v0  ;;  %v2804_v0 = vsel %vm398_vm1, %v2710_v39, 0.0  ;;  %v599_v39 = vld [vmem:[%s4802_s11 + $0xe8] sm:$0xff] }
 0x210   : > { %6858 = vst [vmem:[#allocation57_spill] sm:$0xff] %v5599_v1  ;;  %v2233_v17 = vpop.f32.mrb[27].mxu0  ;;  %v5601_v41 = vpop.f32.mrb[25].mxu1  ;;  %v2720_v20 = vmul.f32 %v5597_v59, %v5548_v40  ;;  %v619_v59 = vld [vmem:[%s4802_s11 + $0x188] sm:$0xff] }
 0x211   : > { %6859 = vst [vmem:[#allocation58_spill] sm:$0xff] %v5601_v41  ;;  %v2801_v41 = vsel %vm398_vm1, %v5536_v12, 0.0  ;;  %v2714_v12 = vmul.f32 %v4064_v2, %v5405_v9  ;;  %v2813_v9 = vsel %vm398_vm1, %v5566_v56, 0.0  ;;  %v607_v2 = vld [vmem:[%s4802_s11 + $0x128] sm:$0xff]  ;;  %v5683_v40 = vpop.permute.xlu0 %1555 }
 0x212   : > { %6870 = vst [vmem:[#allocation69_spill] sm:$0xff] %v5683_v40  ;;  %v5839_v40 = vshrl.u32 %v6889_v4, 7 }
 0x213   : > { %v5607_v58 = vpop.f32.mrb[28].mxu0  ;;  %v5609_v48 = vpop.f32.mrb[26].mxu1  ;;  %2796 = vadd.xlane.f32.xlu0 %v2795_v3 }
 0x214   : > { %6860 = vst [vmem:[#allocation59_spill] sm:$0xff] %v5609_v48  ;;  %v5611_v61 = vpop.f32.mrb[29].mxu0  ;;  %v5613_v35 = vpop.f32.mrb[27].mxu1 }
 0x215   : > { %6861 = vst [vmem:[#allocation60_spill] sm:$0xff] %v5613_v35  ;;  %v5755_v35 = vsel %vm1239_vm3, 1.0, %v6804_v14  ;;  %vm1248_vm3 = vcmp.eq.s32.totalorder %v4494_v16, %v5105_v19  ;;  %v1818_v19 = vsub.f32 %v3768_v63, %v3832_v18 }
 0x216   : > { %v3774_v38 = vsel %vm1248_vm3, 1.0, %v6804_v14 }
 0x217   : > { %v5616_v1 = vpop.f32.mrb[28].mxu1  ;;  %2805 = vadd.xlane.f32.xlu0 %v2804_v0 }
 0x218   : > { %6862 = vst [vmem:[#allocation61_spill] sm:$0xff] %v5616_v1  ;;  %v5618_v27 = vpop.f32.mrb[29].mxu1  ;;  %v2810_v1 = vsel %vm398_vm1, %v2712_v47, 0.0  ;;  %v603_v47 = vld [vmem:[%s4802_s11 + $0x108] sm:$0xff] }
 0x219   : > { %6863 = vst [vmem:[#allocation62_spill] sm:$0xff] %v5618_v27 }
 0x21a   : > { %1486 = vperm.xlu1 %4211, %v597_v32  }
 0x21b   : > { %v5624_v3 = vpop.f32.mrb[30].mxu1  ;;  %2802 = vadd.xlane.f32.xlu0 %v2801_v41 }
 0x21c   : > { %6864 = vst [vmem:[#allocation63_spill] sm:$0xff] %v5624_v3  ;;  %v5626_v48 = vpop.f32.mrb[31].mxu1 }
 0x21d   : > { %6865 = vst [vmem:[#allocation64_spill] sm:$0xff] %v5626_v48 }
 0x21e   : > { %1492 = vperm.xlu1 %4211, %v599_v39   ;;  %v2816_v39 = vsel %vm398_vm1, %v2714_v12, 0.0  ;;  %v2718_v12 = vmul.f32 %v4070_v29, %v5495_v10  ;;  %v2719_v10 = vmul.f32 %v2233_v17, %v5514_v28  ;;  %v3764_v28 = vsel %vm1238_vm2, 1.0, %v6804_v14 }
 0x21f   : > { %v5630_v0 = vpop.f32.mrb[32].mxu1  ;;  %2811 = vadd.xlane.f32.xlu0 %v2810_v1  ;;  %v605_v1 = vld [vmem:[%s4802_s11 + $0x118] sm:$0xff]  ;;  %vm1632_vm2 = vcmp.eq.s32.totalorder %v4494_v16, %v5412_v57  ;;  %v5808_v57 = vsel %vm1249_vm14, 1.0, %v6804_v14 }
 0x220   : > { %6866 = vst [vmem:[#allocation65_spill] sm:$0xff] %v5630_v0  ;;  %v5632_v27 = vpop.f32.mrb[33].mxu1  ;;  %v2716_v0 = vmul.f32 %v4067_v43, %v5449_v21  ;;  %v611_v21 = vld [vmem:[%s4802_s11 + $0x148] sm:$0xff]  ;;  %v2828_v56 = vsel %vm398_vm1, %v2718_v12, 0.0  ;;  %v3838_v26 = vsel %vm1632_vm2, 1.0, %v6804_v14 }
 0x221   : > { %6867 = vst [vmem:[#allocation66_spill] sm:$0xff] %v5632_v27 }
 0x222   : > { %1498 = vperm.xlu1 %4211, %v601_v54   ;;  %v2822_v25 = vsel %vm398_vm1, %v2716_v0, 0.0  ;;  %v609_v54 = vld [vmem:[%s4802_s11 + $0x138] sm:$0xff] }
 0x223   : > { %v5638_v41 = vpop.f32.mrb[34].mxu1  ;;  %2808 = vadd.xlane.f32.xlu0 %v2807_v5  ;;  %v613_v0 = vld [vmem:[%s4802_s11 + $0x158] sm:$0xff] }
 0x224   : > { %6868 = vst [vmem:[#allocation67_spill] sm:$0xff] %v5638_v41  ;;  %v5640_v32 = vpop.f32.mrb[35].mxu1 }
 0x225   : > { %6869 = vst [vmem:[#allocation68_spill] sm:$0xff] %v5640_v32 }
 0x226   : > { %1504 = vperm.xlu1 %4211, %v603_v47   ;;  %v2819_v47 = vsel %vm398_vm1, %v5579_v33, 0.0  ;;  %v2825_v33 = vsel %vm398_vm1, %v5594_v24, 0.0 }
 0x227   : > { %2817 = vadd.xlane.f32.xlu0 %v2816_v39  ;;  %v615_v39 = vld [vmem:[%s4802_s11 + $0x168] sm:$0xff] }
 0x22a   : > { %1510 = vperm.xlu1 %4211, %v605_v1   ;;  %v3828_v1 = vsel %vm1622_vm0, 1.0, %v6804_v14  ;;  %vm1630_vm0 = vcmp.eq.s32.totalorder %v4494_v16, %v5389_v13 }
 0x22b   : > { %2814 = vadd.xlane.f32.xlu0 %v2813_v9  ;;  %v2831_v9 = vsel %vm398_vm1, %v2719_v10, 0.0  ;;  %v1814_v24 = vsub.f32 %v3764_v28, %v3828_v1  ;;  %v627_v28 = vld [vmem:[%s4802_s11 + $0x1c8] sm:$0xff] }
 0x22d   : > { %v2721_v55 = vmul.f32 %v5611_v61, %v1814_v24  ;;  %v621_v61 = vld [vmem:[%s4802_s11 + $0x198] sm:$0xff] }
 0x22e   : > { %1516 = vperm.xlu1 %4211, %v607_v2   ;;  %v617_v2 = vld [vmem:[%s4802_s11 + $0x178] sm:$0xff] }
 0x22f   : > { %2823 = vadd.xlane.f32.xlu0 %v2822_v25  ;;  %v2834_v25 = vsel %vm398_vm1, %v2720_v20, 0.0  ;;  %v2837_v12 = vsel %vm398_vm1, %v2721_v55, 0.0  ;;  %v625_v20 = vld [vmem:[%s4802_s11 + $0x1b8] sm:$0xff] }
 0x230   : > { %v629_v55 = vld [vmem:[%s4802_s11 + $0x1d8] sm:$0xff] }
 0x232   : > { %v5652_v5 = vpop.xlane.xlu1 %2507  ;;  %1522 = vperm.xlu1 %4211, %v609_v54  }
 0x233   : > { %2820 = vadd.xlane.f32.xlu0 %v2819_v47  ;;  %v2465_v47 = vmul.f32 %v5177_v7, %v1814_v24 }
 0x236   : > { %v5658_v43 = vpop.xlane.xlu1 %2510  ;;  %1528 = vperm.xlu1 %4211, %v611_v21  }
 0x237   : > { %2829 = vadd.xlane.f32.xlu0 %v2828_v56  ;;  %v5691_v56 = vpop.permute.xlu0 %1561 }
 0x238   : > { %6871 = vst [vmem:[#allocation70_spill] sm:$0xff] %v5691_v56  ;;  %v5836_v56 = vsub.f32 %v3774_v38, %v3838_v26  ;;  %v5864_v26 = vsel %vm1257_vm10, 1.0, %v6804_v14  ;;  %v6896_v38 = vld [vmem:[#allocation34_spill] sm:$0xff] }
 0x239   : > { %6895 = vst [vmem:[#allocation79_spill] sm:$0xff] %v5864_v26 }
 0x23a   : > { %v5666_v29 = vpop.xlane.xlu1 %2513  ;;  %1534 = vperm.xlu1 %4211, %v613_v0   ;;  %v2581_v0 = vsel %vm398_vm1, %v2465_v47, 0.0 }
 0x23b   : > { %2826 = vadd.xlane.f32.xlu0 %v2825_v33  ;;  %v623_v33 = vld [vmem:[%s4802_s11 + $0x1a8] sm:$0xff]  ;;  %v5699_v1 = vpop.permute.xlu0 %1567 }
 0x23c   : > { %6872 = vst [vmem:[#allocation71_spill] sm:$0xff] %v5699_v1 }
 0x23e   : > { %v5676_v17 = vpop.xlane.xlu1 %2516  ;;  %1540 = vperm.xlu1 %4211, %v615_v39  }
 0x23f   : > { %2832 = vadd.xlane.f32.xlu0 %v2831_v9  ;;  %v5705_v24 = vpop.permute.xlu0 %1573 }
 0x240   : > { %6873 = vst [vmem:[#allocation72_spill] sm:$0xff] %v5705_v24  ;;  %v6884_v24 = vld [vmem:[#allocation10_spill] sm:$0xff] }
 0x241   : > { %vm1255_vm8 = vcmp.eq.s32.totalorder %v4494_v16, %v6884_v24  ;;  %v6890_v24 = vld [vmem:[#allocation32_spill] sm:$0xff] }
 0x242   : > { %v5681_v54 = vpop.xlane.xlu1 %2519  ;;  %1546 = vperm.xlu1 %4211, %v617_v2  }
 0x243   : > { %2835 = vadd.xlane.f32.xlu0 %v2834_v25 }
 0x246   : > { %v5688_v21 = vpop.xlane.xlu1 %2522  ;;  %1552 = vperm.xlu1 %4211, %v619_v59   ;;  %v5712_v59 = vpop.permute.xlu0 %1579 }
 0x247   : > { %2838 = vadd.xlane.f32.xlu0 %v2837_v12  ;;  %6874 = vst [vmem:[#allocation73_spill] sm:$0xff] %v5712_v59  ;;  %v631_v12 = vld [vmem:[%s4802_s11 + $0x1e8] sm:$0xff]  ;;  %v6882_v59 = vld [vmem:[#allocation11_spill] sm:$0xff] }
 0x248   : > { %vm1252_vm7 = vcmp.eq.s32.totalorder %v4494_v16, %v6882_v59 }
 0x249   : > { %v3778_v49 = vsel %vm1252_vm7, 1.0, %v6804_v14 }
 0x24a   : > { %v5694_v10 = vpop.xlane.xlu1 %2525  ;;  %1558 = vperm.xlu1 %4211, %v621_v61   ;;  %v633_v61 = vld [vmem:[%s4802_s11 + $0x1f8] sm:$0xff] }
 0x24b   : > { %2582 = vadd.xlane.f32.xlu0 %v2581_v0  ;;  %v5718_v0 = vpop.permute.xlu0 %1585 }
 0x24c   : > { %6875 = vst [vmem:[#allocation74_spill] sm:$0xff] %v5718_v0  ;;  %v5818_v0 = vsel %vm1251_vm4, 1.0, %v6804_v14 }
 0x24d   : > { %6881 = vst [vmem:[#allocation8_spill] sm:$0xff] %v5818_v0 }
 0x24e   : > { %v5697_v39 = vpop.xlane.xlu1 %2528  ;;  %1564 = vperm.xlu1 %4211, %v623_v33  }
 0x24f   : > { %v5724_v41 = vpop.permute.xlu0 %1591 }
 0x250   : > { %6876 = vst [vmem:[#allocation75_spill] sm:$0xff] %v5724_v41  ;;  %v3766_v41 = vsel %vm1240_vm6, 1.0, %v6804_v14  ;;  %vm1253_vm6 = vcmp.eq.s32.totalorder %v4494_v16, %v6880_v60  ;;  %v6885_v60 = vld [vmem:[#allocation9_spill] sm:$0xff] }
 0x251   : > { %v1816_v34 = vsub.f32 %v3766_v41, %v3830_v11  ;;  %v3834_v41 = vsel %vm1628_vm15, 1.0, %v6804_v14  ;;  %v3836_v11 = vsel %vm1630_vm0, 1.0, %v6804_v14  ;;  %vm1254_vm9 = vcmp.eq.s32.totalorder %v4494_v16, %v6885_v60  ;;  %6888 = vst [vmem:[#allocation9_spill] sm:$0xff] %v5836_v56 }
 0x252   : > { %v5702_v9 = vpop.xlane.xlu1 %2531  ;;  %1570 = vperm.xlu1 %4211, %v625_v20   ;;  %v1820_v63 = vsub.f32 %v3770_v8, %v3834_v41  ;;  %v5832_v1 = vsel %vm1253_vm6, 1.0, %v6804_v14  ;;  %v5856_v4 = vsel %vm1254_vm9, 1.0, %v6804_v14  ;;  %v2725_v60 = vmul.f32 %v6896_v38, %v1818_v19 }
 0x253   : > { %v5728_v32 = vpop.xlane.xlu0 %2504  ;;  %v2467_v37 = vmul.f32 %v5177_v7, %v1816_v34  ;;  %v1822_v7 = vsub.f32 %v3772_v45, %v3836_v11  ;;  %6886 = vst [vmem:[#allocation10_spill] sm:$0xff] %v5832_v1  ;;  %v2723_v52 = vmul.f32 %v6890_v24, %v1816_v34  ;;  %v5845_v45 = vld [vmem:[#allocation3] ss:$0 sm:$0xff]  ;;  %v5853_v11 = vsel %vm1255_vm8, 1.0, %v6804_v14  ;;  %6892 = vst [vmem:[#allocation32_spill] sm:$0xff] %v5856_v4 }
 0x254   : > { %v2469_v41 = vmul.f32 %v5845_v45, %v1818_v19  ;;  %6891 = vst [vmem:[#allocation12_spill] sm:$0xff] %v5853_v11  ;;  %v6893_v34 = vld [vmem:[#allocation13_spill] sm:$0xff]  ;;  %v2471_v11 = vmul.f32 %v5845_v45, %v1820_v63  ;;  %v2727_v1 = vmul.f32 %v5424_v23, %v1820_v63  ;;  %v5880_v19 = vstv %s3931_s7 }
 0x255   : > { %v2587_v8 = vsel %vm398_vm1, %v2467_v37, 0.0  ;;  %vm1256_vm12 = vcmp.eq.s32.totalorder %v4494_v16, %v6893_v34  ;;  %v2473_v24 = vmul.f32 %v5845_v45, %v1822_v7  ;;  %v3840_v34 = vsel %vm1634_vm11, 1.0, %v6804_v14 }
 0x256   : > { %v5707_v2 = vpop.xlane.xlu1 %2534  ;;  %1576 = vperm.xlu1 %4211, %v627_v28   ;;  %v5878_v26 = vsel %vm1256_vm12, 1.0, %v6804_v14  ;;  %v5883_v38 = vsel %vm398_vm1, %v2723_v52, 0.0  ;;  %v5886_v23 = vsel %vm398_vm1, %v2469_v41, 0.0  ;;  %v3213_v63 = vadd.s32 24, %v5839_v40 }
 0x257   : > { %6897 = vst [vmem:[#allocation34_spill] sm:$0xff] %v5878_v26  ;;  %6898 = vst [vmem:[#allocation80_spill] sm:$0xff] %v5886_v23  ;;  %v6900_v26 = vld [vmem:[#allocation37_spill] sm:$0xff]  ;;  %v5896_v62 = vsub.f32 %v3776_v42, %v3840_v34  ;;  %v5899_v4 = vsel %vm398_vm1, %v2725_v60, 0.0  ;;  %v5902_v41 = vsel %vm398_vm1, %v2471_v11, 0.0  ;;  %v3842_v42 = vsel %vm1636_vm13, 1.0, %v6804_v14 }
 0x258   : > { %6902 = vst [vmem:[#allocation82_spill] sm:$0xff] %v5899_v4  ;;  %6903 = vst [vmem:[#allocation83_spill] sm:$0xff] %v5902_v41  ;;  %v3214_v11 = vadd.s32 32, %v5839_v40  ;;  %v5922_v34 = vadd.s32 %v5880_v19, %v3213_v63  ;;  %v3215_v41 = vadd.s32 40, %v5839_v40 }
 0x259   : > { %6901 = vst [vmem:[#allocation37_spill] sm:$0xff] %v5896_v62 }
 0x25a   : > { %v5710_v25 = vpop.xlane.xlu1 %2537  ;;  %1582 = vperm.xlu1 %4211, %v629_v55   ;;  %vm3342_vm15 = vcmp.lt.s32.totalorder %v5922_v34, 288 }
 0x25e   : > { %v5715_v47 = vpop.xlane.xlu1 %2540  ;;  %1588 = vperm.xlu1 %4211, %v631_v12  }
 0x262   : > { %v5720_v33 = vpop.xlane.xlu1 %2543  ;;  %1594 = vperm.xlu1 %4211, %v633_v61  }
 0x266   : > { %v5722_v20 = vpop.xlane.xlu1 %2546 }
 0x26a   : > { %v5726_v28 = vpop.xlane.xlu1 %2549 }
 0x26e   : > { %v5730_v55 = vpop.xlane.xlu1 %2552 }
 0x270   : > { %v5732_v27 = vpop.xlane.xlu0 %2763 }
 0x271   : > { %v2952_v30 = vmul.f32 2.0, %v5732_v27  ;;  %v5908_v27 = vsel %vm398_vm1, %v2473_v24, 0.0 }
 0x272   : > { %v5734_v3 = vpop.xlane.xlu1 %2555 }
 0x274   : > { %v5736_v12 = vpop.xlane.xlu0 %2769 }
 0x276   : > { %v5738_v48 = vpop.xlane.xlu1 %2558 }
 0x277   : > { %6877 = vst [vmem:[#allocation76_spill] sm:$0xff] %v5738_v48 }
 0x278   : > { %v5746_v61 = vpop.xlane.xlu0 %2766 }
 0x279   : > { %v2953_v60 = vmul.f32 2.0, %v5746_v61  ;;  %v5934_v61 = vmul.f32 %v5845_v45, %v5896_v62  ;;  %v3218_v62 = vadd.s32 64, %v5839_v40 }
 0x27a   : > { %v5761_v53 = vpop.xlane.xlu1 %2561 }
 0x27b   : > { %6878 = vst [vmem:[#allocation77_spill] sm:$0xff] %v5761_v53 }
 0x27c   : > { %v5770_v6 = vpop.xlane.xlu0 %2775 }
 0x27e   : > { %v5793_v51 = vpop.xlane.xlu1 %2564 }
 0x27f   : > { %6879 = vst [vmem:[#allocation78_spill] sm:$0xff] %v5793_v51 }
 0x280   : > { %v5804_v13 = vpop.xlane.xlu0 %2772 }
 0x282   : > { %v5823_v15 = vpop.xlane.xlu1 %2567 }
 0x283   : > { %6883 = vst [vmem:[#allocation11_spill] sm:$0xff] %v5823_v15  ;;  %v2729_v15 = vmul.f32 %v6900_v26, %v1822_v7  ;;  %v5914_v7 = vsel %vm398_vm1, %v2727_v1, 0.0  ;;  %v2954_v26 = vmul.f32 2.0, %v5736_v12  ;;  %v3217_v12 = vadd.s32 56, %v5839_v40 }
 0x284   : > { %v5829_v18 = vpop.xlane.xlu0 %2781  ;;  %6905 = vst [vmem:[#allocation85_spill] sm:$0xff] %v5914_v7 }
 0x285   : > { %v3018_v63 = vsub.f32 %v5666_v29, %v2954_v26  ;;  %v5960_v26 = vadd.s32 %v5880_v19, %v3217_v12 }
 0x286   : > { %v5861_v37 = vpop.xlane.xlu1 %2570  ;;  %2588 = vadd.xlane.f32.xlu1 %v2587_v8  ;;  %v2475_v8 = vmul.f32 %v5845_v45, %v5836_v56  ;;  %v3212_v56 = vadd.s32 16, %v5839_v40 }
 0x287   : > { %6894 = vst [vmem:[#allocation13_spill] sm:$0xff] %v5861_v37  ;;  %v3211_v37 = vadd.s32 8, %v5839_v40  ;;  %vm3346_vm7 = vcmp.lt.s32.totalorder %v5960_v26, 288 }
 0x288   : > { %v2779_v59 = vpop.xlane.xlu0 %2778  ;;  %v5911_v0 = vsel %vm398_vm1, %v2475_v8, 0.0  ;;  %v5925_v24 = vadd.s32 %v5880_v19, %v3212_v56  ;;  %v2955_v8 = vmul.f32 2.0, %v5804_v13  ;;  %v3216_v56 = vadd.s32 48, %v5839_v40 }
 0x289   : > { %v5905_v22 = vadd.s32 %v5880_v19, %v3211_v37  ;;  %6904 = vst [vmem:[#allocation84_spill] sm:$0xff] %v5911_v0  ;;  %v3016_v37 = vsub.f32 %v5652_v5, %v2952_v30  ;;  %v5937_v5 = vsel %vm398_vm1, %v2729_v15, 0.0  ;;  %v5939_v30 = vsub.f32 %v3778_v49, %v3842_v42 }
 0x28a   : > { %v5893_v51 = vpop.xlane.xlu1 %2573  ;;  %6907 = vst [vmem:[#allocation87_spill] sm:$0xff] %v5937_v5  ;;  %v3219_v13 = vadd.s32 72, %v5839_v40  ;;  %vm3341_vm0 = vcmp.lt.s32.totalorder %v5925_v24, 288  ;;  %v2956_v15 = vmul.f32 2.0, %v5770_v6  ;;  %v3019_v49 = vsub.f32 %v5676_v17, %v2955_v8 }
 0x28b   : > { %6899 = vst [vmem:[#allocation81_spill] sm:$0xff] %v5893_v51  ;;  %6908 = vst [vmem:[#allocation88_spill] sm:$0xff] %v5939_v30  ;;  %vm3340_vm14 = vcmp.lt.s32.totalorder %v5905_v22, 288  ;;  %v5947_v51 = vadd.s32 %v5880_v19, %v3214_v11  ;;  %v3080_v53 = vadd.f32 1.0, %v3016_v37  ;;  %v3275_v42 = vadd.s32 %v5880_v19, %v5839_v40 }
 0x28c   : > { %v2788_v52 = vpop.xlane.xlu0 %2787  ;;  %v3221_v11 = vadd.s32 88, %v5839_v40  ;;  %v5964_v5 = vadd.s32 %v5880_v19, %v3216_v56  ;;  %v2957_v6 = vmul.f32 2.0, %v2779_v59  ;;  %v5967_v17 = vadd.s32 %v5880_v19, %v3219_v13 }
 0x28d   : > { %v3220_v8 = vadd.s32 80, %v5839_v40  ;;  %v3082_v0 = vadd.f32 1.0, %v3018_v63  ;;  %vm3343_vm2 = vcmp.lt.s32.totalorder %v5947_v51, 288  ;;  %v3020_v48 = vsub.f32 %v5681_v54, %v2956_v15 }
 0x28e   : > { %v5928_v1 = vpop.xlane.xlu1 %2576  ;;  %v3083_v56 = vadd.f32 1.0, %v3019_v49  ;;  %vm3339_vm3 = vcmp.lt.s32.totalorder %v3275_v42, 288  ;;  %v2958_v13 = vmul.f32 2.0, %v5829_v18  ;;  %v2960_v30 = vmul.f32 2.0, %v2788_v52 }
 0x28f   : > { %6906 = vst [vmem:[#allocation86_spill] sm:$0xff] %v5928_v1  ;;  %v3017_v1 = vsub.f32 %v5658_v43, %v2953_v60  ;;  %v5957_v43 = vadd.s32 %v5880_v19, %v3215_v41  ;;  %v5972_v41 = vadd.s32 %v5880_v19, %v3218_v62  ;;  %v3021_v62 = vsub.f32 %v5688_v21, %v2957_v6 }
 0x290   : > { %v2785_v7 = vpop.xlane.xlu0 %2784  ;;  %v3223_v54 = vadd.s32 104, %v5839_v40  ;;  %v3146_v15 = vmax.f32 %v3082_v0, 0.0  ;;  %v3222_v18 = vadd.s32 96, %v5839_v40  ;;  %vm3345_vm5 = vcmp.lt.s32.totalorder %v5964_v5, 288 }
 0x291   : > { %v3081_v23 = vadd.f32 1.0, %v3017_v1  ;;  %v5980_v1 = vadd.s32 %v5880_v19, %v3221_v11  ;;  %vm3344_vm4 = vcmp.lt.s32.totalorder %v5957_v43, 288  ;;  %v3084_v11 = vadd.f32 1.0, %v3020_v48 }
 0x292   : > { %v2761_v29 = vpop.xlane.xlu1 %2760  ;;  %v3024_v6 = vsub.f32 %v5702_v9, %v2960_v30  ;;  %vm3348_vm8 = vcmp.lt.s32.totalorder %v5967_v17, 288  ;;  %v6006_v42 = vadd.s32 %v5880_v19, %v3222_v18  ;;  %vm3347_vm10 = vcmp.lt.s32.totalorder %v5972_v41, 288 }
 0x293   : > { %v2951_v60 = vmul.f32 2.0, %v2761_v29  ;;  %v3144_v29 = vmax.f32 %v3080_v53, 0.0  ;;  %v5985_v53 = vadd.s32 %v5880_v19, %v3220_v8  ;;  %v3145_v49 = vmax.f32 %v3081_v23, 0.0 }
 0x294   : > { %v2794_v37 = vpop.xlane.xlu0 %2793  ;;  %vm3350_vm11 = vcmp.lt.s32.totalorder %v5980_v1, 288  ;;  %vm3351_vm13 = vcmp.lt.s32.totalorder %v6006_v42, 288 }
 0x295   : > { %v3015_v12 = vsub.f32 %v5728_v32, %v2951_v60  ;;  %v2959_v32 = vmul.f32 2.0, %v2785_v7  ;;  %v3404_v52 = vsel %vm3340_vm14, %v3144_v29, 0.0  ;;  %v3022_v7 = vsub.f32 %v5694_v10, %v2958_v13 }
 0x296   : > { %v5976_v59 = vpop.xlane.xlu1 %2579  ;;  %v3406_v10 = vsel %vm3342_vm15, %v3146_v15, 0.0  ;;  %v3405_v9 = vsel %vm3341_vm0, %v3145_v49, 0.0  ;;  %v3148_v29 = vmax.f32 %v3084_v11, 0.0  ;;  %v2962_v13 = vmul.f32 2.0, %v2794_v37 }
 0x297   : > { %6909 = vst [vmem:[#allocation89_spill] sm:$0xff] %v5976_v59  ;;  %v3079_v4 = vadd.f32 1.0, %v3015_v12  ;;  %v3147_v12 = vmax.f32 %v3083_v56, 0.0  ;;  %v3023_v48 = vsub.f32 %v5697_v39, %v2959_v32  ;;  %v3088_v32 = vadd.f32 1.0, %v3024_v6 }
 0x298   : > { %v2791_v63 = vpop.xlane.xlu0 %2790  ;;  %v3026_v11 = vsub.f32 %v5710_v25, %v2962_v13  ;;  %vm3349_vm12 = vcmp.lt.s32.totalorder %v5985_v53, 288 }
 0x299   : > { %v3143_v60 = vmax.f32 %v3079_v4, 0.0  ;;  %v2961_v59 = vmul.f32 2.0, %v2791_v63  ;;  %v3085_v4 = vadd.f32 1.0, %v3021_v62  ;;  %v3086_v62 = vadd.f32 1.0, %v3022_v7 }
 0x29a   : > { %v1487_v21 = vpop.permute.xlu1 %1486  ;;  %v3407_v24 = vsel %vm3343_vm2, %v3147_v12, 0.0  ;;  %v3087_v49 = vadd.f32 1.0, %v3023_v48  ;;  %v3152_v12 = vmax.f32 %v3088_v32, 0.0 }
 0x29b   : > { %v3403_v8 = vsel %vm3339_vm3, %v3143_v60, 0.0  ;;  %vm1623_vm6 = vcmp.eq.s32.totalorder %v4494_v16, %v1487_v21  ;;  %v3025_v63 = vsub.f32 %v5707_v2, %v2961_v59  ;;  %v3150_v51 = vmax.f32 %v3086_v62, 0.0 }
 0x29c   : > { %v2800_v0 = vpop.xlane.xlu0 %2799  ;;  %v3468_v23 = vadd.f32 %v3404_v52, %v3403_v8  ;;  %v3829_v22 = vsel %vm1623_vm6, 1.0, %v6804_v14  ;;  %v3412_v5 = vsel %vm3348_vm8, %v3152_v12, 0.0 }
 0x29d   : > { %v1815_v30 = vsub.f32 %v5755_v35, %v3829_v22  ;;  %v3149_v35 = vmax.f32 %v3085_v4, 0.0  ;;  %v3089_v21 = vadd.f32 1.0, %v3025_v63  ;;  %v2964_v7 = vmul.f32 2.0, %v2800_v0 }
 0x29e   : > { %v3469_v56 = vadd.f32 %v3468_v23, %v3405_v9  ;;  %v1493_v39 = vpop.permute.xlu1 %1492  ;;  %v3151_v4 = vmax.f32 %v3087_v49, 0.0  ;;  %v6024_v23 = vadd.s32 %v5880_v19, %v3223_v54 }
 0x29f   : > { %vm1625_vm9 = vcmp.eq.s32.totalorder %v4494_v16, %v1493_v39  ;;  %v2722_v15 = vmul.f32 %v5607_v58, %v1815_v30  ;;  %v2466_v2 = vmul.f32 %v5845_v45, %v1815_v30  ;;  %v3408_v58 = vsel %vm3344_vm4, %v3148_v29, 0.0  ;;  %v6910_v39 = vld [vmem:[#allocation31_spill] sm:$0xff] }
 0x2a0   : > { %v2797_v34 = vpop.xlane.xlu0 %2796  ;;  %v3470_v60 = vadd.f32 %v3469_v56, %v3406_v10  ;;  %v3831_v18 = vsel %vm1625_vm9, 1.0, %v6804_v14  ;;  %v3409_v0 = vsel %vm3345_vm5, %v3149_v35, 0.0  ;;  %v3090_v10 = vadd.f32 1.0, %v3026_v11 }
 0x2a1   : > { %v2963_v52 = vmul.f32 2.0, %v2797_v34  ;;  %v2840_v37 = vsel %vm398_vm1, %v2722_v15, 0.0  ;;  %v1817_v25 = vsub.f32 %v5758_v44, %v3831_v18  ;;  %v2584_v22 = vsel %vm398_vm1, %v2466_v2, 0.0 }
 0x2a2   : > { %v3471_v59 = vadd.f32 %v3470_v60, %v3407_v24  ;;  %v6017_v6 = vpop.permute.xlu1 %1498  ;;  %2841 = vadd.xlane.f32.xlu0 %v2840_v37  ;;  %v3153_v30 = vmax.f32 %v3089_v21, 0.0  ;;  %v3028_v29 = vsub.f32 %v5720_v33, %v2964_v7  ;;  %v3410_v44 = vsel %vm3346_vm7, %v3150_v51, 0.0 }
 0x2a3   : > { %v3027_v43 = vsub.f32 %v5715_v47, %v2963_v52  ;;  %v3224_v47 = vadd.s32 112, %v5839_v40  ;;  %v3411_v13 = vsel %vm3347_vm10, %v3151_v4, 0.0  ;;  %vm3352_vm15 = vcmp.lt.s32.totalorder %v6024_v23, 288 }
 0x2a4   : > { %v2806_v8 = vpop.xlane.xlu0 %2805  ;;  %v3472_v48 = vadd.f32 %v3471_v59, %v3408_v58  ;;  %v2724_v62 = vmul.f32 %v6910_v39, %v1817_v25  ;;  %v3154_v15 = vmax.f32 %v3090_v10, 0.0  ;;  %v3413_v35 = vsel %vm3349_vm12, %v3153_v30, 0.0 }
 0x2a5   : > { %v3091_v26 = vadd.f32 1.0, %v3027_v43  ;;  %v2966_v32 = vmul.f32 2.0, %v2806_v8  ;;  %v3092_v41 = vadd.f32 1.0, %v3028_v29  ;;  %vm1627_vm0 = vcmp.eq.s32.totalorder %v4494_v16, %v6017_v6 }
 0x2a6   : > { %v3473_v9 = vadd.f32 %v3472_v48, %v3409_v0  ;;  %v1505_v54 = vpop.permute.xlu1 %1504  ;;  %2585 = vadd.xlane.f32.xlu0 %v2584_v22  ;;  %v2846_v53 = vsel %vm398_vm1, %v2724_v62, 0.0  ;;  %v2468_v2 = vmul.f32 %v5845_v45, %v1817_v25  ;;  %v3225_v7 = vadd.s32 120, %v5839_v40 }
 0x2a7   : > { %vm1629_vm14 = vcmp.eq.s32.totalorder %v4494_v16, %v1505_v54  ;;  %v3155_v59 = vmax.f32 %v3091_v26, 0.0  ;;  %v3289_v58 = vadd.s32 %v5880_v19, %v3224_v47  ;;  %v3414_v8 = vsel %vm3350_vm11, %v3154_v15, 0.0 }
 0x2a8   : > { %v2803_v56 = vpop.xlane.xlu0 %2802  ;;  %v3474_v63 = vadd.f32 %v3473_v9, %v3410_v44  ;;  %v3835_v33 = vsel %vm1629_vm14, 1.0, %v6804_v14  ;;  %v3156_v4 = vmax.f32 %v3092_v41, 0.0  ;;  %v3833_v25 = vsel %vm1627_vm0, 1.0, %v6804_v14 }
 0x2a9   : > { %v6046_v17 = vsub.f32 %v5787_v50, %v3835_v33  ;;  %v2965_v34 = vmul.f32 2.0, %v2803_v56  ;;  %v2590_v43 = vsel %vm398_vm1, %v2468_v2, 0.0  ;;  %v3415_v22 = vsel %vm3351_vm13, %v3155_v59, 0.0  ;;  %v6914_v59 = vld [vmem:[#allocation76_spill] sm:$0xff] }
 0x2aa   : > { %v3475_v24 = vadd.f32 %v3474_v63, %v3411_v13  ;;  %v1511_v49 = vpop.permute.xlu1 %1510  ;;  %2844 = vadd.xlane.f32.xlu0 %v5883_v38  ;;  %v3030_v38 = vsub.f32 %v5726_v28, %v2966_v32  ;;  %v3226_v28 = vadd.s32 128, %v5839_v40  ;;  %v3416_v6 = vsel %vm3352_vm15, %v3156_v4, 0.0  ;;  %v6911_v32 = vld [vmem:[#allocation82_spill] sm:$0xff]  ;;  %v6917_v4 = vld [vmem:[#allocation77_spill] sm:$0xff] }
 0x2ab   : > { %v3029_v60 = vsub.f32 %v5722_v20, %v2965_v34  ;;  %vm1631_vm2 = vcmp.eq.s32.totalorder %v4494_v16, %v1511_v49  ;;  %v2472_v50 = vmul.f32 %v5845_v45, %v6046_v17  ;;  %v3290_v42 = vadd.s32 %v5880_v19, %v3225_v7  ;;  %v6912_v34 = vld [vmem:[#allocation88_spill] sm:$0xff] }
 0x2ac   : > { %v2812_v18 = vpop.xlane.xlu0 %2811  ;;  %v3476_v52 = vadd.f32 %v3475_v24, %v3412_v5  ;;  %v3837_v37 = vsel %vm1631_vm2, 1.0, %v6804_v14  ;;  %v3094_v1 = vadd.f32 1.0, %v3030_v38  ;;  %vm3353_vm4 = vcmp.lt.s32.totalorder %v3289_v58, 288 }
 0x2ad   : > { %v6062_v11 = vsub.f32 %v5796_v36, %v3837_v37  ;;  %v2602_v20 = vsel %vm398_vm1, %v2472_v50, 0.0  ;;  %v3093_v51 = vadd.f32 1.0, %v3029_v60  ;;  %v2968_v10 = vmul.f32 2.0, %v2812_v18  ;;  %v6913_v50 = vld [vmem:[#allocation33_spill] sm:$0xff] }
 0x2ae   : > { %v3477_v21 = vadd.f32 %v3476_v52, %v3413_v35  ;;  %v1517_v12 = vpop.permute.xlu1 %1516  ;;  %2847 = vadd.xlane.f32.xlu0 %v2846_v53  ;;  %2603 = vadd.xlane.f32.xlu1 %v2602_v20  ;;  %v6088_v47 = vsel %vm398_vm1, %v5934_v61, 0.0  ;;  %vm1638_vm5 = vcmp.eq.s32.totalorder %v4494_v16, %v5480_v31  ;;  %v3158_v62 = vmax.f32 %v3094_v1, 0.0  ;;  %v6915_v20 = vld [vmem:[#allocation80_spill] sm:$0xff] }
 0x2af   : > { %vm1633_vm3 = vcmp.eq.s32.totalorder %v4494_v16, %v1517_v12  ;;  %v2474_v9 = vmul.f32 %v5845_v45, %v6062_v11  ;;  %v3157_v29 = vmax.f32 %v3093_v51, 0.0  ;;  %v3032_v23 = vsub.f32 %v5734_v3, %v2968_v10  ;;  %v6916_v31 = vld [vmem:[#allocation84_spill] sm:$0xff] }
 0x2b0   : > { %v2809_v36 = vpop.xlane.xlu0 %2808  ;;  %v3478_v48 = vadd.f32 %v3477_v21, %v3414_v8  ;;  %v3839_v54 = vsel %vm1633_vm3, 1.0, %v6804_v14  ;;  %v3227_v26 = vadd.s32 136, %v5839_v40  ;;  %v2479_v15 = vmul.f32 %v5845_v45, %v6912_v34 }
 0x2b1   : > { %v2967_v0 = vmul.f32 2.0, %v2809_v36  ;;  %v6096_v33 = vsub.f32 %v5808_v57, %v3839_v54  ;;  %v2608_v39 = vsel %vm398_vm1, %v2474_v9, 0.0  ;;  %v3417_v61 = vsel %vm3353_vm4, %v3157_v29, 0.0  ;;  %v6919_v9 = vld [vmem:[#allocation32_spill] sm:$0xff] }
 0x2b2   : > { %v3479_v30 = vadd.f32 %v3478_v48, %v3415_v22  ;;  %2591 = vadd.xlane.f32.xlu0 %v2590_v43  ;;  %2606 = vadd.xlane.f32.xlu1 %v5908_v27  ;;  %v1523_v63 = vpop.permute.xlu1 %1522  ;;  %v1819_v27 = vsub.f32 %v5773_v46, %v3833_v25  ;;  %vm3354_vm6 = vcmp.lt.s32.totalorder %v3290_v42, 288  ;;  %v3228_v3 = vadd.s32 144, %v5839_v40  ;;  %v6918_v43 = vld [vmem:[#allocation8_spill] sm:$0xff] }
 0x2b3   : > { %v3031_v44 = vsub.f32 %v5730_v55, %v2967_v0  ;;  %v3291_v55 = vadd.s32 %v5880_v19, %v3226_v28  ;;  %vm1635_vm7 = vcmp.eq.s32.totalorder %v4494_v16, %v1523_v63  ;;  %v3844_v57 = vsel %vm1638_vm5, 1.0, %v6804_v14 }
 0x2b4   : > { %v2818_v5 = vpop.xlane.xlu0 %2817  ;;  %v3480_v56 = vadd.f32 %v3479_v30, %v3416_v6  ;;  %v3096_v60 = vadd.f32 1.0, %v3032_v23  ;;  %v2476_v18 = vmul.f32 %v5845_v45, %v6096_v33  ;;  %v2726_v52 = vmul.f32 %v6913_v50, %v1819_v27 }
 0x2b5   : > { %v3095_v13 = vadd.f32 1.0, %v3031_v44  ;;  %v2970_v41 = vmul.f32 2.0, %v2818_v5  ;;  %vm3355_vm8 = vcmp.lt.s32.totalorder %v3291_v55, 288  ;;  %v3418_v37 = vsel %vm3354_vm6, %v3158_v62, 0.0  ;;  %v6920_v5 = vld [vmem:[#allocation42_spill] sm:$0xff] }
 0x2b6   : > { %2850 = vadd.xlane.f32.xlu0 %v6911_v32  ;;  %2609 = vadd.xlane.f32.xlu1 %v2608_v39  ;;  %v3481_v24 = vadd.f32 %v3480_v56, %v3417_v61  ;;  %v3292_v53 = vadd.s32 %v5880_v19, %v3227_v26  ;;  %v3841_v2 = vsel %vm1635_vm7, 1.0, %v6804_v14  ;;  %v3229_v7 = vadd.s32 152, %v5839_v40  ;;  %v1529_v36 = vpop.permute.xlu1 %1528  ;;  %v6921_v26 = vld [vmem:[#allocation11_spill] sm:$0xff] }
 0x2b7   : > { %v3159_v35 = vmax.f32 %v3095_v13, 0.0  ;;  %v3293_v58 = vadd.s32 %v5880_v19, %v3228_v3  ;;  %v3230_v12 = vadd.s32 160, %v5839_v40  ;;  %v3034_v28 = vsub.f32 %v6917_v4, %v2970_v41 }
 0x2b8   : > { %v2815_v46 = vpop.xlane.xlu0 %2814  ;;  %v3482_v21 = vadd.f32 %v3481_v24, %v3418_v37  ;;  %v2470_v25 = vmul.f32 %v5845_v45, %v1819_v27  ;;  %v3160_v0 = vmax.f32 %v3096_v60, 0.0  ;;  %v6123_v22 = vsub.f32 %v6918_v43, %v3841_v2  ;;  %v6922_v24 = vld [vmem:[#allocation78_spill] sm:$0xff] }
 0x2b9   : > { %v2969_v49 = vmul.f32 2.0, %v2815_v46  ;;  %v3419_v8 = vsel %vm3355_vm8, %v3159_v35, 0.0  ;;  %v2614_v1 = vsel %vm398_vm1, %v2476_v18, 0.0  ;;  %v2852_v10 = vsel %vm398_vm1, %v2726_v52, 0.0  ;;  %v6923_v52 = vld [vmem:[#allocation10_spill] sm:$0xff] }
 0x2ba   : > { %2594 = vadd.xlane.f32.xlu0 %v6915_v20  ;;  %2612 = vadd.xlane.f32.xlu1 %v6916_v31  ;;  %v6128_v30 = vsub.f32 %v6919_v9, %v3844_v57  ;;  %vm3356_vm9 = vcmp.lt.s32.totalorder %v3292_v53, 288  ;;  %v3483_v44 = vadd.f32 %v3482_v21, %v3419_v8  ;;  %v3294_v6 = vadd.s32 %v5880_v19, %v3229_v7  ;;  %v6925_v31 = vld [vmem:[#allocation85_spill] sm:$0xff]  ;;  %v6926_v7 = vld [vmem:[#allocation34_spill] sm:$0xff] }
 0x2bb   : > { %v3033_v38 = vsub.f32 %v6914_v59, %v2969_v49  ;;  %vm1637_vm10 = vcmp.eq.s32.totalorder %v4494_v16, %v1529_v36  ;;  %vm3357_vm11 = vcmp.lt.s32.totalorder %v3293_v58, 288  ;;  %vm1640_vm12 = vcmp.eq.s32.totalorder %v4494_v16, %v6920_v5  ;;  %v1535_v49 = vpop.permute.xlu1 %1534 }
 0x2bc   : > { %v2824_v51 = vpop.xlane.xlu0 %2823  ;;  %v3098_v56 = vadd.f32 1.0, %v3034_v28  ;;  %v2623_v13 = vsel %vm398_vm1, %v2479_v15, 0.0  ;;  %v3420_v63 = vsel %vm3356_vm9, %v3160_v0, 0.0  ;;  %v3295_v27 = vadd.s32 %v5880_v19, %v3230_v12 }
 0x2bd   : > { %v3097_v48 = vadd.f32 1.0, %v3033_v38  ;;  %v2972_v54 = vmul.f32 2.0, %v2824_v51  ;;  %v2596_v23 = vsel %vm398_vm1, %v2470_v25, 0.0  ;;  %v2478_v39 = vmul.f32 %v5845_v45, %v6123_v22  ;;  %v6924_v38 = vld [vmem:[#allocation81_spill] sm:$0xff] }
 0x2be   : > { %2615 = vadd.xlane.f32.xlu1 %v2614_v1  ;;  %2853 = vadd.xlane.f32.xlu0 %v2852_v10  ;;  %v3843_v62 = vsel %vm1637_vm10, 1.0, %v6804_v14  ;;  %v3846_v15 = vsel %vm1640_vm12, 1.0, %v6804_v14  ;;  %vm3358_vm13 = vcmp.lt.s32.totalorder %v3294_v6, 288  ;;  %v3484_v46 = vadd.f32 %v3483_v44, %v3420_v63  ;;  %v6927_v1 = vld [vmem:[#allocation35_spill] sm:$0xff]  ;;  %v6928_v44 = vld [vmem:[#allocation13_spill] sm:$0xff] }
 0x2bf   : > { %v3161_v29 = vmax.f32 %v3097_v48, 0.0  ;;  %v3036_v32 = vsub.f32 %v6921_v26, %v2972_v54  ;;  %v3231_v57 = vadd.s32 168, %v5839_v40  ;;  %v3162_v41 = vmax.f32 %v3098_v56, 0.0 }
 0x2c0   : > { %v2821_v42 = vpop.xlane.xlu0 %2820  ;;  %v3232_v50 = vadd.s32 176, %v5839_v40  ;;  %v6147_v37 = vsub.f32 %v6923_v52, %v3843_v62  ;;  %vm3359_vm14 = vcmp.lt.s32.totalorder %v3295_v27, 288  ;;  %v2481_v21 = vmul.f32 %v5845_v45, %v6128_v30  ;;  %v6930_v27 = vld [vmem:[#allocation15_spill] sm:$0xff] }
 0x2c1   : > { %v2971_v55 = vmul.f32 2.0, %v2821_v42  ;;  %v3421_v61 = vsel %vm3357_vm11, %v3161_v29, 0.0  ;;  %v3100_v2 = vadd.f32 1.0, %v3036_v32  ;;  %v6155_v58 = vsub.f32 %v6926_v7, %v3846_v15  ;;  %v6929_v42 = vld [vmem:[#allocation83_spill] sm:$0xff]  ;;  %v6935_v7 = vld [vmem:[#allocation89_spill] sm:$0xff] }
 0x2c2   : > { %2618 = vadd.xlane.f32.xlu1 %v6088_v47  ;;  %2597 = vadd.xlane.f32.xlu0 %v2596_v23  ;;  %v3485_v53 = vadd.f32 %v3484_v46, %v3421_v61  ;;  %v2620_v47 = vsel %vm398_vm1, %v2478_v39, 0.0  ;;  %vm1639_vm15 = vcmp.eq.s32.totalorder %v4494_v16, %v1535_v49  ;;  %v3296_v51 = vadd.s32 %v5880_v19, %v3231_v57  ;;  %v6931_v61 = vld [vmem:[#allocation12_spill] sm:$0xff]  ;;  %v6932_v57 = vld [vmem:[#allocation86_spill] sm:$0xff] }
 0x2c3   : > { %v3035_v3 = vsub.f32 %v6922_v24, %v2971_v55  ;;  %v3233_v12 = vadd.s32 184, %v5839_v40  ;;  %v3422_v4 = vsel %vm3358_vm13, %v3162_v41, 0.0  ;;  %v3297_v36 = vadd.s32 %v5880_v19, %v3232_v50  ;;  %v6933_v41 = vld [vmem:[#allocation45_spill] sm:$0xff] }
 0x2c4   : > { %v2830_v35 = vpop.xlane.xlu0 %2829  ;;  %v3486_v25 = vadd.f32 %v3485_v53, %v3422_v4  ;;  %v3234_v0 = vadd.s32 192, %v5839_v40  ;;  %v2480_v43 = vmul.f32 %v5845_v45, %v6147_v37  ;;  %v2728_v10 = vmul.f32 %v6927_v1, %v6046_v17  ;;  %v1541_v17 = vpop.permute.xlu1 %1540  ;;  %v6938_v4 = vld [vmem:[#allocation39_spill] sm:$0xff] }
 0x2c5   : > { %v3099_v60 = vadd.f32 1.0, %v3035_v3  ;;  %v2974_v18 = vmul.f32 2.0, %v2830_v35  ;;  %v3845_v9 = vsel %vm1639_vm15, 1.0, %v6804_v14  ;;  %v3164_v29 = vmax.f32 %v3100_v2, 0.0 }
 0x2c6   : > { %2621 = vadd.xlane.f32.xlu1 %v2620_v47  ;;  %2856 = vadd.xlane.f32.xlu0 %v6925_v31  ;;  %vm3360_vm0 = vcmp.lt.s32.totalorder %v3296_v51, 288  ;;  %v3298_v56 = vadd.s32 %v5880_v19, %v3233_v12  ;;  %v2629_v63 = vsel %vm398_vm1, %v2481_v21, 0.0  ;;  %vm1258_vm2 = vcmp.eq.s32.totalorder %v4494_v16, %v6930_v27  ;;  %v6936_v12 = vld [vmem:[#allocation87_spill] sm:$0xff]  ;;  %v6941_v27 = vld [vmem:[#allocation38_spill] sm:$0xff] }
 0x2c7   : > { %v3163_v59 = vmax.f32 %v3099_v60, 0.0  ;;  %v3038_v20 = vsub.f32 %v6924_v38, %v2974_v18  ;;  %vm3361_vm3 = vcmp.lt.s32.totalorder %v3297_v36, 288  ;;  %v3235_v62 = vadd.s32 200, %v5839_v40 }
 0x2c8   : > { %v2827_v8 = vpop.xlane.xlu0 %2826  ;;  %v3299_v26 = vadd.s32 %v5880_v19, %v3234_v0  ;;  %v2626_v32 = vsel %vm398_vm1, %v2480_v43, 0.0  ;;  %v2858_v24 = vsel %vm398_vm1, %v2728_v10, 0.0  ;;  %v3424_v3 = vsel %vm3360_vm0, %v3164_v29, 0.0  ;;  %v1547_v43 = vpop.permute.xlu1 %1546 }
 0x2c9   : > { %v3423_v28 = vsel %vm3359_vm14, %v3163_v59, 0.0  ;;  %v2973_v48 = vmul.f32 2.0, %v2827_v8  ;;  %v3102_v54 = vadd.f32 1.0, %v3038_v20  ;;  %vm1642_vm4 = vcmp.eq.s32.totalorder %v4494_v16, %v6933_v41  ;;  %v6934_v59 = vld [vmem:[#allocation36_spill] sm:$0xff]  ;;  %v6937_v8 = vld [vmem:[#allocation9_spill] sm:$0xff] }
 0x2ca   : > { %2624 = vadd.xlane.f32.xlu1 %v2623_v13  ;;  %2600 = vadd.xlane.f32.xlu0 %v6929_v42  ;;  %v3487_v5 = vadd.f32 %v3486_v25, %v3423_v28  ;;  %v6176_v13 = vsub.f32 %v6931_v61, %v3845_v9  ;;  %vm1641_vm5 = vcmp.eq.s32.totalorder %v4494_v16, %v1541_v17  ;;  %vm3362_vm6 = vcmp.lt.s32.totalorder %v3298_v56, 288  ;;  %v6939_v9 = vld [vmem:[#allocation79_spill] sm:$0xff]  ;;  %v6940_v56 = vld [vmem:[#allocation14_spill] sm:$0xff]  ;;  %v6943_v41 = vld [vmem:[#allocation41_spill] sm:$0xff] }
 0x2cb   : > { %v3037_v6 = vsub.f32 %v6928_v44, %v2973_v48  ;;  %v3166_v15 = vmax.f32 %v3102_v54, 0.0  ;;  %v3300_v52 = vadd.s32 %v5880_v19, %v3235_v62  ;;  %vm3363_vm7 = vcmp.lt.s32.totalorder %v3299_v26, 288 }
 0x2cc   : > { %v2833_v55 = vpop.xlane.xlu0 %2832  ;;  %v3488_v49 = vadd.f32 %v3487_v5, %v3424_v3  ;;  %v2482_v2 = vmul.f32 %v5845_v45, %v6176_v13  ;;  %v2730_v38 = vmul.f32 %v6934_v59, %v6062_v11  ;;  %v3847_v20 = vsel %vm1641_vm5, 1.0, %v6804_v14  ;;  %v6944_v59 = vld [vmem:[#allocation16_spill] sm:$0xff] }
 0x2cd   : > { %v3101_v23 = vadd.f32 1.0, %v3037_v6  ;;  %v2975_v39 = vmul.f32 2.0, %v2833_v55  ;;  %v3426_v31 = vsel %vm3362_vm6, %v3166_v15, 0.0  ;;  %v2731_v28 = vmul.f32 %v6938_v4, %v6937_v8  ;;  %v6947_v4 = vld [vmem:[#allocation18_spill] sm:$0xff] }
 0x2ce   : > { %2627 = vadd.xlane.f32.xlu1 %v2626_v32  ;;  %2859 = vadd.xlane.f32.xlu0 %v2858_v24  ;;  %v3236_v25 = vadd.s32 208, %v5839_v40  ;;  %v2483_v0 = vmul.f32 %v5845_v45, %v6155_v58  ;;  %v3848_v11 = vsel %vm1642_vm4, 1.0, %v6804_v14  ;;  %vm3364_vm8 = vcmp.lt.s32.totalorder %v3300_v52, 288 }
 0x2cf   : > { %v3165_v46 = vmax.f32 %v3101_v23, 0.0  ;;  %v3039_v35 = vsub.f32 %v6932_v57, %v2975_v39  ;;  %v6205_v29 = vsub.f32 %v6939_v9, %v3847_v20  ;;  %v2632_v44 = vsel %vm398_vm1, %v2482_v2, 0.0 }
 0x2d0   : > { %v2836_v60 = vpop.xlane.xlu0 %2835  ;;  %v2864_v6 = vsel %vm398_vm1, %v2730_v38, 0.0  ;;  %vm1259_vm9 = vcmp.eq.s32.totalorder %v4494_v16, %v6940_v56  ;;  %v3784_v55 = vsel %vm1258_vm2, 1.0, %v6804_v14  ;;  %vm1643_vm10 = vcmp.eq.s32.totalorder %v4494_v16, %v1547_v43 }
 0x2d1   : > { %v3425_v18 = vsel %vm3361_vm3, %v3165_v46, 0.0  ;;  %v3103_v50 = vadd.f32 1.0, %v3039_v35  ;;  %v2976_v53 = vmul.f32 2.0, %v2836_v60  ;;  %v6217_v23 = vsub.f32 %v3784_v55, %v3848_v11  ;;  %v6942_v35 = vld [vmem:[#allocation37_spill] sm:$0xff]  ;;  %v1553_v60 = vpop.permute.xlu1 %1552  ;;  %v6952_v55 = vld [vmem:[#allocation70_spill] sm:$0xff] }
 0x2d2   : > { %v3489_v47 = vadd.f32 %v3488_v49, %v3425_v18  ;;  %2630 = vadd.xlane.f32.xlu1 %v2629_v63  ;;  %2862 = vadd.xlane.f32.xlu0 %v6936_v12  ;;  %v3301_v63 = vadd.s32 %v5880_v19, %v3236_v25  ;;  %v2867_v61 = vsel %vm398_vm1, %v2731_v28, 0.0  ;;  %v2635_v32 = vsel %vm398_vm1, %v2483_v0, 0.0  ;;  %v6946_v12 = vld [vmem:[#allocation69_spill] sm:$0xff]  ;;  %v6948_v28 = vld [vmem:[#allocation44_spill] sm:$0xff] }
 0x2d3   : > { %v3167_v21 = vmax.f32 %v3103_v50, 0.0  ;;  %v3040_v51 = vsub.f32 %v6935_v7, %v2976_v53  ;;  %v2484_v24 = vmul.f32 %v5845_v45, %v6205_v29  ;;  %v2732_v3 = vmul.f32 %v6941_v27, %v6096_v33  ;;  %v6949_v11 = vld [vmem:[#allocation53_spill] sm:$0xff] }
 0x2d4   : > { %v3490_v36 = vadd.f32 %v3489_v47, %v3426_v31  ;;  %v2839_v48 = vpop.xlane.xlu0 %2838  ;;  %v3849_v15 = vsel %vm1643_vm10, 1.0, %v6804_v14  ;;  %vm3365_vm11 = vcmp.lt.s32.totalorder %v3301_v63, 288  ;;  %v3785_v57 = vsel %vm1259_vm9, 1.0, %v6804_v14 }
 0x2d5   : > { %v3427_v1 = vsel %vm3363_vm7, %v3167_v21, 0.0  ;;  %v3104_v10 = vadd.f32 1.0, %v3040_v51  ;;  %v2977_v5 = vmul.f32 2.0, %v2839_v48  ;;  %v2733_v49 = vmul.f32 %v6943_v41, %v6942_v35  ;;  %v6945_v21 = vld [vmem:[#allocation40_spill] sm:$0xff]  ;;  %v1559_v48 = vpop.permute.xlu1 %1558  ;;  %v6956_v41 = vld [vmem:[#allocation46_spill] sm:$0xff] }
 0x2d6   : > { %v3491_v54 = vadd.f32 %v3490_v36, %v3427_v1  ;;  %2633 = vadd.xlane.f32.xlu1 %v2632_v44  ;;  %2865 = vadd.xlane.f32.xlu0 %v2864_v6  ;;  %v6233_v50 = vsub.f32 %v3785_v57, %v3849_v15  ;;  %v2638_v33 = vsel %vm398_vm1, %v2484_v24, 0.0  ;;  %v2870_v52 = vsel %vm398_vm1, %v2732_v3, 0.0  ;;  %v6955_v3 = vld [vmem:[#allocation19_spill] sm:$0xff] }
 0x2d7   : > { %v3168_v42 = vmax.f32 %v3104_v10, 0.0  ;;  %v2485_v53 = vmul.f32 %v5845_v45, %v6217_v23  ;;  %vm1645_vm12 = vcmp.eq.s32.totalorder %v4494_v16, %v1553_v60  ;;  %vm1261_vm13 = vcmp.eq.s32.totalorder %v4494_v16, %v6944_v59  ;;  %v6950_v10 = vld [vmem:[#allocation17_spill] sm:$0xff] }
 0x2d8   : > { %v2583_v17 = vpop.xlane.xlu0 %2582  ;;  %v2873_v20 = vsel %vm398_vm1, %v2733_v49, 0.0  ;;  %v2486_v31 = vmul.f32 %v5845_v45, %v6233_v50  ;;  %v2734_v7 = vmul.f32 %v6945_v21, %v6123_v22  ;;  %v3851_v51 = vsel %vm1645_vm12, 1.0, %v6804_v14 }
 0x2d9   : > { %v3428_v39 = vsel %vm3364_vm8, %v3168_v42, 0.0  ;;  %v3041_v62 = vsub.f32 %v2583_v17, %v2977_v5  ;;  %v2641_v38 = vsel %vm398_vm1, %v2485_v53, 0.0  ;;  %vm1646_vm14 = vcmp.eq.s32.totalorder %v4494_v16, %v6946_v12  ;;  %v6951_v42 = vld [vmem:[#allocation43_spill] sm:$0xff]  ;;  %v6953_v17 = vld [vmem:[#allocation20_spill] sm:$0xff]  ;;  %v6959_v53 = vld [vmem:[#allocation49_spill] sm:$0xff] }
 0x2da   : > { %v3492_v26 = vadd.f32 %v3491_v54, %v3428_v39  ;;  %2636 = vadd.xlane.f32.xlu1 %v2635_v32  ;;  %2868 = vadd.xlane.f32.xlu0 %v2867_v61  ;;  %v3787_v8 = vsel %vm1261_vm13, 1.0, %v6804_v14  ;;  %vm1262_vm15 = vcmp.eq.s32.totalorder %v4494_v16, %v6947_v4  ;;  %v2735_v36 = vmul.f32 %v6948_v28, %v6912_v34  ;;  %v6954_v39 = vld [vmem:[#allocation47_spill] sm:$0xff]  ;;  %v1565_v61 = vpop.permute.xlu1 %1564  ;;  %v6961_v28 = vld [vmem:[#allocation48_spill] sm:$0xff] }
 0x2db   : > { %v3105_v46 = vadd.f32 1.0, %v3041_v62  ;;  %v6258_v25 = vsub.f32 %v3787_v8, %v3851_v51  ;;  %v2644_v22 = vsel %vm398_vm1, %v2486_v31, 0.0  ;;  %v2876_v0 = vsel %vm398_vm1, %v2734_v7, 0.0  ;;  %v6960_v7 = vld [vmem:[#allocation21_spill] sm:$0xff] }
 0x2dc   : > { %v2487_v43 = vmul.f32 %v5845_v45, %v6949_v11  ;;  %v3852_v1 = vsel %vm1646_vm14, 1.0, %v6804_v14  ;;  %vm1647_vm0 = vcmp.eq.s32.totalorder %v4494_v16, %v1559_v48  ;;  %vm1263_vm2 = vcmp.eq.s32.totalorder %v4494_v16, %v6950_v10  ;;  %v6963_v11 = vld [vmem:[#allocation24_spill] sm:$0xff] }
 0x2dd   : > { %v3169_v18 = vmax.f32 %v3105_v46, 0.0  ;;  %v3788_v34 = vsel %vm1262_vm15, 1.0, %v6804_v14  ;;  %v2879_v9 = vsel %vm398_vm1, %v2735_v36, 0.0  ;;  %v2488_v6 = vmul.f32 %v5845_v45, %v6258_v25 }
 0x2de   : > { %2639 = vadd.xlane.f32.xlu1 %v2638_v33  ;;  %2871 = vadd.xlane.f32.xlu0 %v2870_v52  ;;  %v6270_v54 = vsub.f32 %v3788_v34, %v3852_v1  ;;  %v2647_v44 = vsel %vm398_vm1, %v2487_v43, 0.0  ;;  %v2736_v5 = vmul.f32 %v6951_v42, %v6147_v37  ;;  %v3853_v56 = vsel %vm1647_vm0, 1.0, %v6804_v14  ;;  %v6958_v52 = vld [vmem:[#allocation22_spill] sm:$0xff]  ;;  %v1571_v59 = vpop.permute.xlu1 %1570  ;;  %v6964_v43 = vld [vmem:[#allocation51_spill] sm:$0xff] }
 0x2df   : > { %v3429_v47 = vsel %vm3365_vm11, %v3169_v18, 0.0  ;;  %vm1648_vm3 = vcmp.eq.s32.totalorder %v4494_v16, %v6952_v55  ;;  %v3789_v63 = vsel %vm1263_vm2, 1.0, %v6804_v14  ;;  %vm1264_vm4 = vcmp.eq.s32.totalorder %v4494_v16, %v6953_v17  ;;  %v6957_v18 = vld [vmem:[#allocation71_spill] sm:$0xff]  ;;  %v6966_v17 = vld [vmem:[#allocation50_spill] sm:$0xff] }
 0x2e0   : > { %v6240_v2 = vadd.f32 %v3492_v26, %v3429_v47  ;;  %v2737_v62 = vmul.f32 %v6954_v39, %v6128_v30  ;;  %v6285_v26 = vsub.f32 %v3789_v63, %v3853_v56  ;;  %v2650_v37 = vsel %vm398_vm1, %v2488_v6, 0.0  ;;  %v6965_v42 = vld [vmem:[#allocation23_spill] sm:$0xff] }
 0x2e1   : > { %v2882_v32 = vsel %vm398_vm1, %v2736_v5, 0.0  ;;  %v2489_v24 = vmul.f32 %v5845_v45, %v6270_v54  ;;  %v3854_v27 = vsel %vm1648_vm3, 1.0, %v6804_v14  ;;  %vm1649_vm5 = vcmp.eq.s32.totalorder %v4494_v16, %v1565_v61  ;;  %v6967_v61 = vld [vmem:[#allocation73_spill] sm:$0xff] }
 0x2e2   : > { %2642 = vadd.xlane.f32.xlu1 %v2641_v38  ;;  %2874 = vadd.xlane.f32.xlu0 %v2873_v20  ;;  %vm1265_vm6 = vcmp.eq.s32.totalorder %v4494_v16, %v6955_v3  ;;  %v3790_v30 = vsel %vm1264_vm4, 1.0, %v6804_v14  ;;  %v2885_v15 = vsel %vm398_vm1, %v2737_v62, 0.0  ;;  %v2490_v35 = vmul.f32 %v5845_v45, %v6285_v26  ;;  %v1577_v10 = vpop.permute.xlu1 %1576 }
 0x2e3   : > { %v6297_v46 = vsub.f32 %v3790_v30, %v3854_v27  ;;  %v2653_v57 = vsel %vm398_vm1, %v2489_v24, 0.0  ;;  %v2738_v49 = vmul.f32 %v6956_v41, %v6176_v13  ;;  %v3855_v60 = vsel %vm1649_vm5, 1.0, %v6804_v14  ;;  %v6970_v41 = vld [vmem:[#allocation54_spill] sm:$0xff] }
 0x2e4   : > { %vm1650_vm7 = vcmp.eq.s32.totalorder %v4494_v16, %v6957_v18  ;;  %v3791_v33 = vsel %vm1265_vm6, 1.0, %v6804_v14  ;;  %vm1266_vm8 = vcmp.eq.s32.totalorder %v4494_v16, %v6958_v52  ;;  %v2739_v47 = vmul.f32 %v6959_v53, %v6155_v58  ;;  %v6971_v52 = vld [vmem:[#allocation52_spill] sm:$0xff] }
 0x2e5   : > { %v6312_v38 = vsub.f32 %v3791_v33, %v3855_v60  ;;  %v2656_v13 = vsel %vm398_vm1, %v2490_v35, 0.0  ;;  %v2888_v20 = vsel %vm398_vm1, %v2738_v49, 0.0  ;;  %v2491_v31 = vmul.f32 %v5845_v45, %v6297_v46 }
 0x2e6   : > { %2645 = vadd.xlane.f32.xlu1 %v2644_v22  ;;  %2877 = vadd.xlane.f32.xlu0 %v2876_v0  ;;  %v3856_v21 = vsel %vm1650_vm7, 1.0, %v6804_v14  ;;  %vm1651_vm9 = vcmp.eq.s32.totalorder %v4494_v16, %v1571_v59  ;;  %vm1267_vm10 = vcmp.eq.s32.totalorder %v4494_v16, %v6960_v7  ;;  %v3792_v58 = vsel %vm1266_vm8, 1.0, %v6804_v14  ;;  %v6962_v22 = vld [vmem:[#allocation72_spill] sm:$0xff]  ;;  %v1583_v24 = vpop.permute.xlu1 %1582  ;;  %v6972_v59 = vld [vmem:[#allocation74_spill] sm:$0xff] }
 0x2e7   : > { %v2891_v51 = vsel %vm398_vm1, %v2739_v47, 0.0  ;;  %v6324_v12 = vsub.f32 %v3792_v58, %v3856_v21  ;;  %v2659_v8 = vsel %vm398_vm1, %v2491_v31, 0.0  ;;  %v2492_v4 = vmul.f32 %v5845_v45, %v6312_v38  ;;  %v6974_v31 = vld [vmem:[#allocation56_spill] sm:$0xff] }
 0x2e8   : > { %v2740_v36 = vmul.f32 %v6961_v28, %v6205_v29  ;;  %v3857_v48 = vsel %vm1651_vm9, 1.0, %v6804_v14  ;;  %vm1652_vm11 = vcmp.eq.s32.totalorder %v4494_v16, %v6962_v22  ;;  %v3793_v0 = vsel %vm1267_vm10, 1.0, %v6804_v14  ;;  %v6975_v28 = vld [vmem:[#allocation27_spill] sm:$0xff] }
 0x2e9   : > { %vm1268_vm12 = vcmp.eq.s32.totalorder %v4494_v16, %v6963_v11  ;;  %v2741_v1 = vmul.f32 %v6964_v43, %v6217_v23  ;;  %v6339_v45 = vsub.f32 %v3793_v0, %v3857_v48  ;;  %v2662_v29 = vsel %vm398_vm1, %v2492_v4, 0.0  ;;  %v6976_v11 = vld [vmem:[#allocation55_spill] sm:$0xff] }
 0x2ea   : > { %2648 = vadd.xlane.f32.xlu1 %v2647_v44  ;;  %2880 = vadd.xlane.f32.xlu0 %v2879_v9  ;;  %v2894_v34 = vsel %vm398_vm1, %v2740_v36, 0.0  ;;  %v6343_v9 = vld [vmem:[#allocation3] ss:$0 sm:$0xff]  ;;  %v3858_v6 = vsel %vm1652_vm11, 1.0, %v6804_v14  ;;  %vm1653_vm13 = vcmp.eq.s32.totalorder %v4494_v16, %v1577_v10  ;;  %vm1269_vm14 = vcmp.eq.s32.totalorder %v4494_v16, %v6965_v42  ;;  %v1589_v7 = vpop.permute.xlu1 %1588  ;;  %v6977_v10 = vld [vmem:[#allocation75_spill] sm:$0xff] }
 0x2eb   : > { %v2493_v44 = vmul.f32 %v6343_v9, %v6324_v12  ;;  %v3794_v23 = vsel %vm1268_vm12, 1.0, %v6804_v14  ;;  %v2897_v5 = vsel %vm398_vm1, %v2741_v1, 0.0  ;;  %v2494_v63 = vmul.f32 %v6343_v9, %v6339_v45 }
 0x2ec   : > { %v6353_v56 = vsub.f32 %v3794_v23, %v3858_v6  ;;  %v2742_v39 = vmul.f32 %v6966_v17, %v6233_v50  ;;  %v3859_v62 = vsel %vm1653_vm13, 1.0, %v6804_v14  ;;  %vm1654_vm15 = vcmp.eq.s32.totalorder %v4494_v16, %v6967_v61  ;;  %v6980_v17 = vld [vmem:[#allocation29_spill] sm:$0xff] }
 0x2ed   : > { %v2665_v55 = vsel %vm398_vm1, %v2493_v44, 0.0  ;;  %v2668_v3 = vsel %vm398_vm1, %v2494_v63, 0.0  ;;  %vm1655_vm2 = vcmp.eq.s32.totalorder %v4494_v16, %v1583_v24  ;;  %v2903_v49 = vsel %vm398_vm1, %v6970_v41, 0.0  ;;  %v6979_v44 = vld [vmem:[#allocation58_spill] sm:$0xff] }
 0x2ee   : > { %2651 = vadd.xlane.f32.xlu1 %v2650_v37  ;;  %2883 = vadd.xlane.f32.xlu0 %v2882_v32  ;;  %v3795_v37 = vsel %vm1269_vm14, 1.0, %v6804_v14  ;;  %v6968_v32 = vld [vmem:[#allocation26_spill] sm:$0xff]  ;;  %v2900_v30 = vsel %vm398_vm1, %v2742_v39, 0.0  ;;  %v2495_v50 = vmul.f32 %v6343_v9, %v6353_v56  ;;  %v2744_v53 = vmul.f32 %v6971_v52, %v6258_v25  ;;  %v1595_v42 = vpop.permute.xlu1 %1594 }
 0x2ef   : > { %vm1270_vm0 = vcmp.eq.s32.totalorder %v4494_v16, %v6968_v32  ;;  %v6366_v27 = vsub.f32 %v3795_v37, %v3859_v62  ;;  %v3861_v47 = vsel %vm1655_vm2, 1.0, %v6804_v14  ;;  %vm1656_vm4 = vcmp.eq.s32.totalorder %v4494_v16, %v6972_v59  ;;  %v6981_v32 = vld [vmem:[#allocation57_spill] sm:$0xff]  ;;  %v6984_v52 = vld [vmem:[#allocation62_spill] sm:$0xff] }
 0x2f0   : > { %v3796_v35 = vsel %vm1270_vm0, 1.0, %v6804_v14  ;;  %v2671_v18 = vsel %vm398_vm1, %v2495_v50, 0.0  ;;  %v2745_v21 = vmul.f32 %v6974_v31, %v6270_v54  ;;  %v3862_v4 = vsel %vm1656_vm4, 1.0, %v6804_v14 }
 0x2f1   : > { %v2496_v33 = vmul.f32 %v6343_v9, %v6366_v27  ;;  %vm1657_vm6 = vcmp.eq.s32.totalorder %v4494_v16, %v1589_v7  ;;  %vm1273_vm7 = vcmp.eq.s32.totalorder %v4494_v16, %v6975_v28  ;;  %v2746_v43 = vmul.f32 %v6976_v11, %v6285_v26 }
 0x2f2   : > { %2654 = vadd.xlane.f32.xlu1 %v2653_v57  ;;  %2886 = vadd.xlane.f32.xlu0 %v2885_v15  ;;  %v3860_v15 = vsel %vm1654_vm15, 1.0, %v6804_v14  ;;  %v6969_v57 = vld [vmem:[#allocation25_spill] sm:$0xff]  ;;  %v2909_v36 = vsel %vm398_vm1, %v2745_v21, 0.0  ;;  %v3863_v1 = vsel %vm1657_vm6, 1.0, %v6804_v14  ;;  %vm1658_vm8 = vcmp.eq.s32.totalorder %v4494_v16, %v6977_v10 }
 0x2f3   : > { %vm1271_vm3 = vcmp.eq.s32.totalorder %v4494_v16, %v6969_v57  ;;  %v6379_v60 = vsub.f32 %v3796_v35, %v3860_v15  ;;  %v2674_v25 = vsel %vm398_vm1, %v2496_v33, 0.0  ;;  %v2747_v6 = vmul.f32 %v6979_v44, %v6297_v46  ;;  %v6983_v33 = vld [vmem:[#allocation59_spill] sm:$0xff]  ;;  %v6989_v44 = vld [vmem:[#allocation65_spill] sm:$0xff] }
 0x2f4   : > { %v3864_v63 = vsel %vm1658_vm8, 1.0, %v6804_v14  ;;  %vm1659_vm10 = vcmp.eq.s32.totalorder %v4494_v16, %v1595_v42  ;;  %vm1275_vm11 = vcmp.eq.s32.totalorder %v4494_v16, %v6980_v17  ;;  %v2748_v24 = vmul.f32 %v6981_v32, %v6312_v38 }
 0x2f5   : > { %v2915_v39 = vsel %vm398_vm1, %v2747_v6, 0.0  ;;  %vm440_vm0 = vcmask 0  }
 0x2f6   : > { %2657 = vadd.xlane.f32.xlu1 %v2656_v13  ;;  %2889 = vadd.xlane.f32.xlu0 %v2888_v20  ;;  %v3797_v13 = vsel %vm1271_vm3, 1.0, %v6804_v14  ;;  %v6973_v20 = vld [vmem:[#allocation28_spill] sm:$0xff]  ;;  %v2918_v35 = vsel %vm398_vm1, %v2748_v24, 0.0  ;;  %441 = vst.msk [vmem:[#allocation4] sm:$0x1] %vm440_vm0, %v6804_v14 }
 0x2f7   : > { %vm1272_vm5 = vcmp.eq.s32.totalorder %v4494_v16, %v6973_v20  ;;  %v6394_v58 = vsub.f32 %v3797_v13, %v3861_v47  ;;  %v6985_v20 = vld [vmem:[#allocation61_spill] sm:$0xff] }
 0x2f8   : > { %v3798_v54 = vsel %vm1272_vm5, 1.0, %v6804_v14  ;;  %v2752_v31 = vmul.f32 %v6985_v20, %v6366_v27 }
 0x2f9   : > { %v6406_v48 = vsub.f32 %v3798_v54, %v3862_v4  ;;  %v2498_v0 = vmul.f32 %v6343_v9, %v6394_v58 }
 0x2fa   : > { %2660 = vadd.xlane.f32.xlu1 %v2659_v8  ;;  %2892 = vadd.xlane.f32.xlu0 %v2891_v51  ;;  %v2906_v51 = vsel %vm398_vm1, %v2744_v53, 0.0  ;;  %v2497_v8 = vmul.f32 %v6343_v9, %v6379_v60  ;;  %v2751_v53 = vmul.f32 %v6984_v52, %v6353_v56  ;;  %v2930_v21 = vsel %vm398_vm1, %v2752_v31, 0.0 }
 0x2fb   : > { %v2680_v26 = vsel %vm398_vm1, %v2498_v0, 0.0  ;;  %v3237_v56 = vadd.s32 216, %v5839_v40  ;;  %v3238_v0 = vadd.s32 224, %v5839_v40 }
 0x2fc   : > { %v2677_v22 = vsel %vm398_vm1, %v2497_v8, 0.0  ;;  %v2927_v13 = vsel %vm398_vm1, %v2751_v53, 0.0 }
 0x2fd   : > { %v3302_v28 = vadd.s32 %v5880_v19, %v3237_v56 }
 0x2fe   : > { %2663 = vadd.xlane.f32.xlu1 %v2662_v29  ;;  %2895 = vadd.xlane.f32.xlu0 %v2894_v34  ;;  %v3799_v29 = vsel %vm1273_vm7, 1.0, %v6804_v14  ;;  %v6978_v34 = vld [vmem:[#allocation30_spill] sm:$0xff] }
 0x2ff   : > { %vm1274_vm9 = vcmp.eq.s32.totalorder %v4494_v16, %v6978_v34  ;;  %v6421_v23 = vsub.f32 %v3799_v29, %v3863_v1  ;;  %v6982_v16 = vld [vmem:[#allocation60_spill] sm:$0xff]  ;;  %vm3366_vm12 = vcmp.lt.s32.totalorder %v3302_v28, 288  ;;  %v3303_v29 = vadd.s32 %v5880_v19, %v3238_v0 }
 0x300   : > { %v3800_v46 = vsel %vm1274_vm9, 1.0, %v6804_v14  ;;  %v2749_v50 = vmul.f32 %v6982_v16, %v6324_v12  ;;  %v2750_v12 = vmul.f32 %v6983_v33, %v6339_v45 }
 0x301   : > { %v1850_v62 = vsub.f32 %v3800_v46, %v3864_v63  ;;  %v2500_v37 = vmul.f32 %v6343_v9, %v6421_v23  ;;  %v2756_v6 = vmul.f32 %v6989_v44, %v6421_v23  ;;  %v3239_v63 = vadd.s32 232, %v5839_v40  ;;  %v6990_v46 = vld [vmem:[#allocation68_spill] sm:$0xff] }
 0x302   : > { %2666 = vadd.xlane.f32.xlu1 %v2665_v55  ;;  %2898 = vadd.xlane.f32.xlu0 %v2897_v5  ;;  %v2912_v5 = vsel %vm398_vm1, %v2746_v43, 0.0  ;;  %v2499_v55 = vmul.f32 %v6343_v9, %v6406_v48  ;;  %v2924_v59 = vsel %vm398_vm1, %v2750_v12, 0.0  ;;  %vm3367_vm13 = vcmp.lt.s32.totalorder %v3303_v29, 288 }
 0x303   : > { %v2686_v57 = vsel %vm398_vm1, %v2500_v37, 0.0  ;;  %v2501_v41 = vmul.f32 %v6343_v9, %v1850_v62  ;;  %v3304_v24 = vadd.s32 %v5880_v19, %v3239_v63 }
 0x304   : > { %v2683_v61 = vsel %vm398_vm1, %v2499_v55, 0.0 }
 0x305   : > { %v2689_v38 = vsel %vm398_vm1, %v2501_v41, 0.0  ;;  %vm3368_vm14 = vcmp.lt.s32.totalorder %v3304_v24, 288 }
 0x306   : > { %2669 = vadd.xlane.f32.xlu1 %v2668_v3  ;;  %2901 = vadd.xlane.f32.xlu0 %v2900_v30  ;;  %v3865_v3 = vsel %vm1659_vm10, 1.0, %v6804_v14  ;;  %v3801_v30 = vsel %vm1275_vm11, 1.0, %v6804_v14 }
 0x307   : > { %v6442_v15 = vsub.f32 %v3801_v30, %v3865_v3 }
 0x30a   : > { %2672 = vadd.xlane.f32.xlu1 %v2671_v18  ;;  %2904 = vadd.xlane.f32.xlu0 %v2903_v49  ;;  %v2921_v49 = vsel %vm398_vm1, %v2749_v50, 0.0  ;;  %v2502_v18 = vmul.f32 %v6343_v9, %v6442_v15  ;;  %v6986_v9 = vld [vmem:[#allocation64_spill] sm:$0xff] }
 0x30b   : > { %v2753_v45 = vmul.f32 %v6986_v9, %v6379_v60 }
 0x30c   : > { %v2692_v47 = vsel %vm398_vm1, %v2502_v18, 0.0 }
 0x30e   : > { %2675 = vadd.xlane.f32.xlu1 %v2674_v25  ;;  %2907 = vadd.xlane.f32.xlu0 %v2906_v51  ;;  %v2933_v25 = vsel %vm398_vm1, %v2753_v45, 0.0  ;;  %v6987_v51 = vld [vmem:[#allocation63_spill] sm:$0xff]  ;;  %v3241_v45 = vadd.s32 248, %v5839_v40 }
 0x30f   : > { %v2754_v8 = vmul.f32 %v6987_v51, %v6394_v58 }
 0x312   : > { %2678 = vadd.xlane.f32.xlu1 %v2677_v22  ;;  %2910 = vadd.xlane.f32.xlu0 %v2909_v36  ;;  %v6988_v36 = vld [vmem:[#allocation66_spill] sm:$0xff]  ;;  %v2936_v22 = vsel %vm398_vm1, %v2754_v8, 0.0  ;;  %v3306_v8 = vadd.s32 %v5880_v19, %v3241_v45  ;;  %v3245_v45 = vadd.s32 280, %v5839_v40 }
 0x313   : > { %v2755_v60 = vmul.f32 %v6988_v36, %v6406_v48  ;;  %v2589_v43 = vpop.xlane.xlu1 %2588 }
 0x315   : > { %v2939_v34 = vsel %vm398_vm1, %v2755_v60, 0.0  ;;  %v3242_v60 = vadd.s32 256, %v5839_v40 }
 0x316   : > { %2681 = vadd.xlane.f32.xlu1 %v2680_v26  ;;  %2913 = vadd.xlane.f32.xlu0 %v2912_v5 }
 0x31a   : > { %2684 = vadd.xlane.f32.xlu1 %v2683_v61  ;;  %2916 = vadd.xlane.f32.xlu0 %v2915_v39  ;;  %v2757_v39 = vmul.f32 %v6990_v46, %v1850_v62  ;;  %v2942_v61 = vsel %vm398_vm1, %v2756_v6, 0.0 }
 0x31c   : > { %v2945_v50 = vsel %vm398_vm1, %v2757_v39, 0.0 }
 0x31e   : > { %2687 = vadd.xlane.f32.xlu1 %v2686_v57  ;;  %2919 = vadd.xlane.f32.xlu0 %v2918_v35  ;;  %v6991_v57 = vld [vmem:[#allocation67_spill] sm:$0xff] }
 0x31f   : > { %v2758_v35 = vmul.f32 %v6991_v57, %v6442_v15 }
 0x321   : > { %v2948_v33 = vsel %vm398_vm1, %v2758_v35, 0.0  ;;  %vm3370_vm1 = vcmp.lt.s32.totalorder %v3306_v8, 288 }
 0x322   : > { %2690 = vadd.xlane.f32.xlu1 %v2689_v38  ;;  %2922 = vadd.xlane.f32.xlu0 %v2921_v49  ;;  %v3240_v49 = vadd.s32 240, %v5839_v40 }
 0x326   : > { %2693 = vadd.xlane.f32.xlu1 %v2692_v47  ;;  %2925 = vadd.xlane.f32.xlu0 %v2924_v59  ;;  %v3305_v59 = vadd.s32 %v5880_v19, %v3240_v49 }
 0x328   : > { %vm3369_vm15 = vcmp.lt.s32.totalorder %v3305_v59, 288  ;;  %v3244_v59 = vadd.s32 272, %v5839_v40 }
 0x32a   : > { %2928 = vadd.xlane.f32.xlu0 %v2927_v13 }
 0x32e   : > { %2931 = vadd.xlane.f32.xlu0 %v2930_v21 }
 0x32f   : > { %v2842_v7 = vpop.xlane.xlu0 %2841 }
 0x330   : > { %v2978_v4 = vmul.f32 2.0, %v2842_v7 }
 0x332   : > { %2934 = vadd.xlane.f32.xlu0 %v2933_v25 }
 0x333   : > { %v2586_v27 = vpop.xlane.xlu0 %2585 }
 0x334   : > { %v3042_v54 = vsub.f32 %v2586_v27, %v2978_v4 }
 0x336   : > { %v3106_v11 = vadd.f32 1.0, %v3042_v54  ;;  %2937 = vadd.xlane.f32.xlu0 %v2936_v22 }
 0x337   : > { %v2845_v1 = vpop.xlane.xlu0 %2844 }
 0x338   : > { %v3170_v10 = vmax.f32 %v3106_v11, 0.0  ;;  %v2979_v58 = vmul.f32 2.0, %v2845_v1 }
 0x33a   : > { %v3430_v42 = vsel %vm3366_vm12, %v3170_v10, 0.0  ;;  %v3043_v48 = vsub.f32 %v2589_v43, %v2979_v58  ;;  %2940 = vadd.xlane.f32.xlu0 %v2939_v34  ;;  %v3307_v10 = vadd.s32 %v5880_v19, %v3242_v60 }
 0x33b   : > { %v3494_v26 = vadd.f32 %v6240_v2, %v3430_v42  ;;  %v6477_v5 = vpop.xlane.xlu1 %2603  ;;  %v2848_v55 = vpop.xlane.xlu0 %2847 }
 0x33c   : > { %v3107_v17 = vadd.f32 1.0, %v3043_v48  ;;  %v2980_v32 = vmul.f32 2.0, %v2848_v55  ;;  %vm3371_vm2 = vcmp.lt.s32.totalorder %v3307_v10, 288 }
 0x33e   : > { %v3171_v37 = vmax.f32 %v3107_v17, 0.0  ;;  %2943 = vadd.xlane.f32.xlu0 %v2942_v61 }
 0x33f   : > { %v6482_v23 = vpop.xlane.xlu1 %2606  ;;  %v2592_v3 = vpop.xlane.xlu0 %2591 }
 0x340   : > { %v3431_v2 = vsel %vm3367_vm13, %v3171_v37, 0.0  ;;  %v3044_v30 = vsub.f32 %v2592_v3, %v2980_v32 }
 0x341   : > { %v3495_v16 = vadd.f32 %v3494_v26, %v3431_v2 }
 0x342   : > { %v3108_v62 = vadd.f32 1.0, %v3044_v30  ;;  %2946 = vadd.xlane.f32.xlu0 %v2945_v50 }
 0x343   : > { %v6488_v41 = vpop.xlane.xlu1 %2609  ;;  %v2851_v38 = vpop.xlane.xlu0 %2850 }
 0x344   : > { %v3172_v18 = vmax.f32 %v3108_v62, 0.0  ;;  %v2981_v52 = vmul.f32 2.0, %v2851_v38 }
 0x346   : > { %v3432_v12 = vsel %vm3368_vm14, %v3172_v18, 0.0  ;;  %2949 = vadd.xlane.f32.xlu0 %v2948_v33 }
 0x347   : > { %v3496_v53 = vadd.f32 %v3495_v16, %v3432_v12  ;;  %v6492_v47 = vpop.xlane.xlu1 %2612  ;;  %v2595_v15 = vpop.xlane.xlu0 %2594 }
 0x348   : > { %v3045_v13 = vsub.f32 %v2595_v15, %v2981_v52  ;;  %v3243_v52 = vadd.s32 264, %v5839_v40 }
 0x34a   : > { %v3109_v20 = vadd.f32 1.0, %v3045_v13 }
 0x34b   : > { %v6495_v31 = vpop.xlane.xlu1 %2615  ;;  %v2854_v9 = vpop.xlane.xlu0 %2853 }
 0x34c   : > { %v3173_v21 = vmax.f32 %v3109_v20, 0.0  ;;  %v2982_v56 = vmul.f32 2.0, %v2854_v9  ;;  %v3308_v9 = vadd.s32 %v5880_v19, %v3243_v52 }
 0x34e   : > { %v3433_v7 = vsel %vm3369_vm15, %v3173_v21, 0.0  ;;  %v3246_v21 = vadd.s32 288, %v5839_v40  ;;  %vm3372_vm3 = vcmp.lt.s32.totalorder %v3308_v9, 288 }
 0x34f   : > { %v3497_v25 = vadd.f32 %v3496_v53, %v3433_v7  ;;  %v6498_v51 = vpop.xlane.xlu1 %2618  ;;  %v2598_v4 = vpop.xlane.xlu0 %2597 }
 0x350   : > { %v3046_v28 = vsub.f32 %v2598_v4, %v2982_v56 }
 0x352   : > { %v3110_v27 = vadd.f32 1.0, %v3046_v28  ;;  %v3247_v28 = vadd.s32 296, %v5839_v40 }
 0x353   : > { %v6501_v54 = vpop.xlane.xlu1 %2621  ;;  %v2857_v36 = vpop.xlane.xlu0 %2856 }
 0x354   : > { %v3174_v22 = vmax.f32 %v3110_v27, 0.0  ;;  %v2983_v11 = vmul.f32 2.0, %v2857_v36 }
 0x356   : > { %v3434_v0 = vsel %vm3370_vm1, %v3174_v22, 0.0  ;;  %v3249_v22 = vadd.s32 312, %v5839_v40 }
 0x357   : > { %v3498_v43 = vadd.f32 %v3497_v25, %v3434_v0  ;;  %v6504_v1 = vpop.xlane.xlu1 %2624  ;;  %v2601_v58 = vpop.xlane.xlu0 %2600  ;;  %v3309_v25 = vadd.s32 %v5880_v19, %v3244_v59  ;;  %v3310_v0 = vadd.s32 %v5880_v19, %v3245_v45 }
 0x358   : > { %v3047_v29 = vsub.f32 %v2601_v58, %v2983_v11  ;;  %v3311_v11 = vadd.s32 %v5880_v19, %v3246_v21 }
 0x359   : > { %vm3373_vm4 = vcmp.lt.s32.totalorder %v3309_v25, 288  ;;  %vm3374_vm5 = vcmp.lt.s32.totalorder %v3310_v0, 288 }
 0x35a   : > { %v3111_v34 = vadd.f32 1.0, %v3047_v29  ;;  %v3312_v29 = vadd.s32 %v5880_v19, %v3247_v28  ;;  %vm3375_vm6 = vcmp.lt.s32.totalorder %v3311_v11, 288 }
 0x35b   : > { %v6509_v44 = vpop.xlane.xlu1 %2627  ;;  %v2860_v6 = vpop.xlane.xlu0 %2859 }
 0x35c   : > { %v3175_v42 = vmax.f32 %v3111_v34, 0.0  ;;  %v2984_v12 = vmul.f32 2.0, %v2860_v6  ;;  %v3250_v6 = vadd.s32 320, %v5839_v40  ;;  %vm3376_vm7 = vcmp.lt.s32.totalorder %v3312_v29, 288 }
 0x35e   : > { %v3435_v48 = vsel %vm3371_vm2, %v3175_v42, 0.0  ;;  %v3048_v13 = vsub.f32 %v6477_v5, %v2984_v12  ;;  %v3248_v5 = vadd.s32 304, %v5839_v40 }
 0x35f   : > { %v6511_v26 = vadd.f32 %v3498_v43, %v3435_v48  ;;  %v6513_v55 = vpop.xlane.xlu1 %2630  ;;  %v2863_v63 = vpop.xlane.xlu0 %2862 }
 0x360   : > { %v2985_v15 = vmul.f32 2.0, %v2863_v63  ;;  %v3112_v27 = vadd.f32 1.0, %v3048_v13  ;;  %v6566_v34 = vadd.s32 %v5880_v19, %v3248_v5 }
 0x362   : > { %v3049_v8 = vsub.f32 %v6482_v23, %v2985_v15  ;;  %v3176_v48 = vmax.f32 %v3112_v27, 0.0  ;;  %vm3377_vm8 = vcmp.lt.s32.totalorder %v6566_v34, 288  ;;  %v6583_v15 = vadd.s32 %v5880_v19, %v3250_v6 }
 0x363   : > { %v6515_v17 = vpop.xlane.xlu1 %2633  ;;  %v2866_v46 = vpop.xlane.xlu0 %2865 }
 0x364   : > { %v2986_v20 = vmul.f32 2.0, %v2866_v46  ;;  %v3113_v23 = vadd.f32 1.0, %v3049_v8  ;;  %v3436_v13 = vsel %vm3372_vm3, %v3176_v48, 0.0  ;;  %vm3379_vm10 = vcmp.lt.s32.totalorder %v6583_v15, 288 }
 0x366   : > { %v3050_v36 = vsub.f32 %v6488_v41, %v2986_v20 }
 0x367   : > { %v6517_v39 = vpop.xlane.xlu1 %2636  ;;  %v2869_v61 = vpop.xlane.xlu0 %2868 }
 0x368   : > { %v2987_v4 = vmul.f32 2.0, %v2869_v61  ;;  %v3114_v63 = vadd.f32 1.0, %v3050_v36  ;;  %v6573_v61 = vadd.s32 %v5880_v19, %v3249_v22  ;;  %v3500_v36 = vadd.f32 %v6511_v26, %v3436_v13 }
 0x369   : > { %v3254_v22 = vadd.s32 352, %v5839_v40  ;;  %v3255_v26 = vadd.s32 360, %v5839_v40  ;;  %v3257_v13 = vadd.s32 376, %v5839_v40 }
 0x36a   : > { %v3051_v10 = vsub.f32 %v6492_v47, %v2987_v4  ;;  %v3251_v47 = vadd.s32 328, %v5839_v40  ;;  %v3178_v20 = vmax.f32 %v3114_v63, 0.0  ;;  %vm3378_vm9 = vcmp.lt.s32.totalorder %v6573_v61, 288 }
 0x36b   : > { %v6519_v37 = vpop.xlane.xlu1 %2639  ;;  %v2872_v14 = vpop.xlane.xlu0 %2871  ;;  %v3258_v61 = vadd.s32 384, %v5839_v40 }
 0x36c   : > { %v2988_v60 = vmul.f32 2.0, %v2872_v14  ;;  %v3252_v14 = vadd.s32 336, %v5839_v40  ;;  %v3115_v12 = vadd.f32 1.0, %v3051_v10  ;;  %v6588_v8 = vadd.s32 %v5880_v19, %v3251_v47 }
 0x36d   : > { %v6619_v47 = vadd.s32 %v5880_v19, %v3254_v22 }
 0x36e   : > { %v3052_v46 = vsub.f32 %v6495_v31, %v2988_v60  ;;  %v3179_v5 = vmax.f32 %v3115_v12, 0.0  ;;  %vm3380_vm11 = vcmp.lt.s32.totalorder %v6588_v8, 288 }
 0x36f   : > { %v6521_v32 = vpop.xlane.xlu1 %2642  ;;  %v2875_v24 = vpop.xlane.xlu0 %2874  ;;  %vm3383_vm14 = vcmp.lt.s32.totalorder %v6619_v47, 288 }
 0x370   : > { %v2989_v58 = vmul.f32 2.0, %v2875_v24  ;;  %v3116_v45 = vadd.f32 1.0, %v3052_v46  ;;  %v3439_v0 = vsel %vm3375_vm6, %v3179_v5, 0.0 }
 0x372   : > { %v3053_v52 = vsub.f32 %v6498_v51, %v2989_v58  ;;  %v6591_v51 = vadd.s32 %v5880_v19, %v3252_v14 }
 0x373   : > { %v2878_v3 = vpop.xlane.xlu0 %2877  ;;  %v6523_v2 = vpop.xlane.xlu1 %2645 }
 0x374   : > { %v2990_v41 = vmul.f32 2.0, %v2878_v3  ;;  %v3177_v3 = vmax.f32 %v3113_v23, 0.0  ;;  %v3117_v27 = vadd.f32 1.0, %v3053_v52  ;;  %v3180_v23 = vmax.f32 %v3116_v45, 0.0 }
 0x375   : > { %vm3381_vm12 = vcmp.lt.s32.totalorder %v6591_v51, 288  ;;  %v3260_v51 = vadd.s32 400, %v5839_v40 }
 0x376   : > { %v3054_v31 = vsub.f32 %v6501_v54, %v2990_v41  ;;  %v3253_v54 = vadd.s32 344, %v5839_v40  ;;  %v3437_v9 = vsel %vm3373_vm4, %v3177_v3, 0.0  ;;  %v3181_v48 = vmax.f32 %v3117_v27, 0.0 }
 0x377   : > { %v2881_v30 = vpop.xlane.xlu0 %2880  ;;  %v6525_v16 = vpop.xlane.xlu1 %2648  ;;  %v3501_v25 = vadd.f32 %v3500_v36, %v3437_v9  ;;  %v3440_v3 = vsel %vm3376_vm7, %v3180_v23, 0.0 }
 0x378   : > { %v2991_v59 = vmul.f32 2.0, %v2881_v30  ;;  %v3118_v60 = vadd.f32 1.0, %v3054_v31  ;;  %v3441_v45 = vsel %vm3377_vm8, %v3181_v48, 0.0 }
 0x37a   : > { %v3182_v46 = vmax.f32 %v3118_v60, 0.0 }
 0x37b   : > { %v2884_v50 = vpop.xlane.xlu0 %2883  ;;  %v6529_v35 = vpop.xlane.xlu1 %2651 }
 0x37c   : > { %v2992_v21 = vmul.f32 2.0, %v2884_v50  ;;  %v3055_v50 = vsub.f32 %v6504_v1, %v2991_v59  ;;  %v6610_v1 = vadd.s32 %v5880_v19, %v3253_v54 }
 0x37e   : > { %v3056_v10 = vsub.f32 %v6509_v44, %v2992_v21  ;;  %v3119_v63 = vadd.f32 1.0, %v3055_v50  ;;  %vm3382_vm13 = vcmp.lt.s32.totalorder %v6610_v1, 288 }
 0x37f   : > { %v6527_v57 = vpop.xlane.xlu0 %2886  ;;  %v6533_v38 = vpop.xlane.xlu1 %2654 }
 0x380   : > { %v2993_v30 = vmul.f32 2.0, %v6527_v57  ;;  %v3438_v57 = vsel %vm3374_vm5, %v3178_v20, 0.0  ;;  %v3120_v12 = vadd.f32 1.0, %v3056_v10  ;;  %v3183_v29 = vmax.f32 %v3119_v63, 0.0 }
 0x381   : > { %v3259_v10 = vadd.s32 392, %v5839_v40 }
 0x382   : > { %v3057_v41 = vsub.f32 %v6513_v55, %v2993_v30  ;;  %v3256_v55 = vadd.s32 368, %v5839_v40  ;;  %v3184_v9 = vmax.f32 %v3120_v12, 0.0  ;;  %v3443_v22 = vsel %vm3379_vm10, %v3183_v29, 0.0 }
 0x383   : > { %v6531_v62 = vpop.xlane.xlu0 %2889  ;;  %v6539_v33 = vpop.xlane.xlu1 %2657 }
 0x384   : > { %v2994_v58 = vmul.f32 2.0, %v6531_v62  ;;  %v3502_v62 = vadd.f32 %v3501_v25, %v3438_v57  ;;  %v3121_v31 = vadd.f32 1.0, %v3057_v41  ;;  %v6640_v54 = vadd.s32 %v5880_v19, %v3256_v55 }
 0x385   : > { %v3444_v25 = vsel %vm3380_vm11, %v3184_v9, 0.0 }
 0x386   : > { %v3058_v11 = vsub.f32 %v6515_v17, %v2994_v58  ;;  %v3503_v59 = vadd.f32 %v3502_v62, %v3439_v0  ;;  %v3185_v36 = vmax.f32 %v3121_v31, 0.0  ;;  %vm3385_vm1 = vcmp.lt.s32.totalorder %v6640_v54, 288 }
 0x387   : > { %v6535_v49 = vpop.xlane.xlu0 %2892  ;;  %v6549_v7 = vpop.xlane.xlu1 %2660 }
 0x388   : > { %v2995_v44 = vmul.f32 2.0, %v6535_v49  ;;  %v6629_v49 = vadd.s32 %v5880_v19, %v3255_v26  ;;  %v3504_v30 = vadd.f32 %v3503_v59, %v3440_v3  ;;  %v3122_v5 = vadd.f32 1.0, %v3058_v11 }
 0x38a   : > { %v3059_v21 = vsub.f32 %v6517_v39, %v2995_v44  ;;  %v3505_v50 = vadd.f32 %v3504_v30, %v3441_v45  ;;  %vm3384_vm15 = vcmp.lt.s32.totalorder %v6629_v49, 288  ;;  %v6646_v39 = vadd.s32 %v5880_v19, %v3257_v13 }
 0x38b   : > { %v6537_v18 = vpop.xlane.xlu0 %2895  ;;  %v6569_v42 = vpop.xlane.xlu1 %2663  ;;  %v3186_v41 = vmax.f32 %v3122_v5, 0.0 }
 0x38c   : > { %v2996_v52 = vmul.f32 2.0, %v6537_v18  ;;  %v3442_v18 = vsel %vm3378_vm9, %v3182_v46, 0.0  ;;  %v3123_v57 = vadd.f32 1.0, %v3059_v21  ;;  %vm3386_vm2 = vcmp.lt.s32.totalorder %v6646_v39, 288 }
 0x38d   : > { %v3506_v23 = vadd.f32 %v3505_v50, %v3442_v18  ;;  %v3446_v3 = vsel %vm3382_vm13, %v3186_v41, 0.0 }
 0x38e   : > { %v3060_v27 = vsub.f32 %v6519_v37, %v2996_v52  ;;  %v3187_v63 = vmax.f32 %v3123_v57, 0.0 }
 0x38f   : > { %v6542_v53 = vpop.xlane.xlu0 %2898  ;;  %v6595_v4 = vpop.xlane.xlu1 %2666  ;;  %v3507_v0 = vadd.f32 %v3506_v23, %v3443_v22 }
 0x390   : > { %v2997_v17 = vmul.f32 2.0, %v6542_v53  ;;  %v3124_v26 = vadd.f32 1.0, %v3060_v27  ;;  %v3447_v13 = vsel %vm3383_vm14, %v3187_v63, 0.0  ;;  %v3262_v27 = vadd.s32 416, %v5839_v40 }
 0x391   : > { %v3508_v62 = vadd.f32 %v3507_v0, %v3444_v25 }
 0x392   : > { %v3061_v37 = vsub.f32 %v6521_v32, %v2997_v17  ;;  %v3445_v32 = vsel %vm3381_vm12, %v3185_v36, 0.0  ;;  %v3188_v12 = vmax.f32 %v3124_v26, 0.0  ;;  %v3325_v17 = vadd.s32 %v5880_v19, %v3260_v51 }
 0x393   : > { %v6551_v56 = vpop.xlane.xlu0 %2901  ;;  %v6622_v14 = vpop.xlane.xlu1 %2669  ;;  %v3509_v59 = vadd.f32 %v3508_v62, %v3445_v32  ;;  %v3327_v54 = vadd.s32 %v5880_v19, %v3262_v27 }
 0x394   : > { %v2998_v34 = vmul.f32 2.0, %v6551_v56  ;;  %v3125_v44 = vadd.f32 1.0, %v3061_v37  ;;  %vm3389_vm5 = vcmp.lt.s32.totalorder %v3325_v17, 288 }
 0x395   : > { %v3510_v21 = vadd.f32 %v3509_v59, %v3446_v3  ;;  %vm3391_vm7 = vcmp.lt.s32.totalorder %v3327_v54, 288  ;;  %v3266_v59 = vadd.s32 448, %v5839_v40 }
 0x396   : > { %v3062_v15 = vsub.f32 %v6523_v2, %v2998_v34  ;;  %v3324_v2 = vadd.s32 %v5880_v19, %v3259_v10  ;;  %v3189_v45 = vmax.f32 %v3125_v44, 0.0 }
 0x397   : > { %v6561_v43 = vpop.xlane.xlu0 %2904  ;;  %v6648_v53 = vpop.xlane.xlu1 %2672  ;;  %v3511_v9 = vadd.f32 %v3510_v21, %v3447_v13 }
 0x398   : > { %v2999_v56 = vmul.f32 2.0, %v6561_v43  ;;  %v3323_v43 = vadd.s32 %v5880_v19, %v3258_v61  ;;  %v3126_v11 = vadd.f32 1.0, %v3062_v15  ;;  %vm3388_vm4 = vcmp.lt.s32.totalorder %v3324_v2, 288 }
 0x399   : > { %v3449_v50 = vsel %vm3385_vm1, %v3189_v45, 0.0 }
 0x39a   : > { %vm3387_vm3 = vcmp.lt.s32.totalorder %v3323_v43, 288  ;;  %v3190_v30 = vmax.f32 %v3126_v11, 0.0 }
 0x39b   : > { %v6577_v24 = vpop.xlane.xlu0 %2907  ;;  %v6667_v46 = vpop.xlane.xlu1 %2675 }
 0x39c   : > { %v3000_v58 = vmul.f32 2.0, %v6577_v24  ;;  %v3063_v24 = vsub.f32 %v6525_v16, %v2999_v56  ;;  %v3261_v16 = vadd.s32 408, %v5839_v40 }
 0x39e   : > { %v3064_v55 = vsub.f32 %v6529_v35, %v3000_v58  ;;  %v3127_v35 = vadd.f32 1.0, %v3063_v24  ;;  %v3326_v47 = vadd.s32 %v5880_v19, %v3261_v16 }
 0x39f   : > { %v6597_v28 = vpop.xlane.xlu0 %2910  ;;  %v6683_v5 = vpop.xlane.xlu1 %2678 }
 0x3a0   : > { %v3001_v8 = vmul.f32 2.0, %v6597_v28  ;;  %v3128_v1 = vadd.f32 1.0, %v3064_v55  ;;  %v3191_v36 = vmax.f32 %v3127_v35, 0.0  ;;  %vm3390_vm6 = vcmp.lt.s32.totalorder %v3326_v47, 288 }
 0x3a1   : > { %v3265_v55 = vadd.s32 440, %v5839_v40 }
 0x3a2   : > { %v3065_v29 = vsub.f32 %v6533_v38, %v3001_v8  ;;  %v3192_v57 = vmax.f32 %v3128_v1, 0.0  ;;  %v3451_v25 = vsel %vm3387_vm3, %v3191_v36, 0.0  ;;  %v3269_v36 = vadd.s32 472, %v5839_v40 }
 0x3a3   : > { %v6613_v6 = vpop.xlane.xlu0 %2913  ;;  %v2682_v32 = vpop.xlane.xlu1 %2681 }
 0x3a4   : > { %v3002_v52 = vmul.f32 2.0, %v6613_v6  ;;  %v3448_v6 = vsel %vm3384_vm15, %v3188_v12, 0.0  ;;  %v3129_v49 = vadd.f32 1.0, %v3065_v29  ;;  %v3452_v39 = vsel %vm3388_vm4, %v3192_v57, 0.0 }
 0x3a5   : > { %v3512_v22 = vadd.f32 %v3511_v9, %v3448_v6  ;;  %v3330_v29 = vadd.s32 %v5880_v19, %v3265_v55 }
 0x3a6   : > { %v3066_v18 = vsub.f32 %v6539_v33, %v3002_v52  ;;  %v3263_v33 = vadd.s32 424, %v5839_v40  ;;  %v3193_v41 = vmax.f32 %v3129_v49, 0.0 }
 0x3a7   : > { %v2917_v20 = vpop.xlane.xlu0 %2916  ;;  %v2685_v45 = vpop.xlane.xlu1 %2684  ;;  %vm3394_vm10 = vcmp.lt.s32.totalorder %v3330_v29, 288 }
 0x3a8   : > { %v3003_v28 = vmul.f32 2.0, %v2917_v20  ;;  %v3130_v37 = vadd.f32 1.0, %v3066_v18  ;;  %v3453_v51 = vsel %vm3389_vm5, %v3193_v41, 0.0  ;;  %v3271_v41 = vadd.s32 488, %v5839_v40 }
 0x3aa   : > { %v3067_v38 = vsub.f32 %v6549_v7, %v3003_v28  ;;  %v3513_v7 = vadd.f32 %v3512_v22, %v3449_v50  ;;  %v3194_v63 = vmax.f32 %v3130_v37, 0.0  ;;  %v3336_v55 = vadd.s32 %v5880_v19, %v3271_v41 }
 0x3ab   : > { %v2920_v60 = vpop.xlane.xlu0 %2919 }
 0x3ac   : > { %v3004_v20 = vmul.f32 2.0, %v2920_v60  ;;  %v3450_v60 = vsel %vm3386_vm2, %v3190_v30, 0.0  ;;  %v3131_v10 = vadd.f32 1.0, %v3067_v38  ;;  %vm3400_vm1 = vcmp.lt.s32.totalorder %v3336_v55, 288 }
 0x3ad   : > { %v3514_v0 = vadd.f32 %v3513_v7, %v3450_v60 }
 0x3ae   : > { %v3068_v56 = vsub.f32 %v6569_v42, %v3004_v20  ;;  %v3264_v42 = vadd.s32 432, %v5839_v40  ;;  %v3195_v43 = vmax.f32 %v3131_v10, 0.0  ;;  %v3331_v20 = vadd.s32 %v5880_v19, %v3266_v59 }
 0x3af   : > { %v2923_v48 = vpop.xlane.xlu0 %2922  ;;  %v3515_v62 = vadd.f32 %v3514_v0, %v3451_v25  ;;  %v3334_v25 = vadd.s32 %v5880_v19, %v3269_v36  ;;  %v3273_v59 = vadd.s32 504, %v5839_v40 }
 0x3b0   : > { %v3005_v61 = vmul.f32 2.0, %v2923_v48  ;;  %v3328_v48 = vadd.s32 %v5880_v19, %v3263_v33  ;;  %v3132_v44 = vadd.f32 1.0, %v3068_v56  ;;  %v3329_v52 = vadd.s32 %v5880_v19, %v3264_v42  ;;  %v2688_v33 = vpop.xlane.xlu1 %2687 }
 0x3b1   : > { %v3516_v11 = vadd.f32 %v3515_v62, %v3452_v39  ;;  %v3455_v35 = vsel %vm3391_vm7, %v3195_v43, 0.0  ;;  %vm3395_vm11 = vcmp.lt.s32.totalorder %v3331_v20, 288  ;;  %v3270_v56 = vadd.s32 480, %v5839_v40 }
 0x3b2   : > { %v3069_v26 = vsub.f32 %v6595_v4, %v3005_v61  ;;  %vm3392_vm8 = vcmp.lt.s32.totalorder %v3328_v48, 288  ;;  %v3196_v16 = vmax.f32 %v3132_v44, 0.0  ;;  %vm3393_vm9 = vcmp.lt.s32.totalorder %v3329_v52, 288 }
 0x3b3   : > { %v2926_v31 = vpop.xlane.xlu0 %2925  ;;  %v3517_v13 = vadd.f32 %v3516_v11, %v3453_v51  ;;  %v3335_v42 = vadd.s32 %v5880_v19, %v3270_v56  ;;  %vm3398_vm14 = vcmp.lt.s32.totalorder %v3334_v25, 288 }
 0x3b4   : > { %v3006_v23 = vmul.f32 2.0, %v2926_v31  ;;  %v3133_v2 = vadd.f32 1.0, %v3069_v26  ;;  %v3456_v9 = vsel %vm3392_vm8, %v3196_v16, 0.0  ;;  %v2691_v62 = vpop.xlane.xlu1 %2690 }
 0x3b5   : > { %vm3399_vm15 = vcmp.lt.s32.totalorder %v3335_v42, 288 }
 0x3b6   : > { %v3070_v24 = vsub.f32 %v6622_v14, %v3006_v23  ;;  %v3454_v14 = vsel %vm3390_vm6, %v3194_v63, 0.0  ;;  %v3197_v1 = vmax.f32 %v3133_v2, 0.0  ;;  %v3272_v63 = vadd.s32 496, %v5839_v40 }
 0x3b7   : > { %v2929_v34 = vpop.xlane.xlu0 %2928  ;;  %v3518_v18 = vadd.f32 %v3517_v13, %v3454_v14 }
 0x3b8   : > { %v3007_v15 = vmul.f32 2.0, %v2929_v34  ;;  %v3134_v28 = vadd.f32 1.0, %v3070_v24  ;;  %v3337_v52 = vadd.s32 %v5880_v19, %v3272_v63 }
 0x3b9   : > { %v3519_v34 = vadd.f32 %v3518_v18, %v3455_v35 }
 0x3ba   : > { %v3071_v3 = vsub.f32 %v6648_v53, %v3007_v15  ;;  %v3267_v53 = vadd.s32 456, %v5839_v40  ;;  %v3198_v47 = vmax.f32 %v3134_v28, 0.0  ;;  %vm3401_vm2 = vcmp.lt.s32.totalorder %v3337_v52, 288 }
 0x3bb   : > { %v2932_v58 = vpop.xlane.xlu0 %2931  ;;  %v3520_v60 = vadd.f32 %v3519_v34, %v3456_v9 }
 0x3bc   : > { %v3008_v8 = vmul.f32 2.0, %v2932_v58  ;;  %v3135_v17 = vadd.f32 1.0, %v3071_v3  ;;  %v3332_v50 = vadd.s32 %v5880_v19, %v3267_v53  ;;  %v3458_v23 = vsel %vm3394_vm10, %v3198_v47, 0.0  ;;  %v2694_v53 = vpop.xlane.xlu1 %2693 }
 0x3be   : > { %v3072_v31 = vsub.f32 %v6667_v46, %v3008_v8  ;;  %v3268_v46 = vadd.s32 464, %v5839_v40  ;;  %v3199_v61 = vmax.f32 %v3135_v17, 0.0  ;;  %vm3396_vm12 = vcmp.lt.s32.totalorder %v3332_v50, 288 }
 0x3bf   : > { %v2935_v4 = vpop.xlane.xlu0 %2934 }
 0x3c0   : > { %v3009_v12 = vmul.f32 2.0, %v2935_v4  ;;  %v3136_v27 = vadd.f32 1.0, %v3072_v31  ;;  %v3333_v37 = vadd.s32 %v5880_v19, %v3268_v46  ;;  %v3459_v15 = vsel %vm3395_vm11, %v3199_v61, 0.0 }
 0x3c2   : > { %v3073_v6 = vsub.f32 %v6683_v5, %v3009_v12  ;;  %v3457_v5 = vsel %vm3393_vm9, %v3197_v1, 0.0  ;;  %v3200_v7 = vmax.f32 %v3136_v27, 0.0  ;;  %vm3397_vm13 = vcmp.lt.s32.totalorder %v3333_v37, 288 }
 0x3c3   : > { %v2938_v21 = vpop.xlane.xlu0 %2937  ;;  %v3521_v58 = vadd.f32 %v3520_v60, %v3457_v5  ;;  %v3338_v1 = vadd.s32 %v5880_v19, %v3273_v59  ;;  %v3467_v19 = vld [vmem:[#allocation4] sm:$0x1] }
 0x3c4   : > { %v3010_v30 = vmul.f32 2.0, %v2938_v21  ;;  %v3137_v22 = vadd.f32 1.0, %v3073_v6  ;;  %v3460_v44 = vsel %vm3396_vm12, %v3200_v7, 0.0 }
 0x3c5   : > { %v3522_v48 = vadd.f32 %v3521_v58, %v3458_v23  ;;  %vm3402_vm3 = vcmp.lt.s32.totalorder %v3338_v1, 288 }
 0x3c6   : > { %v3074_v38 = vsub.f32 %v2682_v32, %v3010_v30  ;;  %v3201_v0 = vmax.f32 %v3137_v22, 0.0 }
 0x3c7   : > { %v2941_v49 = vpop.xlane.xlu0 %2940  ;;  %v3523_v43 = vadd.f32 %v3522_v48, %v3459_v15 }
 0x3c8   : > { %v3011_v57 = vmul.f32 2.0, %v2941_v49  ;;  %v3138_v54 = vadd.f32 1.0, %v3074_v38  ;;  %v3461_v51 = vsel %vm3397_vm13, %v3201_v0, 0.0 }
 0x3c9   : > { %v3524_v11 = vadd.f32 %v3523_v43, %v3460_v44 }
 0x3ca   : > { %v3075_v10 = vsub.f32 %v2685_v45, %v3011_v57  ;;  %v3202_v24 = vmax.f32 %v3138_v54, 0.0 }
 0x3cb   : > { %v2944_v26 = vpop.xlane.xlu0 %2943  ;;  %v3525_v31 = vadd.f32 %v3524_v11, %v3461_v51 }
 0x3cc   : > { %v3139_v39 = vadd.f32 1.0, %v3075_v10  ;;  %v3012_v32 = vmul.f32 2.0, %v2944_v26  ;;  %v3462_v14 = vsel %vm3398_vm14, %v3202_v24, 0.0 }
 0x3cd   : > { %v3526_v21 = vadd.f32 %v3525_v31, %v3462_v14 }
 0x3ce   : > { %v3076_v8 = vsub.f32 %v2688_v33, %v3012_v32  ;;  %v3203_v2 = vmax.f32 %v3139_v39, 0.0  ;;  %v3548_v33 = vsub.s32 0, %v5839_v40 }
 0x3cf   : > { %v2947_v4 = vpop.xlane.xlu0 %2946 }
 0x3d0   : > { %v3140_v3 = vadd.f32 1.0, %v3076_v8  ;;  %v3013_v12 = vmul.f32 2.0, %v2947_v4  ;;  %v3463_v45 = vsel %vm3399_vm15, %v3203_v2, 0.0 }
 0x3d1   : > { %v3527_v18 = vadd.f32 %v3526_v21, %v3463_v45 }
 0x3d2   : > { %v3204_v16 = vmax.f32 %v3140_v3, 0.0  ;;  %v3077_v28 = vsub.f32 %v2691_v62, %v3013_v12 }
 0x3d3   : > { %v2950_v13 = vpop.xlane.xlu0 %2949 }
 0x3d4   : > { %v3141_v35 = vadd.f32 1.0, %v3077_v28  ;;  %v3014_v29 = vmul.f32 2.0, %v2950_v13  ;;  %v3464_v17 = vsel %vm3400_vm1, %v3204_v16, 0.0 }
 0x3d5   : > { %v3528_v9 = vadd.f32 %v3527_v18, %v3464_v17 }
 0x3d6   : > { %v3205_v6 = vmax.f32 %v3141_v35, 0.0  ;;  %v3078_v30 = vsub.f32 %v2694_v53, %v3014_v29 }
 0x3d8   : > { %v3465_v20 = vsel %vm3401_vm2, %v3205_v6, 0.0  ;;  %v3142_v46 = vadd.f32 1.0, %v3078_v30 }
 0x3d9   : > { %v3529_v27 = vadd.f32 %v3528_v9, %v3465_v20 }
 0x3da   : > { %v3206_v47 = vmax.f32 %v3142_v46, 0.0 }
 0x3dc   : > { %v3466_v38 = vsel %vm3402_vm3, %v3206_v47, 0.0 }
 0x3dd   : > { %v3530_v34 = vadd.f32 %v3529_v27, %v3466_v38 }
 0x3df   : > { %v3531_v50 = vrot.slane %v3530_v34, 4 }
 0x3e1   : > { %v3532_v36 = vadd.f32 %v3531_v50, %v3530_v34 }
 0x3e3   : > { %v3533_v49 = vrot.slane %v3532_v36, 2 }
 0x3e5   : > { %v3534_v5 = vadd.f32 %v3533_v49, %v3532_v36 }
 0x3e7   : > { %v3535_v61 = vrot.slane %v3534_v5, 1 }
 0x3e9   : > { %v3536_v22 = vadd.f32 %v3535_v61, %v3534_v5 }
 0x3eb   : > { %v3537_v57 = vadd.f32 %v3536_v22, %v3467_v19 }
 0x3ed   : > { %3539 = vst.msk [vmem:[#allocation4] sm:$0x1] %vm440_vm0, %v3537_v57 }
 0x3f4   : > { %v3543_v60 = vld [vmem:[#allocation4] sm:$0x1] }
 0x3f5   : > { %v3544_v37 = vmul.f32 0.0034722222, %v3543_v60 }
 0x3f7   : > { %v3549_v56 = vrot.slane %v3544_v37, %v3548_v33 }
 0x3f9   : > { %3551 = vperm.xlu0 %4210, %v3549_v56  }
 0x478   : > { %v3552_v40 = vpop.permute.xlu0 %3551 }
 0x479   : > { %3554 = vst [vmem:[%s277_s14] sm:$0xff] %v3552_v40 }
 0x47a   : > { %4227 = shalt.err (!%p4224_p5)
}
 0x47b   : > { %s4228_s10 = scalar_lea.hbm %s6736_s24, 128  ;;  %s4232_s25 = scalar_lea.hbm %s6786_s5, 256 }
 0x47c   : > { %p4229_p6 = scmp.ne.s32.totalorder %s6736_s24, %s4228_s10  ;;  %p4233_p10 = scmp.lt.u32.totalorder %s6736_s24, %s6786_s5 }
 0x47d   : > { %p4234_p11 = scmp.lt.u32.totalorder %s4232_s25, %s4228_s10  ;;  %p4236_p13 = scmp.lt.u32.totalorder %s4228_s10, %s6736_s24 }
 0x47e   : > { %p4230_p7 = pnand %p4229_p6, %p4367_p4 }
 0x47f   : > { %p4235_p12 = por %p4234_p11, %p4233_p10 }
 0x480   : > { %p4231_p9 = pneg %p4230_p7 }
 0x481   : > { %p4237_p0 = por %p4236_p13, %p4235_p12 }
 0x483   : > { %p4238_p1 = pnand %p4237_p0, %p4231_p9 }
 0x485   : > { %4241 = shalt.err (!%p4238_p1)
}
 0x486   : > { %4153 = dma.vmem_to_hbm [thread:$0]  (%p4367_p4), %s6731_s15, 128, %s6736_s24, %s3556_s27  }
 0x487 PF: > { %p4159_p2 = scmp.ge.s32.totalorder %s4292_s23, 2  ;;  %s3581_s13 = sand.u32 1, %s4272_s18  }
 0x488   : > { %s3582_s16 = scalar_lea.sflag [#allocation6], %s3581_s13 }
 0x489   : > { %p4156_p3 = pnand %p4159_p2, %p4374_p8 }
 0x48b   : > { %4267 = dma.done.wait (!%p4156_p3), %s3582_s16, 128  }
 0x48c   : > { %4269 = vsyncadd (!%p4156_p3), %s3582_s16, 4294967168  ;;  %s18_s23 = sadd.s32 1, %s4292_s23   ;;  %s6992_s18 = smov %s4276_s19 }
 0x48d   : > { %p15_p5 = scmp.ge.s32.totalorder %s18_s23, 4   ;;  %s6993_s19 = smov %s4280_s20 }
 0x48e   : > { %s6994_s20 = smov %s4380_s6  ;;  %s6995_s21 = smov %s4288_s22 }
 0x48f   : > { %s6996_s22 = smov %s6998_s26  ;;  %17 = sbr.rel (!%p15_p5) target bundleno = 4 (0x4), region = 89 }
 0x496   :  { %3587 = vsyncpa [#allocation6], 1 }
 0x497   :  { %3589 = vsyncpa [#allocation6 + $0x1], 1 }

</bundles_post_ra>
